<compile_context>
chip_gen: v7x
topology: tpu7x:2x2x1
jax: 0.10.0
libtpu: 0.0.40
codegen_flags: <defaults>
</compile_context>

<pallas_src>
import functools

import jax
import jax.numpy as jnp
from jax import lax
from jax.experimental import pallas as pl
from jax.experimental.pallas import tpu as pltpu


def _round_up(x, m):
    return (x + m - 1) // m * m


# ----------------------------------------------------------------------------
# Kernel: one time-chunk of the 2-layer LSTM + fused, hoisted prediction heads.
# ----------------------------------------------------------------------------
def _death_pred_kernel(
    x_ref,                        # (CT, BNc, F)   bf16  time-major input chunk
    wih1_ref, whh1_ref, b1_ref,   # (F,4Hp),(Hp,4Hp) bf16, (1,4Hp) f32 : LSTM layer 0
    wih2_ref, whh2_ref, b2_ref,   # (Hp,4Hp),(Hp,4Hp) bf16, (1,4Hp) f32 : LSTM layer 1
    wh1_ref, bh1_ref,             # (Hp,2Hp) bf16, (1,2Hp) f32 : fused [state|death] ReLU layer
    wh2_ref, bh2_ref,             # (2Hp,O)  bf16, (1,O)  f32  : block-diag -> [state|death_logit|0..]
    out_ref,                      # (CT, BNc, O) f32
    h1_ref, c1_ref, h2_ref, c2_ref,   # (BNc, Hp) f32 scratch, carried across time chunks
    xg_ref,                       # (CT, BNc, 4Hp) f32 scratch : hoisted layer-0 projection
    h2s_ref,                      # (CT, BNc, Hp)  f32 scratch : per-step layer-1 outputs
):
    t_chunk = pl.program_id(1)
    CT, BNc, F = x_ref.shape
    Hp = h1_ref.shape[-1]
    O = out_ref.shape[-1]
    bf16 = jnp.bfloat16

    @pl.when(t_chunk == 0)
    def _():
        h1_ref[...] = jnp.zeros_like(h1_ref)
        c1_ref[...] = jnp.zeros_like(c1_ref)
        h2_ref[...] = jnp.zeros_like(h2_ref)
        c2_ref[...] = jnp.zeros_like(c2_ref)

    # ---- Time-parallel work hoisted out of the recurrence --------------------
    # Layer-0 input projection for ALL CT timesteps of the chunk in one MXU call.
    x_flat = x_ref[...].reshape(CT * BNc, F)                       # bf16, no f32 round-trip
    xg = jnp.dot(x_flat, wih1_ref[...], preferred_element_type=jnp.float32)
    xg_ref[...] = (xg + b1_ref[...]).reshape(CT, BNc, 4 * Hp)      # (1,4Hp) sublane-bcast add

    # Hoisted once per chunk: recurrent weights / slim bias.
    whh1 = whh1_ref[...]
    wih2 = wih2_ref[...]
    whh2 = whh2_ref[...]
    b2 = b2_ref[...]                                               # (1,4Hp): slim add

    # State loaded/stored to the persistent scratch once per chunk.
    h1 = h1_ref[...]
    c1 = c1_ref[...]
    h2 = h2_ref[...]
    c2 = c2_ref[...]

    def gates(z):
        # PyTorch gate order i, f, g, o — each slice is a full 128-lane tile (Hp%128==0).
        return (jax.nn.sigmoid(z[:, 0 * Hp:1 * Hp]),
                jax.nn.sigmoid(z[:, 1 * Hp:2 * Hp]),
                jnp.tanh(z[:, 2 * Hp:3 * Hp]),
                jax.nn.sigmoid(z[:, 3 * Hp:4 * Hp]))

    # ---- Serial recurrence: only the h @ W_hh-style matmuls + gate math ------
    # CT is small & static; bulky tensors flow through the VMEM scratches, so
    # the per-iteration live set is just the four (BNc,Hp) states -> a fully
    # unrolled loop stays within the vreg file.
    # TODO(synk): nn.LSTM inter-layer dropout (p=0.2) is train-time only; this
    # kernel implements eval()/inference semantics.
    # TODO(synk): h is downcast to bf16 for the recurrent matmuls (f32 accum);
    # keep the contraction fully f32 if exact long-horizon torch parity matters.
    for ct in range(CT):
        # LSTM layer 0: hoisted input projection + recurrent matmul.
        g = xg_ref[ct] + jnp.dot(h1.astype(bf16), whh1,
                                 preferred_element_type=jnp.float32)
        i_g, f_g, g_g, o_g = gates(g)
        c1 = f_g * c1 + i_g * g_g
        h1 = o_g * jnp.tanh(c1)

        # LSTM layer 1: two dots accumulated (no lane-concat on the serial path).
        g = (jnp.dot(h1.astype(bf16), wih2, preferred_element_type=jnp.float32)
             + jnp.dot(h2.astype(bf16), whh2, preferred_element_type=jnp.float32)
             + b2)
        i_g, f_g, g_g, o_g = gates(g)
        c2 = f_g * c2 + i_g * g_g
        h2 = o_g * jnp.tanh(c2)

        h2s_ref[ct] = h2

    # Carried state written back once per chunk.
    h1_ref[...] = h1
    c1_ref[...] = c1
    h2_ref[...] = h2
    c2_ref[...] = c2

    # ---- Fused heads, batched over the whole chunk; one lane-dense store -----
    hs = h2s_ref[...].reshape(CT * BNc, Hp).astype(bf16)
    ph = jnp.maximum(
        jnp.dot(hs, wh1_ref[...], preferred_element_type=jnp.float32)
        + bh1_ref[...], 0.0)                                        # (CT*BNc, 2Hp)
    head = (jnp.dot(ph.astype(bf16), wh2_ref[...],
                    preferred_element_type=jnp.float32) + bh2_ref[...])  # (CT*BNc, O)
    out_ref[...] = head.reshape(CT, BNc, O)


# ----------------------------------------------------------------------------
# VMEM budget estimate (for explicit vmem_limit_bytes).
# ----------------------------------------------------------------------------
def _estimate_vmem_bytes(ct, bnc, f_dim, hp, o_dim, packed, weight_bufs):
    w = sum(int(v.size) * v.dtype.itemsize for v in packed.values()) * weight_bufs
    io = 2 * ct * bnc * f_dim * 2 + 2 * ct * bnc * o_dim * 4        # double-buffered x / out
    scratch = (4 * bnc * hp + ct * bnc * 4 * hp + ct * bnc * hp) * 4
    temps = ct * bnc * (4 * hp + 2 * hp + hp + o_dim) * 4           # xg value, ph, hs, head
    return int(1.5 * (w + io + scratch + temps)) + (2 << 20)


# ----------------------------------------------------------------------------
# Wrapper
# ----------------------------------------------------------------------------
def death_prediction_forward(states, actions, masks, packed, *,
                             hidden_dim, time_chunk=16, bn_chunks=None,
                             weight_buffering=None):
    """states: (B,T,N,S), actions: (B,T,N,A), masks: (B,T,N) ->
       (state_pred (B,T,N,S), death_probs (B,T,N))."""
    B, T, N, S = states.shape
    A = actions.shape[-1]
    F = S + A + 1
    BN = B * N
    Hp = packed["whh1"].shape[0]          # lane-padded hidden dim (multiple of 128)
    O = packed["wh2"].shape[1]            # lane-padded head output (multiple of 128)
    assert Hp >= hidden_dim and Hp % 128 == 0 and O % 128 == 0

    # One concat + ONE layout transpose to time-major (T, B*N, F); the original
    # module does permute+reshape on both sides.
    inp = jnp.concatenate(
        [states, actions, masks[..., None].astype(states.dtype)], axis=-1)
    x = jnp.transpose(inp, (1, 0, 2, 3)).reshape(T, BN, F).astype(jnp.bfloat16)

    # Batch-chunk count: the "parallel" axis lets v7x shard rows across its two
    # TensorCores; only worth it when each chunk still fills the MXU rows.
    if bn_chunks is None:
        bn_chunks = 2 if BN >= 512 else 1

    # Pad batch rows so each chunk is a multiple of 16 (bf16 sublane packing and
    # tile-aligned in-kernel reshapes).  Padded rows are zero; sliced off below.
    BNp = _round_up(BN, 16 * bn_chunks)
    if BNp != BN:
        x = jnp.pad(x, ((0, 0), (0, BNp - BN), (0, 0)))
    BNc = BNp // bn_chunks

    # Time-chunk size: largest divisor of T not exceeding `time_chunk`.
    ct = max(d for d in range(1, min(time_chunk, T) + 1) if T % d == 0)
    grid = (bn_chunks, T // ct)

    def wspec(arr):
        nd = arr.ndim
        imap = lambda b, t, _nd=nd: (0,) * _nd
        if weight_buffering is not None:
            # e.g. weight_buffering=1 on v7x: constant-index blocks never change,
            # single-buffering halves their VMEM footprint.
            return pl.BlockSpec(arr.shape, imap,
                                pipeline_mode=pl.Buffered(weight_buffering))
        return pl.BlockSpec(arr.shape, imap)

    vmem_limit = min(64 << 20, max(32 << 20, _estimate_vmem_bytes(
        ct, BNc, F, Hp, O, packed, weight_buffering or 2)))

    out = pl.pallas_call(
        _death_pred_kernel,
        out_shape=jax.ShapeDtypeStruct((T, BNp, O), jnp.float32),
        grid_spec=pltpu.PrefetchScalarGridSpec(
            num_scalar_prefetch=0,
            grid=grid,
            in_specs=[
                pl.BlockSpec((ct, BNc, F), lambda b, t: (t, b, 0)),
                wspec(packed["wih1"]), wspec(packed["whh1"]), wspec(packed["b1"]),
                wspec(packed["wih2"]), wspec(packed["whh2"]), wspec(packed["b2"]),
                wspec(packed["wh1"]), wspec(packed["bh1"]),
                wspec(packed["wh2"]), wspec(packed["bh2"]),
            ],
            out_specs=pl.BlockSpec((ct, BNc, O), lambda b, t: (t, b, 0)),
            scratch_shapes=[
                pltpu.VMEM((BNc, Hp), jnp.float32),        # h, layer 0
                pltpu.VMEM((BNc, Hp), jnp.float32),        # c, layer 0
                pltpu.VMEM((BNc, Hp), jnp.float32),        # h, layer 1
                pltpu.VMEM((BNc, Hp), jnp.float32),        # c, layer 1
                pltpu.VMEM((ct, BNc, 4 * Hp), jnp.float32),  # hoisted input projection
                pltpu.VMEM((ct, BNc, Hp), jnp.float32),      # per-step h2 for the heads
            ],
        ),
        compiler_params=pltpu.CompilerParams(
            # Batch chunks are independent -> "parallel" (shardable across v7x's
            # two TensorCores); the time axis is recurrent -> "arbitrary".
            dimension_semantics=("parallel", "arbitrary"),
            vmem_limit_bytes=vmem_limit,
        ),
    )(x, packed["wih1"], packed["whh1"], packed["b1"],
      packed["wih2"], packed["whh2"], packed["b2"],
      packed["wh1"], packed["bh1"], packed["wh2"], packed["bh2"])

    out = out[:, :BN]                                             # drop padded rows
    out = out.reshape(T, B, N, O).transpose(1, 0, 2, 3)           # (B, T, N, O)
    state_pred = out[..., :S]
    death_probs = jax.nn.sigmoid(out[..., S])                     # sigmoid on the death lane
    return state_pred, death_probs


# ----------------------------------------------------------------------------
# Parameters: raw (torch-equivalent) init + one-time packing for the kernel.
# ----------------------------------------------------------------------------
def init_raw_params(key, state_dim, action_dim, hidden_dim):
    """Xavier-uniform weights, zero biases (matches the module's explicit init)."""
    F = state_dim + action_dim + 1
    H = hidden_dim

    def xavier(k, out_dim, in_dim):
        bound = (6.0 / (in_dim + out_dim)) ** 0.5
        # torch layout is (out, in); stored pre-transposed to (in, out).
        return jax.random.uniform(k, (out_dim, in_dim), jnp.float32, -bound, bound).T

    ks = jax.random.split(key, 8)
    return {
        # LSTM layer 0 / layer 1.  b* holds b_ih + b_hh folded (both zero here);
        # a real torch-weight loader must SUM the two bias vectors.
        "wih1": xavier(ks[0], 4 * H, F), "whh1": xavier(ks[1], 4 * H, H),
        "b1": jnp.zeros((1, 4 * H), jnp.float32),
        "wih2": xavier(ks[2], 4 * H, H), "whh2": xavier(ks[3], 4 * H, H),
        "b2": jnp.zeros((1, 4 * H), jnp.float32),
        # state head
        "ws1": xavier(ks[4], H, H), "bs1": jnp.zeros((1, H), jnp.float32),
        "ws2": xavier(ks[5], state_dim, H), "bs2": jnp.zeros((1, state_dim), jnp.float32),
        # death head
        "wd1": xavier(ks[6], H, H), "bd1": jnp.zeros((1, H), jnp.float32),
        "wd2": xavier(ks[7], 1, H), "bd2": jnp.zeros((1, 1), jnp.float32),
    }


def pack_params(raw, state_dim, hidden_dim):
    """One-time packing: lane-pad hidden dim to 128, fuse heads, pad head output
    to 128 lanes, cast matmul operands to bf16.  Zero-padding keeps the LSTM
    math exact (padded hidden/cell lanes stay 0 for zero initial state)."""
    H, S = hidden_dim, state_dim
    Hp = _round_up(H, 128)
    O = _round_up(S + 1, 128)
    bf16 = jnp.bfloat16

    def pad_gate_cols(w, rows_to=None):
        # w: (in, 4H), gate order i,f,g,o -> (rows_to, 4Hp), each gate block padded.
        inn = w.shape[0]
        rows = rows_to if rows_to is not None else inn
        out = jnp.zeros((rows, 4 * Hp), jnp.float32)
        for k in range(4):
            out = out.at[:inn, k * Hp:k * Hp + H].set(w[:, k * H:(k + 1) * H])
        return out

    def pad_gate_bias(b):
        out = jnp.zeros((1, 4 * Hp), jnp.float32)
        for k in range(4):
            out = out.at[:, k * Hp:k * Hp + H].set(b[:, k * H:(k + 1) * H])
        return out

    wih1 = pad_gate_cols(raw["wih1"])                  # (F,  4Hp)
    whh1 = pad_gate_cols(raw["whh1"], rows_to=Hp)      # (Hp, 4Hp)
    wih2 = pad_gate_cols(raw["wih2"], rows_to=Hp)      # (Hp, 4Hp)
    whh2 = pad_gate_cols(raw["whh2"], rows_to=Hp)      # (Hp, 4Hp)

    # Fused head layer 1: [state | death] ReLU hiddens, each padded to Hp lanes.
    wh1 = jnp.zeros((Hp, 2 * Hp), jnp.float32)
    wh1 = wh1.at[:H, :H].set(raw["ws1"]).at[:H, Hp:Hp + H].set(raw["wd1"])
    bh1 = jnp.zeros((1, 2 * Hp), jnp.float32)
    bh1 = bh1.at[:, :H].set(raw["bs1"]).at[:, Hp:Hp + H].set(raw["bd1"])

    # Fused head layer 2 (block-diagonal), lane-padded output [state | death_logit | 0..].
    wh2 = jnp.zeros((2 * Hp, O), jnp.float32)
    wh2 = wh2.at[:H, :S].set(raw["ws2"]).at[Hp:Hp + H, S:S + 1].set(raw["wd2"])
    bh2 = jnp.zeros((1, O), jnp.float32)
    bh2 = bh2.at[:, :S].set(raw["bs2"]).at[:, S:S + 1].set(raw["bd2"])

    return {
        "wih1": wih1.astype(bf16), "whh1": whh1.astype(bf16), "b1": pad_gate_bias(raw["b1"]),
        "wih2": wih2.astype(bf16), "whh2": whh2.astype(bf16), "b2": pad_gate_bias(raw["b2"]),
        "wh1": wh1.astype(bf16), "bh1": bh1,
        "wh2": wh2.astype(bf16), "bh2": bh2,
    }


# ----------------------------------------------------------------------------
# Pure-JAX reference (un-fused, un-padded math, same bf16-operand precision).
# ----------------------------------------------------------------------------
def reference_forward(states, actions, masks, raw, hidden_dim):
    B, T, N, S = states.shape
    H = hidden_dim
    inp = jnp.concatenate(
        [states, actions, masks[..., None].astype(states.dtype)], axis=-1)
    x = jnp.transpose(inp, (0, 2, 1, 3)).reshape(B * N, T, -1)
    xs = jnp.swapaxes(x, 0, 1).astype(jnp.bfloat16)              # (T, BN, F)

    def mm(a, w):
        return jnp.dot(a.astype(jnp.bfloat16), w.astype(jnp.bfloat16),
                       preferred_element_type=jnp.float32)

    def cell(x_t, h, c, wih, whh, b):
        z = mm(x_t, wih) + mm(h, whh) + b
        i = jax.nn.sigmoid(z[:, :H]); f = jax.nn.sigmoid(z[:, H:2 * H])
        g = jnp.tanh(z[:, 2 * H:3 * H]); o = jax.nn.sigmoid(z[:, 3 * H:])
        c = f * c + i * g
        return o * jnp.tanh(c), c

    def step(carry, x_t):
        h1, c1, h2, c2 = carry
        h1, c1 = cell(x_t, h1, c1, raw["wih1"], raw["whh1"], raw["b1"])
        h2, c2 = cell(h1, h2, c2, raw["wih2"], raw["whh2"], raw["b2"])
        return (h1, c1, h2, c2), h2

    z0 = jnp.zeros((B * N, H), jnp.float32)
    _, hs = lax.scan(step, (z0, z0, z0, z0), xs)                 # (T, BN, H)

    s = mm(jnp.maximum(mm(hs, raw["ws1"]) + raw["bs1"], 0.0), raw["ws2"]) + raw["bs2"]
    d = jax.nn.sigmoid(
        mm(jnp.maximum(mm(hs, raw["wd1"]) + raw["bd1"], 0.0), raw["wd2"]) + raw["bd2"])
    sp = jnp.transpose(s, (1, 0, 2)).reshape(B, N, T, S).transpose(0, 2, 1, 3)
    dp = jnp.transpose(d, (1, 0, 2)).reshape(B, N, T, 1).transpose(0, 2, 1, 3)[..., 0]
    return sp, dp


if __name__ == "__main__":
    # Small shapes; N=5 exercises the batch-row padding, hidden_dim=32 exercises
    # the lane-padding of the hidden dim (32 -> 128), time_chunk=4 on T=8
    # exercises the cross-chunk recurrent state carry.
    B, T, N = 2, 8, 5
    state_dim, action_dim, hidden_dim = 16, 8, 32

    key = jax.random.PRNGKey(0)
    k_s, k_a, k_m, k_p = jax.random.split(key, 4)

    states = jax.random.normal(k_s, (B, T, N, state_dim), jnp.float32)
    actions = jax.random.normal(k_a, (B, T, N, action_dim), jnp.float32)
    masks = (jax.random.uniform(k_m, (B, T, N)) > 0.5).astype(jnp.float32)

    raw = init_raw_params(k_p, state_dim, action_dim, hidden_dim)
    packed = pack_params(raw, state_dim, hidden_dim)    # packed once, outside jit

    fwd = jax.jit(functools.partial(
        death_prediction_forward, hidden_dim=hidden_dim, time_chunk=4, bn_chunks=1))
    state_pred, death_probs = fwd(states, actions, masks, packed)
    jax.block_until_ready((state_pred, death_probs))

    assert state_pred.shape == (B, T, N, state_dim)
    assert death_probs.shape == (B, T, N)
    assert bool(jnp.all((death_probs >= 0.0) & (death_probs <= 1.0)))

    # Correctness vs. the un-fused pure-JAX reference (same bf16 matmul precision).
    sp_ref, dp_ref = reference_forward(states, actions, masks, raw, hidden_dim)
    err_s = float(jnp.max(jnp.abs(state_pred - sp_ref)))
    err_d = float(jnp.max(jnp.abs(death_probs - dp_ref)))
    assert err_s < 5e-2 and err_d < 5e-2, (err_s, err_d)

    print("KERNEL_OK")
</pallas_src>

<mosaic_0001>
module attributes {stable_mosaic.version = 11 : i64} {
  func.func @_death_pred_kernel(%arg0: i32, %arg1: i32, %arg2: memref<4x16x25xbf16, #tpu.memory_space<vmem>>, %arg3: memref<25x512xbf16, #tpu.memory_space<vmem>>, %arg4: memref<128x512xbf16, #tpu.memory_space<vmem>>, %arg5: memref<1x512xf32, #tpu.memory_space<vmem>>, %arg6: memref<128x512xbf16, #tpu.memory_space<vmem>>, %arg7: memref<128x512xbf16, #tpu.memory_space<vmem>>, %arg8: memref<1x512xf32, #tpu.memory_space<vmem>>, %arg9: memref<128x256xbf16, #tpu.memory_space<vmem>>, %arg10: memref<1x256xf32, #tpu.memory_space<vmem>>, %arg11: memref<256x128xbf16, #tpu.memory_space<vmem>>, %arg12: memref<1x128xf32, #tpu.memory_space<vmem>>, %arg13: memref<4x16x128xf32, #tpu.memory_space<vmem>>, %arg14: memref<16x128xf32, #tpu.memory_space<vmem>>, %arg15: memref<16x128xf32, #tpu.memory_space<vmem>>, %arg16: memref<16x128xf32, #tpu.memory_space<vmem>>, %arg17: memref<16x128xf32, #tpu.memory_space<vmem>>, %arg18: memref<4x16x512xf32, #tpu.memory_space<vmem>>, %arg19: memref<4x16x128xf32, #tpu.memory_space<vmem>>) attributes {dimension_semantics = [#tpu.dimension_semantics<parallel>, #tpu.dimension_semantics<arbitrary>], iteration_bounds = array<i64: 1, 2>, scalar_prefetch = 0 : i64, scratch_operands = 6 : i64, tpu.core_type = #tpu.core_type<tc>, window_params = [{transform_indices = @transform_0, window_bounds = array<i64: 4, 16, 25>}, {pipeline_mode = #tpu.pipeline_mode<synchronous>, transform_indices = @transform_1, window_bounds = array<i64: 25, 512>}, {pipeline_mode = #tpu.pipeline_mode<synchronous>, transform_indices = @transform_2, window_bounds = array<i64: 128, 512>}, {pipeline_mode = #tpu.pipeline_mode<synchronous>, transform_indices = @transform_3, window_bounds = array<i64: 1, 512>}, {pipeline_mode = #tpu.pipeline_mode<synchronous>, transform_indices = @transform_4, window_bounds = array<i64: 128, 512>}, {pipeline_mode = #tpu.pipeline_mode<synchronous>, transform_indices = @transform_5, window_bounds = array<i64: 128, 512>}, {pipeline_mode = #tpu.pipeline_mode<synchronous>, transform_indices = @transform_6, window_bounds = array<i64: 1, 512>}, {pipeline_mode = #tpu.pipeline_mode<synchronous>, transform_indices = @transform_7, window_bounds = array<i64: 128, 256>}, {pipeline_mode = #tpu.pipeline_mode<synchronous>, transform_indices = @transform_8, window_bounds = array<i64: 1, 256>}, {pipeline_mode = #tpu.pipeline_mode<synchronous>, transform_indices = @transform_9, window_bounds = array<i64: 256, 128>}, {pipeline_mode = #tpu.pipeline_mode<synchronous>, transform_indices = @transform_10, window_bounds = array<i64: 1, 128>}, {transform_indices = @transform_11, window_bounds = array<i64: 4, 16, 128>}]} {
    %c0_i32 = arith.constant 0 : i32
    %0 = arith.cmpi eq, %arg1, %c0_i32 : i32
    %1 = arith.extui %0 : i1 to i32
    %c0_i32_0 = arith.constant 0 : i32
    %2 = arith.cmpi ne, %1, %c0_i32_0 : i32
    scf.if %2 {
      %cst_108 = arith.constant 0.000000e+00 : f32
      %302 = vector.broadcast %cst_108 : f32 to vector<16x128xf32>
      %c0_109 = arith.constant 0 : index
      %c0_110 = arith.constant 0 : index
      %303 = vector.load %arg14[%c0_109, %c0_110] : memref<16x128xf32, #tpu.memory_space<vmem>>, vector<16x128xf32>
      tpu.vector_store %arg14[%c0_109, %c0_110], %302 {strides = array<i32>} : memref<16x128xf32, #tpu.memory_space<vmem>>, vector<16x128xf32>,
      %cst_111 = arith.constant 0.000000e+00 : f32
      %304 = vector.broadcast %cst_111 : f32 to vector<16x128xf32>
      %c0_112 = arith.constant 0 : index
      %c0_113 = arith.constant 0 : index
      %305 = vector.load %arg15[%c0_112, %c0_113] : memref<16x128xf32, #tpu.memory_space<vmem>>, vector<16x128xf32>
      tpu.vector_store %arg15[%c0_112, %c0_113], %304 {strides = array<i32>} : memref<16x128xf32, #tpu.memory_space<vmem>>, vector<16x128xf32>,
      %cst_114 = arith.constant 0.000000e+00 : f32
      %306 = vector.broadcast %cst_114 : f32 to vector<16x128xf32>
      %c0_115 = arith.constant 0 : index
      %c0_116 = arith.constant 0 : index
      %307 = vector.load %arg16[%c0_115, %c0_116] : memref<16x128xf32, #tpu.memory_space<vmem>>, vector<16x128xf32>
      tpu.vector_store %arg16[%c0_115, %c0_116], %306 {strides = array<i32>} : memref<16x128xf32, #tpu.memory_space<vmem>>, vector<16x128xf32>,
      %cst_117 = arith.constant 0.000000e+00 : f32
      %308 = vector.broadcast %cst_117 : f32 to vector<16x128xf32>
      %c0_118 = arith.constant 0 : index
      %c0_119 = arith.constant 0 : index
      %309 = vector.load %arg17[%c0_118, %c0_119] : memref<16x128xf32, #tpu.memory_space<vmem>>, vector<16x128xf32>
      tpu.vector_store %arg17[%c0_118, %c0_119], %308 {strides = array<i32>} : memref<16x128xf32, #tpu.memory_space<vmem>>, vector<16x128xf32>,
    } else {
    }
    %c0 = arith.constant 0 : index
    %c0_1 = arith.constant 0 : index
    %c0_2 = arith.constant 0 : index
    %3 = vector.load %arg2[%c0, %c0_1, %c0_2] : memref<4x16x25xbf16, #tpu.memory_space<vmem>>, vector<4x16x25xbf16>
    %4 = vector.shape_cast %3 : vector<4x16x25xbf16> to vector<64x25xbf16>
    %c0_3 = arith.constant 0 : index
    %c0_4 = arith.constant 0 : index
    %5 = vector.load %arg3[%c0_3, %c0_4] : memref<25x512xbf16, #tpu.memory_space<vmem>>, vector<25x512xbf16>
    %cst = arith.constant dense<0.000000e+00> : vector<64x512xf32>
    %6 = tpu.matmul %4, %5, %cst {dimension_numbers = #tpu.dot_dimension_numbers<[1], [0], [0], [1], [0, 0, 1, 1], [], []>} : vector<64x25xbf16>, vector<25x512xbf16>, vector<64x512xf32> -> vector<64x512xf32>
    %c0_5 = arith.constant 0 : index
    %c0_6 = arith.constant 0 : index
    %7 = vector.load %arg5[%c0_5, %c0_6] : memref<1x512xf32, #tpu.memory_space<vmem>>, vector<1x512xf32>
    %8 = vector.broadcast %7 : vector<1x512xf32> to vector<64x512xf32>
    %9 = arith.addf %6, %8 : vector<64x512xf32>
    %10 = vector.shape_cast %9 : vector<64x512xf32> to vector<4x16x512xf32>
    %c0_7 = arith.constant 0 : index
    %c0_8 = arith.constant 0 : index
    %c0_9 = arith.constant 0 : index
    %11 = vector.load %arg18[%c0_7, %c0_8, %c0_9] : memref<4x16x512xf32, #tpu.memory_space<vmem>>, vector<4x16x512xf32>
    tpu.vector_store %arg18[%c0_7, %c0_8, %c0_9], %10 {strides = array<i32>} : memref<4x16x512xf32, #tpu.memory_space<vmem>>, vector<4x16x512xf32>,
    %c0_10 = arith.constant 0 : index
    %c0_11 = arith.constant 0 : index
    %12 = vector.load %arg4[%c0_10, %c0_11] : memref<128x512xbf16, #tpu.memory_space<vmem>>, vector<128x512xbf16>
    %c0_12 = arith.constant 0 : index
    %c0_13 = arith.constant 0 : index
    %13 = vector.load %arg6[%c0_12, %c0_13] : memref<128x512xbf16, #tpu.memory_space<vmem>>, vector<128x512xbf16>
    %c0_14 = arith.constant 0 : index
    %c0_15 = arith.constant 0 : index
    %14 = vector.load %arg7[%c0_14, %c0_15] : memref<128x512xbf16, #tpu.memory_space<vmem>>, vector<128x512xbf16>
    %c0_16 = arith.constant 0 : index
    %c0_17 = arith.constant 0 : index
    %15 = vector.load %arg8[%c0_16, %c0_17] : memref<1x512xf32, #tpu.memory_space<vmem>>, vector<1x512xf32>
    %c0_18 = arith.constant 0 : index
    %c0_19 = arith.constant 0 : index
    %16 = vector.load %arg14[%c0_18, %c0_19] : memref<16x128xf32, #tpu.memory_space<vmem>>, vector<16x128xf32>
    %c0_20 = arith.constant 0 : index
    %c0_21 = arith.constant 0 : index
    %17 = vector.load %arg15[%c0_20, %c0_21] : memref<16x128xf32, #tpu.memory_space<vmem>>, vector<16x128xf32>
    %c0_22 = arith.constant 0 : index
    %c0_23 = arith.constant 0 : index
    %18 = vector.load %arg16[%c0_22, %c0_23] : memref<16x128xf32, #tpu.memory_space<vmem>>, vector<16x128xf32>
    %c0_24 = arith.constant 0 : index
    %c0_25 = arith.constant 0 : index
    %19 = vector.load %arg17[%c0_24, %c0_25] : memref<16x128xf32, #tpu.memory_space<vmem>>, vector<16x128xf32>
    %c0_26 = arith.constant 0 : index
    %c0_27 = arith.constant 0 : index
    %c0_28 = arith.constant 0 : index
    %20 = vector.load %arg18[%c0_26, %c0_27, %c0_28] : memref<4x16x512xf32, #tpu.memory_space<vmem>>, vector<1x16x512xf32>
    %21 = vector.shape_cast %20 : vector<1x16x512xf32> to vector<16x512xf32>
    %22 = arith.truncf %16 : vector<16x128xf32> to vector<16x128xbf16>
    %cst_29 = arith.constant dense<0.000000e+00> : vector<16x512xf32>
    %23 = tpu.matmul %22, %12, %cst_29 {dimension_numbers = #tpu.dot_dimension_numbers<[1], [0], [0], [1], [0, 0, 1, 1], [], []>} : vector<16x128xbf16>, vector<128x512xbf16>, vector<16x512xf32> -> vector<16x512xf32>
    %24 = arith.addf %21, %23 : vector<16x512xf32>
    %25 = vector.extract_strided_slice %24 {offsets = [0, 0], sizes = [16, 128], strides = [1, 1]} : vector<16x512xf32> to vector<16x128xf32>
    %26 = arith.negf %25 : vector<16x128xf32>
    %27 = math.exp %26 : vector<16x128xf32>
    %cst_30 = arith.constant 1.000000e+00 : f32
    %28 = vector.broadcast %cst_30 : f32 to vector<16x128xf32>
    %29 = arith.addf %28, %27 : vector<16x128xf32>
    %30 = arith.divf %28, %29 : vector<16x128xf32>
    %31 = vector.extract_strided_slice %24 {offsets = [0, 128], sizes = [16, 128], strides = [1, 1]} : vector<16x512xf32> to vector<16x128xf32>
    %32 = arith.negf %31 : vector<16x128xf32>
    %33 = math.exp %32 : vector<16x128xf32>
    %cst_31 = arith.constant 1.000000e+00 : f32
    %34 = vector.broadcast %cst_31 : f32 to vector<16x128xf32>
    %35 = arith.addf %34, %33 : vector<16x128xf32>
    %36 = arith.divf %34, %35 : vector<16x128xf32>
    %37 = vector.extract_strided_slice %24 {offsets = [0, 256], sizes = [16, 128], strides = [1, 1]} : vector<16x512xf32> to vector<16x128xf32>
    %38 = math.tanh %37 : vector<16x128xf32>
    %39 = vector.extract_strided_slice %24 {offsets = [0, 384], sizes = [16, 128], strides = [1, 1]} : vector<16x512xf32> to vector<16x128xf32>
    %40 = arith.negf %39 : vector<16x128xf32>
    %41 = math.exp %40 : vector<16x128xf32>
    %cst_32 = arith.constant 1.000000e+00 : f32
    %42 = vector.broadcast %cst_32 : f32 to vector<16x128xf32>
    %43 = arith.addf %42, %41 : vector<16x128xf32>
    %44 = arith.divf %42, %43 : vector<16x128xf32>
    %45 = arith.mulf %36, %17 : vector<16x128xf32>
    %46 = arith.mulf %30, %38 : vector<16x128xf32>
    %47 = arith.addf %45, %46 : vector<16x128xf32>
    %48 = math.tanh %47 : vector<16x128xf32>
    %49 = arith.mulf %44, %48 : vector<16x128xf32>
    %50 = arith.truncf %49 : vector<16x128xf32> to vector<16x128xbf16>
    %cst_33 = arith.constant dense<0.000000e+00> : vector<16x512xf32>
    %51 = tpu.matmul %50, %13, %cst_33 {dimension_numbers = #tpu.dot_dimension_numbers<[1], [0], [0], [1], [0, 0, 1, 1], [], []>} : vector<16x128xbf16>, vector<128x512xbf16>, vector<16x512xf32> -> vector<16x512xf32>
    %52 = arith.truncf %18 : vector<16x128xf32> to vector<16x128xbf16>
    %cst_34 = arith.constant dense<0.000000e+00> : vector<16x512xf32>
    %53 = tpu.matmul %52, %14, %cst_34 {dimension_numbers = #tpu.dot_dimension_numbers<[1], [0], [0], [1], [0, 0, 1, 1], [], []>} : vector<16x128xbf16>, vector<128x512xbf16>, vector<16x512xf32> -> vector<16x512xf32>
    %54 = arith.addf %51, %53 : vector<16x512xf32>
    %55 = vector.broadcast %15 : vector<1x512xf32> to vector<16x512xf32>
    %56 = arith.addf %54, %55 : vector<16x512xf32>
    %57 = vector.extract_strided_slice %56 {offsets = [0, 0], sizes = [16, 128], strides = [1, 1]} : vector<16x512xf32> to vector<16x128xf32>
    %58 = arith.negf %57 : vector<16x128xf32>
    %59 = math.exp %58 : vector<16x128xf32>
    %cst_35 = arith.constant 1.000000e+00 : f32
    %60 = vector.broadcast %cst_35 : f32 to vector<16x128xf32>
    %61 = arith.addf %60, %59 : vector<16x128xf32>
    %62 = arith.divf %60, %61 : vector<16x128xf32>
    %63 = vector.extract_strided_slice %56 {offsets = [0, 128], sizes = [16, 128], strides = [1, 1]} : vector<16x512xf32> to vector<16x128xf32>
    %64 = arith.negf %63 : vector<16x128xf32>
    %65 = math.exp %64 : vector<16x128xf32>
    %cst_36 = arith.constant 1.000000e+00 : f32
    %66 = vector.broadcast %cst_36 : f32 to vector<16x128xf32>
    %67 = arith.addf %66, %65 : vector<16x128xf32>
    %68 = arith.divf %66, %67 : vector<16x128xf32>
    %69 = vector.extract_strided_slice %56 {offsets = [0, 256], sizes = [16, 128], strides = [1, 1]} : vector<16x512xf32> to vector<16x128xf32>
    %70 = math.tanh %69 : vector<16x128xf32>
    %71 = vector.extract_strided_slice %56 {offsets = [0, 384], sizes = [16, 128], strides = [1, 1]} : vector<16x512xf32> to vector<16x128xf32>
    %72 = arith.negf %71 : vector<16x128xf32>
    %73 = math.exp %72 : vector<16x128xf32>
    %cst_37 = arith.constant 1.000000e+00 : f32
    %74 = vector.broadcast %cst_37 : f32 to vector<16x128xf32>
    %75 = arith.addf %74, %73 : vector<16x128xf32>
    %76 = arith.divf %74, %75 : vector<16x128xf32>
    %77 = arith.mulf %68, %19 : vector<16x128xf32>
    %78 = arith.mulf %62, %70 : vector<16x128xf32>
    %79 = arith.addf %77, %78 : vector<16x128xf32>
    %80 = math.tanh %79 : vector<16x128xf32>
    %81 = arith.mulf %76, %80 : vector<16x128xf32>
    %c0_38 = arith.constant 0 : index
    %c0_39 = arith.constant 0 : index
    %c0_40 = arith.constant 0 : index
    %82 = vector.load %arg19[%c0_38, %c0_39, %c0_40] : memref<4x16x128xf32, #tpu.memory_space<vmem>>, vector<1x16x128xf32>
    %83 = vector.shape_cast %82 : vector<1x16x128xf32> to vector<16x128xf32>
    %84 = vector.shape_cast %81 : vector<16x128xf32> to vector<1x16x128xf32>
    tpu.vector_store %arg19[%c0_38, %c0_39, %c0_40], %84 {strides = array<i32>} : memref<4x16x128xf32, #tpu.memory_space<vmem>>, vector<1x16x128xf32>,
    %c1 = arith.constant 1 : index
    %c0_41 = arith.constant 0 : index
    %c0_42 = arith.constant 0 : index
    %85 = vector.load %arg18[%c1, %c0_41, %c0_42] : memref<4x16x512xf32, #tpu.memory_space<vmem>>, vector<1x16x512xf32>
    %86 = vector.shape_cast %85 : vector<1x16x512xf32> to vector<16x512xf32>
    %87 = arith.truncf %49 : vector<16x128xf32> to vector<16x128xbf16>
    %cst_43 = arith.constant dense<0.000000e+00> : vector<16x512xf32>
    %88 = tpu.matmul %87, %12, %cst_43 {dimension_numbers = #tpu.dot_dimension_numbers<[1], [0], [0], [1], [0, 0, 1, 1], [], []>} : vector<16x128xbf16>, vector<128x512xbf16>, vector<16x512xf32> -> vector<16x512xf32>
    %89 = arith.addf %86, %88 : vector<16x512xf32>
    %90 = vector.extract_strided_slice %89 {offsets = [0, 0], sizes = [16, 128], strides = [1, 1]} : vector<16x512xf32> to vector<16x128xf32>
    %91 = arith.negf %90 : vector<16x128xf32>
    %92 = math.exp %91 : vector<16x128xf32>
    %cst_44 = arith.constant 1.000000e+00 : f32
    %93 = vector.broadcast %cst_44 : f32 to vector<16x128xf32>
    %94 = arith.addf %93, %92 : vector<16x128xf32>
    %95 = arith.divf %93, %94 : vector<16x128xf32>
    %96 = vector.extract_strided_slice %89 {offsets = [0, 128], sizes = [16, 128], strides = [1, 1]} : vector<16x512xf32> to vector<16x128xf32>
    %97 = arith.negf %96 : vector<16x128xf32>
    %98 = math.exp %97 : vector<16x128xf32>
    %cst_45 = arith.constant 1.000000e+00 : f32
    %99 = vector.broadcast %cst_45 : f32 to vector<16x128xf32>
    %100 = arith.addf %99, %98 : vector<16x128xf32>
    %101 = arith.divf %99, %100 : vector<16x128xf32>
    %102 = vector.extract_strided_slice %89 {offsets = [0, 256], sizes = [16, 128], strides = [1, 1]} : vector<16x512xf32> to vector<16x128xf32>
    %103 = math.tanh %102 : vector<16x128xf32>
    %104 = vector.extract_strided_slice %89 {offsets = [0, 384], sizes = [16, 128], strides = [1, 1]} : vector<16x512xf32> to vector<16x128xf32>
    %105 = arith.negf %104 : vector<16x128xf32>
    %106 = math.exp %105 : vector<16x128xf32>
    %cst_46 = arith.constant 1.000000e+00 : f32
    %107 = vector.broadcast %cst_46 : f32 to vector<16x128xf32>
    %108 = arith.addf %107, %106 : vector<16x128xf32>
    %109 = arith.divf %107, %108 : vector<16x128xf32>
    %110 = arith.mulf %101, %47 : vector<16x128xf32>
    %111 = arith.mulf %95, %103 : vector<16x128xf32>
    %112 = arith.addf %110, %111 : vector<16x128xf32>
    %113 = math.tanh %112 : vector<16x128xf32>
    %114 = arith.mulf %109, %113 : vector<16x128xf32>
    %115 = arith.truncf %114 : vector<16x128xf32> to vector<16x128xbf16>
    %cst_47 = arith.constant dense<0.000000e+00> : vector<16x512xf32>
    %116 = tpu.matmul %115, %13, %cst_47 {dimension_numbers = #tpu.dot_dimension_numbers<[1], [0], [0], [1], [0, 0, 1, 1], [], []>} : vector<16x128xbf16>, vector<128x512xbf16>, vector<16x512xf32> -> vector<16x512xf32>
    %117 = arith.truncf %81 : vector<16x128xf32> to vector<16x128xbf16>
    %cst_48 = arith.constant dense<0.000000e+00> : vector<16x512xf32>
    %118 = tpu.matmul %117, %14, %cst_48 {dimension_numbers = #tpu.dot_dimension_numbers<[1], [0], [0], [1], [0, 0, 1, 1], [], []>} : vector<16x128xbf16>, vector<128x512xbf16>, vector<16x512xf32> -> vector<16x512xf32>
    %119 = arith.addf %116, %118 : vector<16x512xf32>
    %120 = vector.broadcast %15 : vector<1x512xf32> to vector<16x512xf32>
    %121 = arith.addf %119, %120 : vector<16x512xf32>
    %122 = vector.extract_strided_slice %121 {offsets = [0, 0], sizes = [16, 128], strides = [1, 1]} : vector<16x512xf32> to vector<16x128xf32>
    %123 = arith.negf %122 : vector<16x128xf32>
    %124 = math.exp %123 : vector<16x128xf32>
    %cst_49 = arith.constant 1.000000e+00 : f32
    %125 = vector.broadcast %cst_49 : f32 to vector<16x128xf32>
    %126 = arith.addf %125, %124 : vector<16x128xf32>
    %127 = arith.divf %125, %126 : vector<16x128xf32>
    %128 = vector.extract_strided_slice %121 {offsets = [0, 128], sizes = [16, 128], strides = [1, 1]} : vector<16x512xf32> to vector<16x128xf32>
    %129 = arith.negf %128 : vector<16x128xf32>
    %130 = math.exp %129 : vector<16x128xf32>
    %cst_50 = arith.constant 1.000000e+00 : f32
    %131 = vector.broadcast %cst_50 : f32 to vector<16x128xf32>
    %132 = arith.addf %131, %130 : vector<16x128xf32>
    %133 = arith.divf %131, %132 : vector<16x128xf32>
    %134 = vector.extract_strided_slice %121 {offsets = [0, 256], sizes = [16, 128], strides = [1, 1]} : vector<16x512xf32> to vector<16x128xf32>
    %135 = math.tanh %134 : vector<16x128xf32>
    %136 = vector.extract_strided_slice %121 {offsets = [0, 384], sizes = [16, 128], strides = [1, 1]} : vector<16x512xf32> to vector<16x128xf32>
    %137 = arith.negf %136 : vector<16x128xf32>
    %138 = math.exp %137 : vector<16x128xf32>
    %cst_51 = arith.constant 1.000000e+00 : f32
    %139 = vector.broadcast %cst_51 : f32 to vector<16x128xf32>
    %140 = arith.addf %139, %138 : vector<16x128xf32>
    %141 = arith.divf %139, %140 : vector<16x128xf32>
    %142 = arith.mulf %133, %79 : vector<16x128xf32>
    %143 = arith.mulf %127, %135 : vector<16x128xf32>
    %144 = arith.addf %142, %143 : vector<16x128xf32>
    %145 = math.tanh %144 : vector<16x128xf32>
    %146 = arith.mulf %141, %145 : vector<16x128xf32>
    %c1_52 = arith.constant 1 : index
    %c0_53 = arith.constant 0 : index
    %c0_54 = arith.constant 0 : index
    %147 = vector.load %arg19[%c1_52, %c0_53, %c0_54] : memref<4x16x128xf32, #tpu.memory_space<vmem>>, vector<1x16x128xf32>
    %148 = vector.shape_cast %147 : vector<1x16x128xf32> to vector<16x128xf32>
    %149 = vector.shape_cast %146 : vector<16x128xf32> to vector<1x16x128xf32>
    tpu.vector_store %arg19[%c1_52, %c0_53, %c0_54], %149 {strides = array<i32>} : memref<4x16x128xf32, #tpu.memory_space<vmem>>, vector<1x16x128xf32>,
    %c2 = arith.constant 2 : index
    %c0_55 = arith.constant 0 : index
    %c0_56 = arith.constant 0 : index
    %150 = vector.load %arg18[%c2, %c0_55, %c0_56] : memref<4x16x512xf32, #tpu.memory_space<vmem>>, vector<1x16x512xf32>
    %151 = vector.shape_cast %150 : vector<1x16x512xf32> to vector<16x512xf32>
    %152 = arith.truncf %114 : vector<16x128xf32> to vector<16x128xbf16>
    %cst_57 = arith.constant dense<0.000000e+00> : vector<16x512xf32>
    %153 = tpu.matmul %152, %12, %cst_57 {dimension_numbers = #tpu.dot_dimension_numbers<[1], [0], [0], [1], [0, 0, 1, 1], [], []>} : vector<16x128xbf16>, vector<128x512xbf16>, vector<16x512xf32> -> vector<16x512xf32>
    %154 = arith.addf %151, %153 : vector<16x512xf32>
    %155 = vector.extract_strided_slice %154 {offsets = [0, 0], sizes = [16, 128], strides = [1, 1]} : vector<16x512xf32> to vector<16x128xf32>
    %156 = arith.negf %155 : vector<16x128xf32>
    %157 = math.exp %156 : vector<16x128xf32>
    %cst_58 = arith.constant 1.000000e+00 : f32
    %158 = vector.broadcast %cst_58 : f32 to vector<16x128xf32>
    %159 = arith.addf %158, %157 : vector<16x128xf32>
    %160 = arith.divf %158, %159 : vector<16x128xf32>
    %161 = vector.extract_strided_slice %154 {offsets = [0, 128], sizes = [16, 128], strides = [1, 1]} : vector<16x512xf32> to vector<16x128xf32>
    %162 = arith.negf %161 : vector<16x128xf32>
    %163 = math.exp %162 : vector<16x128xf32>
    %cst_59 = arith.constant 1.000000e+00 : f32
    %164 = vector.broadcast %cst_59 : f32 to vector<16x128xf32>
    %165 = arith.addf %164, %163 : vector<16x128xf32>
    %166 = arith.divf %164, %165 : vector<16x128xf32>
    %167 = vector.extract_strided_slice %154 {offsets = [0, 256], sizes = [16, 128], strides = [1, 1]} : vector<16x512xf32> to vector<16x128xf32>
    %168 = math.tanh %167 : vector<16x128xf32>
    %169 = vector.extract_strided_slice %154 {offsets = [0, 384], sizes = [16, 128], strides = [1, 1]} : vector<16x512xf32> to vector<16x128xf32>
    %170 = arith.negf %169 : vector<16x128xf32>
    %171 = math.exp %170 : vector<16x128xf32>
    %cst_60 = arith.constant 1.000000e+00 : f32
    %172 = vector.broadcast %cst_60 : f32 to vector<16x128xf32>
    %173 = arith.addf %172, %171 : vector<16x128xf32>
    %174 = arith.divf %172, %173 : vector<16x128xf32>
    %175 = arith.mulf %166, %112 : vector<16x128xf32>
    %176 = arith.mulf %160, %168 : vector<16x128xf32>
    %177 = arith.addf %175, %176 : vector<16x128xf32>
    %178 = math.tanh %177 : vector<16x128xf32>
    %179 = arith.mulf %174, %178 : vector<16x128xf32>
    %180 = arith.truncf %179 : vector<16x128xf32> to vector<16x128xbf16>
    %cst_61 = arith.constant dense<0.000000e+00> : vector<16x512xf32>
    %181 = tpu.matmul %180, %13, %cst_61 {dimension_numbers = #tpu.dot_dimension_numbers<[1], [0], [0], [1], [0, 0, 1, 1], [], []>} : vector<16x128xbf16>, vector<128x512xbf16>, vector<16x512xf32> -> vector<16x512xf32>
    %182 = arith.truncf %146 : vector<16x128xf32> to vector<16x128xbf16>
    %cst_62 = arith.constant dense<0.000000e+00> : vector<16x512xf32>
    %183 = tpu.matmul %182, %14, %cst_62 {dimension_numbers = #tpu.dot_dimension_numbers<[1], [0], [0], [1], [0, 0, 1, 1], [], []>} : vector<16x128xbf16>, vector<128x512xbf16>, vector<16x512xf32> -> vector<16x512xf32>
    %184 = arith.addf %181, %183 : vector<16x512xf32>
    %185 = vector.broadcast %15 : vector<1x512xf32> to vector<16x512xf32>
    %186 = arith.addf %184, %185 : vector<16x512xf32>
    %187 = vector.extract_strided_slice %186 {offsets = [0, 0], sizes = [16, 128], strides = [1, 1]} : vector<16x512xf32> to vector<16x128xf32>
    %188 = arith.negf %187 : vector<16x128xf32>
    %189 = math.exp %188 : vector<16x128xf32>
    %cst_63 = arith.constant 1.000000e+00 : f32
    %190 = vector.broadcast %cst_63 : f32 to vector<16x128xf32>
    %191 = arith.addf %190, %189 : vector<16x128xf32>
    %192 = arith.divf %190, %191 : vector<16x128xf32>
    %193 = vector.extract_strided_slice %186 {offsets = [0, 128], sizes = [16, 128], strides = [1, 1]} : vector<16x512xf32> to vector<16x128xf32>
    %194 = arith.negf %193 : vector<16x128xf32>
    %195 = math.exp %194 : vector<16x128xf32>
    %cst_64 = arith.constant 1.000000e+00 : f32
    %196 = vector.broadcast %cst_64 : f32 to vector<16x128xf32>
    %197 = arith.addf %196, %195 : vector<16x128xf32>
    %198 = arith.divf %196, %197 : vector<16x128xf32>
    %199 = vector.extract_strided_slice %186 {offsets = [0, 256], sizes = [16, 128], strides = [1, 1]} : vector<16x512xf32> to vector<16x128xf32>
    %200 = math.tanh %199 : vector<16x128xf32>
    %201 = vector.extract_strided_slice %186 {offsets = [0, 384], sizes = [16, 128], strides = [1, 1]} : vector<16x512xf32> to vector<16x128xf32>
    %202 = arith.negf %201 : vector<16x128xf32>
    %203 = math.exp %202 : vector<16x128xf32>
    %cst_65 = arith.constant 1.000000e+00 : f32
    %204 = vector.broadcast %cst_65 : f32 to vector<16x128xf32>
    %205 = arith.addf %204, %203 : vector<16x128xf32>
    %206 = arith.divf %204, %205 : vector<16x128xf32>
    %207 = arith.mulf %198, %144 : vector<16x128xf32>
    %208 = arith.mulf %192, %200 : vector<16x128xf32>
    %209 = arith.addf %207, %208 : vector<16x128xf32>
    %210 = math.tanh %209 : vector<16x128xf32>
    %211 = arith.mulf %206, %210 : vector<16x128xf32>
    %c2_66 = arith.constant 2 : index
    %c0_67 = arith.constant 0 : index
    %c0_68 = arith.constant 0 : index
    %212 = vector.load %arg19[%c2_66, %c0_67, %c0_68] : memref<4x16x128xf32, #tpu.memory_space<vmem>>, vector<1x16x128xf32>
    %213 = vector.shape_cast %212 : vector<1x16x128xf32> to vector<16x128xf32>
    %214 = vector.shape_cast %211 : vector<16x128xf32> to vector<1x16x128xf32>
    tpu.vector_store %arg19[%c2_66, %c0_67, %c0_68], %214 {strides = array<i32>} : memref<4x16x128xf32, #tpu.memory_space<vmem>>, vector<1x16x128xf32>,
    %c3 = arith.constant 3 : index
    %c0_69 = arith.constant 0 : index
    %c0_70 = arith.constant 0 : index
    %215 = vector.load %arg18[%c3, %c0_69, %c0_70] : memref<4x16x512xf32, #tpu.memory_space<vmem>>, vector<1x16x512xf32>
    %216 = vector.shape_cast %215 : vector<1x16x512xf32> to vector<16x512xf32>
    %217 = arith.truncf %179 : vector<16x128xf32> to vector<16x128xbf16>
    %cst_71 = arith.constant dense<0.000000e+00> : vector<16x512xf32>
    %218 = tpu.matmul %217, %12, %cst_71 {dimension_numbers = #tpu.dot_dimension_numbers<[1], [0], [0], [1], [0, 0, 1, 1], [], []>} : vector<16x128xbf16>, vector<128x512xbf16>, vector<16x512xf32> -> vector<16x512xf32>
    %219 = arith.addf %216, %218 : vector<16x512xf32>
    %220 = vector.extract_strided_slice %219 {offsets = [0, 0], sizes = [16, 128], strides = [1, 1]} : vector<16x512xf32> to vector<16x128xf32>
    %221 = arith.negf %220 : vector<16x128xf32>
    %222 = math.exp %221 : vector<16x128xf32>
    %cst_72 = arith.constant 1.000000e+00 : f32
    %223 = vector.broadcast %cst_72 : f32 to vector<16x128xf32>
    %224 = arith.addf %223, %222 : vector<16x128xf32>
    %225 = arith.divf %223, %224 : vector<16x128xf32>
    %226 = vector.extract_strided_slice %219 {offsets = [0, 128], sizes = [16, 128], strides = [1, 1]} : vector<16x512xf32> to vector<16x128xf32>
    %227 = arith.negf %226 : vector<16x128xf32>
    %228 = math.exp %227 : vector<16x128xf32>
    %cst_73 = arith.constant 1.000000e+00 : f32
    %229 = vector.broadcast %cst_73 : f32 to vector<16x128xf32>
    %230 = arith.addf %229, %228 : vector<16x128xf32>
    %231 = arith.divf %229, %230 : vector<16x128xf32>
    %232 = vector.extract_strided_slice %219 {offsets = [0, 256], sizes = [16, 128], strides = [1, 1]} : vector<16x512xf32> to vector<16x128xf32>
    %233 = math.tanh %232 : vector<16x128xf32>
    %234 = vector.extract_strided_slice %219 {offsets = [0, 384], sizes = [16, 128], strides = [1, 1]} : vector<16x512xf32> to vector<16x128xf32>
    %235 = arith.negf %234 : vector<16x128xf32>
    %236 = math.exp %235 : vector<16x128xf32>
    %cst_74 = arith.constant 1.000000e+00 : f32
    %237 = vector.broadcast %cst_74 : f32 to vector<16x128xf32>
    %238 = arith.addf %237, %236 : vector<16x128xf32>
    %239 = arith.divf %237, %238 : vector<16x128xf32>
    %240 = arith.mulf %231, %177 : vector<16x128xf32>
    %241 = arith.mulf %225, %233 : vector<16x128xf32>
    %242 = arith.addf %240, %241 : vector<16x128xf32>
    %243 = math.tanh %242 : vector<16x128xf32>
    %244 = arith.mulf %239, %243 : vector<16x128xf32>
    %245 = arith.truncf %244 : vector<16x128xf32> to vector<16x128xbf16>
    %cst_75 = arith.constant dense<0.000000e+00> : vector<16x512xf32>
    %246 = tpu.matmul %245, %13, %cst_75 {dimension_numbers = #tpu.dot_dimension_numbers<[1], [0], [0], [1], [0, 0, 1, 1], [], []>} : vector<16x128xbf16>, vector<128x512xbf16>, vector<16x512xf32> -> vector<16x512xf32>
    %247 = arith.truncf %211 : vector<16x128xf32> to vector<16x128xbf16>
    %cst_76 = arith.constant dense<0.000000e+00> : vector<16x512xf32>
    %248 = tpu.matmul %247, %14, %cst_76 {dimension_numbers = #tpu.dot_dimension_numbers<[1], [0], [0], [1], [0, 0, 1, 1], [], []>} : vector<16x128xbf16>, vector<128x512xbf16>, vector<16x512xf32> -> vector<16x512xf32>
    %249 = arith.addf %246, %248 : vector<16x512xf32>
    %250 = vector.broadcast %15 : vector<1x512xf32> to vector<16x512xf32>
    %251 = arith.addf %249, %250 : vector<16x512xf32>
    %252 = vector.extract_strided_slice %251 {offsets = [0, 0], sizes = [16, 128], strides = [1, 1]} : vector<16x512xf32> to vector<16x128xf32>
    %253 = arith.negf %252 : vector<16x128xf32>
    %254 = math.exp %253 : vector<16x128xf32>
    %cst_77 = arith.constant 1.000000e+00 : f32
    %255 = vector.broadcast %cst_77 : f32 to vector<16x128xf32>
    %256 = arith.addf %255, %254 : vector<16x128xf32>
    %257 = arith.divf %255, %256 : vector<16x128xf32>
    %258 = vector.extract_strided_slice %251 {offsets = [0, 128], sizes = [16, 128], strides = [1, 1]} : vector<16x512xf32> to vector<16x128xf32>
    %259 = arith.negf %258 : vector<16x128xf32>
    %260 = math.exp %259 : vector<16x128xf32>
    %cst_78 = arith.constant 1.000000e+00 : f32
    %261 = vector.broadcast %cst_78 : f32 to vector<16x128xf32>
    %262 = arith.addf %261, %260 : vector<16x128xf32>
    %263 = arith.divf %261, %262 : vector<16x128xf32>
    %264 = vector.extract_strided_slice %251 {offsets = [0, 256], sizes = [16, 128], strides = [1, 1]} : vector<16x512xf32> to vector<16x128xf32>
    %265 = math.tanh %264 : vector<16x128xf32>
    %266 = vector.extract_strided_slice %251 {offsets = [0, 384], sizes = [16, 128], strides = [1, 1]} : vector<16x512xf32> to vector<16x128xf32>
    %267 = arith.negf %266 : vector<16x128xf32>
    %268 = math.exp %267 : vector<16x128xf32>
    %cst_79 = arith.constant 1.000000e+00 : f32
    %269 = vector.broadcast %cst_79 : f32 to vector<16x128xf32>
    %270 = arith.addf %269, %268 : vector<16x128xf32>
    %271 = arith.divf %269, %270 : vector<16x128xf32>
    %272 = arith.mulf %263, %209 : vector<16x128xf32>
    %273 = arith.mulf %257, %265 : vector<16x128xf32>
    %274 = arith.addf %272, %273 : vector<16x128xf32>
    %275 = math.tanh %274 : vector<16x128xf32>
    %276 = arith.mulf %271, %275 : vector<16x128xf32>
    %c3_80 = arith.constant 3 : index
    %c0_81 = arith.constant 0 : index
    %c0_82 = arith.constant 0 : index
    %277 = vector.load %arg19[%c3_80, %c0_81, %c0_82] : memref<4x16x128xf32, #tpu.memory_space<vmem>>, vector<1x16x128xf32>
    %278 = vector.shape_cast %277 : vector<1x16x128xf32> to vector<16x128xf32>
    %279 = vector.shape_cast %276 : vector<16x128xf32> to vector<1x16x128xf32>
    tpu.vector_store %arg19[%c3_80, %c0_81, %c0_82], %279 {strides = array<i32>} : memref<4x16x128xf32, #tpu.memory_space<vmem>>, vector<1x16x128xf32>,
    %c0_83 = arith.constant 0 : index
    %c0_84 = arith.constant 0 : index
    %280 = vector.load %arg14[%c0_83, %c0_84] : memref<16x128xf32, #tpu.memory_space<vmem>>, vector<16x128xf32>
    tpu.vector_store %arg14[%c0_83, %c0_84], %244 {strides = array<i32>} : memref<16x128xf32, #tpu.memory_space<vmem>>, vector<16x128xf32>,
    %c0_85 = arith.constant 0 : index
    %c0_86 = arith.constant 0 : index
    %281 = vector.load %arg15[%c0_85, %c0_86] : memref<16x128xf32, #tpu.memory_space<vmem>>, vector<16x128xf32>
    tpu.vector_store %arg15[%c0_85, %c0_86], %242 {strides = array<i32>} : memref<16x128xf32, #tpu.memory_space<vmem>>, vector<16x128xf32>,
    %c0_87 = arith.constant 0 : index
    %c0_88 = arith.constant 0 : index
    %282 = vector.load %arg16[%c0_87, %c0_88] : memref<16x128xf32, #tpu.memory_space<vmem>>, vector<16x128xf32>
    tpu.vector_store %arg16[%c0_87, %c0_88], %276 {strides = array<i32>} : memref<16x128xf32, #tpu.memory_space<vmem>>, vector<16x128xf32>,
    %c0_89 = arith.constant 0 : index
    %c0_90 = arith.constant 0 : index
    %283 = vector.load %arg17[%c0_89, %c0_90] : memref<16x128xf32, #tpu.memory_space<vmem>>, vector<16x128xf32>
    tpu.vector_store %arg17[%c0_89, %c0_90], %274 {strides = array<i32>} : memref<16x128xf32, #tpu.memory_space<vmem>>, vector<16x128xf32>,
    %c0_91 = arith.constant 0 : index
    %c0_92 = arith.constant 0 : index
    %c0_93 = arith.constant 0 : index
    %284 = vector.load %arg19[%c0_91, %c0_92, %c0_93] : memref<4x16x128xf32, #tpu.memory_space<vmem>>, vector<4x16x128xf32>
    %285 = vector.shape_cast %284 : vector<4x16x128xf32> to vector<64x128xf32>
    %286 = arith.truncf %285 : vector<64x128xf32> to vector<64x128xbf16>
    %c0_94 = arith.constant 0 : index
    %c0_95 = arith.constant 0 : index
    %287 = vector.load %arg9[%c0_94, %c0_95] : memref<128x256xbf16, #tpu.memory_space<vmem>>, vector<128x256xbf16>
    %cst_96 = arith.constant dense<0.000000e+00> : vector<64x256xf32>
    %288 = tpu.matmul %286, %287, %cst_96 {dimension_numbers = #tpu.dot_dimension_numbers<[1], [0], [0], [1], [0, 0, 1, 1], [], []>} : vector<64x128xbf16>, vector<128x256xbf16>, vector<64x256xf32> -> vector<64x256xf32>
    %c0_97 = arith.constant 0 : index
    %c0_98 = arith.constant 0 : index
    %289 = vector.load %arg10[%c0_97, %c0_98] : memref<1x256xf32, #tpu.memory_space<vmem>>, vector<1x256xf32>
    %290 = vector.broadcast %289 : vector<1x256xf32> to vector<64x256xf32>
    %291 = arith.addf %288, %290 : vector<64x256xf32>
    %cst_99 = arith.constant 0.000000e+00 : f32
    %292 = vector.broadcast %cst_99 : f32 to vector<64x256xf32>
    %293 = arith.maximumf %291, %292 : vector<64x256xf32>
    %294 = arith.truncf %293 : vector<64x256xf32> to vector<64x256xbf16>
    %c0_100 = arith.constant 0 : index
    %c0_101 = arith.constant 0 : index
    %295 = vector.load %arg11[%c0_100, %c0_101] : memref<256x128xbf16, #tpu.memory_space<vmem>>, vector<256x128xbf16>
    %cst_102 = arith.constant dense<0.000000e+00> : vector<64x128xf32>
    %296 = tpu.matmul %294, %295, %cst_102 {dimension_numbers = #tpu.dot_dimension_numbers<[1], [0], [0], [1], [0, 0, 1, 1], [], []>} : vector<64x256xbf16>, vector<256x128xbf16>, vector<64x128xf32> -> vector<64x128xf32>
    %c0_103 = arith.constant 0 : index
    %c0_104 = arith.constant 0 : index
    %297 = vector.load %arg12[%c0_103, %c0_104] : memref<1x128xf32, #tpu.memory_space<vmem>>, vector<1x128xf32>
    %298 = vector.broadcast %297 : vector<1x128xf32> to vector<64x128xf32>
    %299 = arith.addf %296, %298 : vector<64x128xf32>
    %300 = vector.shape_cast %299 : vector<64x128xf32> to vector<4x16x128xf32>
    %c0_105 = arith.constant 0 : index
    %c0_106 = arith.constant 0 : index
    %c0_107 = arith.constant 0 : index
    %301 = vector.load %arg13[%c0_105, %c0_106, %c0_107] : memref<4x16x128xf32, #tpu.memory_space<vmem>>, vector<4x16x128xf32>
    tpu.vector_store %arg13[%c0_105, %c0_106, %c0_107], %300 {strides = array<i32>} : memref<4x16x128xf32, #tpu.memory_space<vmem>>, vector<4x16x128xf32>,
    return
  }
  func.func @transform_0(%arg0: i32, %arg1: i32) -> (i32, i32, i32) {
    %c0_i32 = arith.constant 0 : i32
    %c0_i32_0 = arith.constant 0 : i32
    return %arg1, %arg0, %c0_i32 : i32, i32, i32
  }
  func.func @transform_1(%arg0: i32, %arg1: i32) -> (i32, i32) {
    %c0_i32 = arith.constant 0 : i32
    %c0_i32_0 = arith.constant 0 : i32
    %c0_i32_1 = arith.constant 0 : i32
    return %c0_i32, %c0_i32_0 : i32, i32
  }
  func.func @transform_2(%arg0: i32, %arg1: i32) -> (i32, i32) {
    %c0_i32 = arith.constant 0 : i32
    %c0_i32_0 = arith.constant 0 : i32
    %c0_i32_1 = arith.constant 0 : i32
    return %c0_i32, %c0_i32_0 : i32, i32
  }
  func.func @transform_3(%arg0: i32, %arg1: i32) -> (i32, i32) {
    %c0_i32 = arith.constant 0 : i32
    %c0_i32_0 = arith.constant 0 : i32
    %c0_i32_1 = arith.constant 0 : i32
    return %c0_i32, %c0_i32_0 : i32, i32
  }
  func.func @transform_4(%arg0: i32, %arg1: i32) -> (i32, i32) {
    %c0_i32 = arith.constant 0 : i32
    %c0_i32_0 = arith.constant 0 : i32
    %c0_i32_1 = arith.constant 0 : i32
    return %c0_i32, %c0_i32_0 : i32, i32
  }
  func.func @transform_5(%arg0: i32, %arg1: i32) -> (i32, i32) {
    %c0_i32 = arith.constant 0 : i32
    %c0_i32_0 = arith.constant 0 : i32
    %c0_i32_1 = arith.constant 0 : i32
    return %c0_i32, %c0_i32_0 : i32, i32
  }
  func.func @transform_6(%arg0: i32, %arg1: i32) -> (i32, i32) {
    %c0_i32 = arith.constant 0 : i32
    %c0_i32_0 = arith.constant 0 : i32
    %c0_i32_1 = arith.constant 0 : i32
    return %c0_i32, %c0_i32_0 : i32, i32
  }
  func.func @transform_7(%arg0: i32, %arg1: i32) -> (i32, i32) {
    %c0_i32 = arith.constant 0 : i32
    %c0_i32_0 = arith.constant 0 : i32
    %c0_i32_1 = arith.constant 0 : i32
    return %c0_i32, %c0_i32_0 : i32, i32
  }
  func.func @transform_8(%arg0: i32, %arg1: i32) -> (i32, i32) {
    %c0_i32 = arith.constant 0 : i32
    %c0_i32_0 = arith.constant 0 : i32
    %c0_i32_1 = arith.constant 0 : i32
    return %c0_i32, %c0_i32_0 : i32, i32
  }
  func.func @transform_9(%arg0: i32, %arg1: i32) -> (i32, i32) {
    %c0_i32 = arith.constant 0 : i32
    %c0_i32_0 = arith.constant 0 : i32
    %c0_i32_1 = arith.constant 0 : i32
    return %c0_i32, %c0_i32_0 : i32, i32
  }
  func.func @transform_10(%arg0: i32, %arg1: i32) -> (i32, i32) {
    %c0_i32 = arith.constant 0 : i32
    %c0_i32_0 = arith.constant 0 : i32
    %c0_i32_1 = arith.constant 0 : i32
    return %c0_i32, %c0_i32_0 : i32, i32
  }
  func.func @transform_11(%arg0: i32, %arg1: i32) -> (i32, i32, i32) {
    %c0_i32 = arith.constant 0 : i32
    %c0_i32_0 = arith.constant 0 : i32
    return %arg1, %arg0, %c0_i32 : i32, i32, i32
  }
}

</mosaic_0001>

<bundles_post_ra>
// kernel: death_prediction_forward.1
= control target key start
LH: loop header
LB: loop body
LE: loop exit
PB: predicated region body
PF: predicated region fallthrough
CT: control target
= control target key end

     0   :  { %s6209_s0 = inlined_call_operand.vmem [shape: bf16[8,16,25], index: 0, kind: input, shape index: {}]   ;;  %s6210_s1 = inlined_call_operand.vmem [shape: bf16[25,512], index: 1, kind: input, shape index: {}]   ;;  %s6211_s2 = inlined_call_operand.vmem [shape: bf16[128,512], index: 2, kind: input, shape index: {}]   ;;  %s6212_s3 = inlined_call_operand.hbm [shape: f32[1,512], index: 3, kind: input, shape index: {}]   ;;  %s6213_s4 = inlined_call_operand.vmem [shape: bf16[128,512], index: 4, kind: input, shape index: {}]   ;;  %s6214_s5 = inlined_call_operand.hbm [shape: bf16[128,512], index: 5, kind: input, shape index: {}]   ;;  %s6215_s6 = inlined_call_operand.vmem [shape: f32[1,512], index: 6, kind: input, shape index: {}]   ;;  %s6216_s7 = inlined_call_operand.vmem [shape: bf16[128,256], index: 7, kind: input, shape index: {}]   ;;  %s6217_s8 = inlined_call_operand.vmem [shape: f32[1,256], index: 8, kind: input, shape index: {}]   ;;  %s6218_s9 = inlined_call_operand.hbm [shape: bf16[256,128], index: 9, kind: input, shape index: {}]   ;;  %s6219_s10 = inlined_call_operand.vmem [shape: f32[1,128], index: 10, kind: input, shape index: {}]   ;;  %s6220_s11 = inlined_call_operand.vmem [shape: f32[8,16,128], index: 11, kind: output, shape index: {}]  }
   0x1   :  { %6347 = sst [smem:[#allocation74_spill]] %s6219_s10 }
   0x2   :  { %16 = vsyncpa [#allocation9], 0 }
   0x3   :  { %17 = vsyncpa [#allocation11], 0  ;;  %s4640_s17 = smov 0   ;;  %s4642_s18 = smov 0  }
   0x4   :  { %s4644_s19 = smov 0  }
   0x5 LB: > { %6348 = sst [smem:[#allocation15_spill]] %s4564_s18  ;;  %s4570_s20 = smov [#allocation10]   ;;  %s4568_s19 = sphi %s4644_s19, %s23_s19   ;;  %s4564_s18 = sphi %s4642_s18, %s6551_s18   ;;  %s4560_s17 = sphi %s4640_s17, %s6550_s17  }
   0x6   : > { %6349 = sst [smem:[#allocation16_spill]] %s4568_s19  ;;  %s338_s21 = sshll.u32 %s4570_s20, 4  ;;  %s4662_s21 = int_to_ptr.vmem [resolvable:$true] %s338_s21 }
   0x7   : > { %s3485_s22 = sadd.s32 4294967295, %s4568_s19   ;;  %p3487_p0 = scmp.ge.s32.totalorder %s4568_s19, 1 }
   0x8   : > { %p306_p1 = scmp.lt.s32.totalorder %s4568_s19, 3  ;;  %p4658_p2 = scmp.eq.s32.totalorder %s3485_s22, 0 }
   0x9   : > { %s32_s26 = sadd.s32 1, %s4564_s18  ;;  %s4571_s28 = smov [#allocation8]  }
   0xa   : > { %s6350_s23 = scalar_select %p4658_p2, 1, 0 }
   0xb   : > { %p4664_p3 = pnand %p3487_p0, %p306_p1  ;;  %p4677_p6 = scmp.ge.s32.totalorder %s32_s26, 2 }
   0xc   : > { %s325_s29 = sshll.u32 %s4571_s28, 4  ;;  %s4454_s13 = scalar_lea.hbm %s6214_s5, 4096  ;;  %s326_s29 = int_to_ptr.vmem [resolvable:$true] %s325_s29 }
   0xd   : > { %s6351_s24 = scalar_select %p4664_p3, 1, 0 }
   0xe   : > { %p3852_p4 = pneg %p4664_p3  ;;  %p4455_p7 = scmp.ne.s32.totalorder %s6214_s5, %s4454_s13 }
   0xf   : > { %p4461_p11 = scmp.lt.u32.totalorder %s4454_s13, %s6214_s5 }
  0x10   : > { %p4672_p5 = pnand %p4658_p2, %p3852_p4 }
  0x12   : > { %p4689_p8 = pneg %p4672_p5 }
  0x14   : > { %p4457_p9 = pnand %p4689_p8, %p4455_p7 }
  0x16   : > { %p4458_p10 = pneg %p4457_p9 }
  0x18   : > { %p4463_p12 = pnand %p4461_p11, %p4458_p10 }
  0x1a   : > { %4466 = shalt.err (!%p4463_p12)
}
  0x1b   : > { %s4467_s28 = scalar_lea.vmem %s4662_s21, 4096  ;;  %p4475_p4 = scmp.lt.s32.totalorder %s4662_s21, %s4662_s21 }
  0x1c   : > { %p4468_p13 = scmp.ne.s32.totalorder %s4662_s21, %s4467_s28  ;;  %p4476_p2 = scmp.lt.s32.totalorder %s4467_s28, %s4467_s28 }
  0x1e   : > { %p4470_p0 = pnand %p4468_p13, %p4689_p8  ;;  %p4477_p7 = por %p4476_p2, %p4475_p4 }
  0x20   : > { %p4471_p1 = pneg %p4470_p0 }
  0x22   : > { %p4478_p9 = pnand %p4477_p7, %p4471_p1 }
  0x24   : > { %4481 = shalt.err (!%p4478_p9)
}
  0x25   : > { %s4572_s30 = smov 256   ;;  %s4573_s12 = smov 16  }
  0x26   : > { %3858 = dma.hbm_to_vmem [thread:$0]  (!%p4672_p5), %s6214_s5, 4096, %s4662_s21, [#allocation11], %s4572_s30, %s4572_s30, %s4573_s12  }
  0x27   : > { %s6553_s26 = smov (%p4677_p6, %s32_s26), 0  ;;  %s4482_s22 = scalar_lea.hbm %s6212_s3, 64 }
  0x28   : > { %p4483_p2 = scmp.ne.s32.totalorder %s6212_s3, %s4482_s22  ;;  %p4489_p12 = scmp.lt.u32.totalorder %s4482_s22, %s6212_s3 }
  0x2a   : > { %p4485_p10 = pnand %p4483_p2, %p4689_p8 }
  0x2c   : > { %p4486_p11 = pneg %p4485_p10 }
  0x2e   : > { %p4491_p13 = pnand %p4489_p12, %p4486_p11 }
  0x30   : > { %4494 = shalt.err (!%p4491_p13)
}
  0x31   : > { %s4495_s21 = scalar_lea.vmem %s326_s29, 64  ;;  %p4503_p4 = scmp.lt.s32.totalorder %s326_s29, %s326_s29 }
  0x32   : > { %p4496_p6 = scmp.ne.s32.totalorder %s326_s29, %s4495_s21  ;;  %p4504_p7 = scmp.lt.s32.totalorder %s4495_s21, %s4495_s21 }
  0x34   : > { %p4498_p0 = pnand %p4496_p6, %p4689_p8  ;;  %p4505_p9 = por %p4504_p7, %p4503_p4 }
  0x36   : > { %p4499_p1 = pneg %p4498_p0 }
  0x38   : > { %p4506_p3 = pnand %p4505_p9, %p4499_p1 }
  0x3a   : > { %4509 = shalt.err (!%p4506_p3)
}
  0x3b   : > { %3855 = dma.hbm_to_vmem [thread:$0]  (!%p4672_p5), %s6212_s3, 64, %s326_s29, [#allocation9]  }
  0x3c   : > { %s4574_s10 = smov [#allocation12]   ;;  %s4510_s13 = scalar_lea.hbm %s6218_s9, 2048 }
  0x3d   : > { %s360_s19 = sshll.u32 %s4574_s10, 4  ;;  %p4511_p2 = scmp.ne.s32.totalorder %s6218_s9, %s4510_s13  ;;  %s361_s19 = int_to_ptr.vmem [resolvable:$true] %s360_s19 }
  0x3e   : > { %p4517_p11 = scmp.lt.u32.totalorder %s4510_s13, %s6218_s9 }
  0x3f   : > { %p4513_p3 = pnand %p4511_p2, %p4689_p8 }
  0x41   : > { %p4514_p10 = pneg %p4513_p3 }
  0x43   : > { %p4519_p12 = pnand %p4517_p11, %p4514_p10 }
  0x45   : > { %4522 = shalt.err (!%p4519_p12)
}
  0x46   : > { %s4523_s29 = scalar_lea.vmem %s361_s19, 2048  ;;  %p4531_p1 = scmp.lt.s32.totalorder %s361_s19, %s361_s19 }
  0x47   : > { %p4524_p13 = scmp.ne.s32.totalorder %s361_s19, %s4523_s29  ;;  %p4532_p4 = scmp.lt.s32.totalorder %s4523_s29, %s4523_s29 }
  0x49   : > { %p4526_p6 = pnand %p4524_p13, %p4689_p8  ;;  %p4533_p7 = por %p4532_p4, %p4531_p1 }
  0x4b   : > { %p4527_p0 = pneg %p4526_p6 }
  0x4d   : > { %p4534_p9 = pnand %p4533_p7, %p4527_p0 }
  0x4f   : > { %4537 = shalt.err (!%p4534_p9)
}
  0x50   : > { %s4575_s28 = smov 64   ;;  %s4576_s21 = smov 4  }
  0x51   : > { %3861 = dma.hbm_to_vmem [thread:$0]  (!%p4672_p5), %s6218_s9, 2048, %s361_s19, [#allocation11], %s4575_s28, %s4575_s28, %s4576_s21  }
  0x52   : > { %p6355_p2 = scmp.ne.s32.totalorder %s6351_s24, 0 }
  0x54   : > { %394 = sbr.rel (%p6355_p2) target bundleno = 2003 (0x7d3), region = 64 }
  0x5b   : > { %p6356_p3 = scmp.ne.s32.totalorder %s6350_s23, 0 }
  0x5d   : > { %4551 = dma.done.wait (%p6356_p3), [#allocation9], 64  }
  0x5e   : > { %4553 = vsyncadd (%p6356_p3), [#allocation9], 4294967232 }
  0x5f   : > { %4555 = dma.done.wait (%p6356_p3), [#allocation11], 6144  }
  0x60   : > { %4557 = vsyncadd (%p6356_p3), [#allocation11], 4294961152  ;;  %s3496_s25 = sshll.u32 %s4560_s17, 2  ;;  %p3502_p5 = scmp.ne.s32.totalorder %s4560_s17, 0 }
  0x61   : > { %p454_p8 = scmp.lt.s32.totalorder %s3496_s25, 7  ;;  %v4577_v0 = vmov (!%p3502_p5), 0.0  }
  0x62   : > { %480 = sbr.rel (%p3502_p5) target bundleno = 105 (0x69), region = 80  ;;  %481 = vst [vmem:[#allocation2] sm:$0xff] (!%p3502_p5), %v4577_v0  ;;  %482 = vst [vmem:[#allocation2 + $0x8] sm:$0xff] (!%p3502_p5), %v4577_v0 }
  0x63   : > { %s6555_s25 = smov (!%p454_p8, %s3496_s25), 7  ;;  %483 = vst [vmem:[#allocation3] sm:$0xff] (!%p3502_p5), %v4577_v0  ;;  %484 = vst [vmem:[#allocation3 + $0x8] sm:$0xff] (!%p3502_p5), %v4577_v0 }
  0x64   : > { %s3702_s16 = sshll.u32 %s6555_s25, 3  ;;  %s3703_s10 = sshll.u32 %s6555_s25, 4  ;;  %485 = vst [vmem:[#allocation4] sm:$0xff] (!%p3502_p5), %v4577_v0  ;;  %486 = vst [vmem:[#allocation4 + $0x8] sm:$0xff] (!%p3502_p5), %v4577_v0 }
  0x65   : > { %s4764_s30 = scalar_lea.vmem %s6209_s0, %s3702_s16  ;;  %s4769_s14 = scalar_lea.vmem %s6220_s11, %s3703_s10  ;;  %487 = vst [vmem:[#allocation5] sm:$0xff] (!%p3502_p5), %v4577_v0  ;;  %488 = vst [vmem:[#allocation5 + $0x8] sm:$0xff] (!%p3502_p5), %v4577_v0 }
  0x69 PF: > { %v3902_v1 = vld [vmem:[%s6210_s1 + $0x4] ss:$16 sps:$4 sm:$0xff]   ;;  %vm596_vm0 = vcmask 1043456   ;;  %vm597_vm1 = vcmask 1044480   ;;  %v3904_v2 = vld [vmem:[%s6210_s1 + $0xc] ss:$16 sps:$4 sm:$0xff]  }
  0x6a   : > { %612 = vmatprep.subr.bf16.mxu0 %v3902_v1  ;;  %v3906_v3 = vld [vmem:[%s6210_s1] ss:$16 sps:$4 sm:$0xff]   ;;  %v3907_v4 = vld [vmem:[%s6210_s1 + $0x8] ss:$16 sps:$4 sm:$0xff]   ;;  %v4578_v5 = vmov 65535   ;;  %v6226_v7 = vmov 0   ;;  %685 = vmatprep.subr.bf16.mxu1 %v3904_v2 }
  0x6b   : > { %v598_v6 = vsel %vm596_vm0, 4294967295, %v4578_v5  ;;  %644 = vmatprep.mubr.bf16.mxu0 %v6226_v7  ;;  %v3908_v8 = vld [vmem:[%s6210_s1 + $0x24] ss:$16 sps:$4 sm:$0x1f]   ;;  %717 = vmatprep.mubr.bf16.mxu1 %v6226_v7  ;;  %v4807_v19 = vld [vmem:[%s6211_s2 + $0xc] ss:$16 sps:$4 sm:$0xff]  }
  0x6c   : > { %v599_v9 = vsel %vm597_vm1, %v598_v6, 0  ;;  %613 = vmatpush1.bf16.msra.mxu0 %v3906_v3  ;;  %686 = vmatpush1.bf16.msra.mxu1 %v3907_v4  ;;  %v3910_v10 = vld [vmem:[%s6210_s1 + $0x2c] ss:$16 sps:$4 sm:$0x1f]   ;;  %v3914_v15 = vld [vmem:[%s4764_s30] sm:$0xff]   ;;  %vm583_vm2 = vcmask 203776  }
  0x6d   : > { %v604_v11 = vand.u32 %v3908_v8, %v599_v9  ;;  %v3912_v12 = vld [vmem:[%s6210_s1 + $0x20] ss:$16 sps:$4 sm:$0x1f]   ;;  %v3913_v13 = vld [vmem:[%s6210_s1 + $0x28] ss:$16 sps:$4 sm:$0x1f]   ;;  %v610_v14 = vand.u32 %v3910_v10, %v599_v9 }
  0x6e   : > { %v601_v16 = vand.u32 %v3912_v12, %v599_v9  ;;  %v607_v17 = vand.u32 %v3913_v13, %v599_v9  ;;  %v4802_v18 = vld [vmem:[%s6211_s2 + $0x4] ss:$16 sps:$4 sm:$0xff]   ;;  %v4812_v20 = vld [vmem:[%s6211_s2] ss:$16 sps:$4 sm:$0xff]   ;;  %v4817_v21 = vld [vmem:[%s6211_s2 + $0x8] ss:$16 sps:$4 sm:$0xff]  }
  0x6f   : > { %614 = vmatprep.subr.bf16.mxu0 %v604_v11  ;;  %687 = vmatprep.subr.bf16.mxu1 %v610_v14  ;;  %v4824_v22 = vld [vmem:[%s6211_s2 + $0x24] ss:$16 sps:$4 sm:$0xff]   ;;  %v4829_v23 = vld [vmem:[%s6211_s2 + $0x2c] ss:$16 sps:$4 sm:$0xff]   ;;  %v4836_v24 = vld [vmem:[%s6211_s2 + $0x20] ss:$16 sps:$4 sm:$0xff]  }
  0x70   : > { %615 = vmatpush1.bf16.msra.mxu0 %v601_v16  ;;  %688 = vmatpush1.bf16.msra.mxu1 %v607_v17  ;;  %v4843_v25 = vld [vmem:[%s6211_s2 + $0x28] ss:$16 sps:$4 sm:$0xff]   ;;  %v4850_v26 = vld [vmem:[%s6211_s2 + $0x44] ss:$16 sps:$4 sm:$0xff]   ;;  %v4858_v28 = vld [vmem:[%s6211_s2 + $0x4c] ss:$16 sps:$4 sm:$0xff]  }
  0x71   : > { %1064 = vmatprep.subr.bf16.mxu0 %v4802_v18  ;;  %1107 = vmatprep.subr.bf16.mxu1 %v4807_v19  ;;  %v3927_v27 = vld [vmem:[%s4764_s30 + $0x8] sm:$0xff]   ;;  %v4863_v29 = vld [vmem:[%s6211_s2 + $0x40] ss:$16 sps:$4 sm:$0xff]   ;;  %v4877_v31 = vld [vmem:[%s6211_s2 + $0x64] ss:$16 sps:$4 sm:$0xff]   ;;  %s6548_s21 = sld [smem:[#allocation74_spill]] }
  0x72   : > { %v4870_v30 = vld [vmem:[%s6211_s2 + $0x48] ss:$16 sps:$4 sm:$0xff]   ;;  %v4882_v32 = vld [vmem:[%s6211_s2 + $0x6c] ss:$16 sps:$4 sm:$0xff]   ;;  %v4889_v33 = vld [vmem:[%s6211_s2 + $0x60] ss:$16 sps:$4 sm:$0xff]  }
  0x73   : > { %3515 = vmatmul.mubr.msk.bf16.vlgmr.msra.gmra.mrb[0].mxu0 %vm583_vm2, %v3914_v15  ;;  %3519 = vmatmul.mubr.msk.bf16.vlgmr.msra.gmra.mrb[0].mxu1 %vm583_vm2, %v3914_v15  ;;  %v4896_v34 = vld [vmem:[%s6211_s2 + $0x68] ss:$16 sps:$4 sm:$0xff]   ;;  %v4901_v35 = vld [vmem:[%s6211_s2 + $0x84] ss:$16 sps:$4 sm:$0xff]   ;;  %v4908_v36 = vld [vmem:[%s6211_s2 + $0x8c] ss:$16 sps:$4 sm:$0xff]  }
  0x74   : > { %1065 = vmatpush1.bf16.msra.mxu0 %v4812_v20  ;;  %1108 = vmatpush1.bf16.msra.mxu1 %v4817_v21  ;;  %v3940_v37 = vld [vmem:[%s4764_s30 + $0x10] sm:$0xff]   ;;  %v4921_v39 = vld [vmem:[%s6211_s2 + $0x88] ss:$16 sps:$4 sm:$0xff]   ;;  %v4935_v41 = vld [vmem:[%s6211_s2 + $0xac] ss:$16 sps:$4 sm:$0xff]  }
  0x75   : > { %1066 = vmatprep.subr.bf16.mxu0 %v4824_v22  ;;  %1109 = vmatprep.subr.bf16.mxu1 %v4829_v23  ;;  %v4916_v38 = vld [vmem:[%s6211_s2 + $0x80] ss:$16 sps:$4 sm:$0xff]   ;;  %v4928_v40 = vld [vmem:[%s6211_s2 + $0xa4] ss:$16 sps:$4 sm:$0xff]   ;;  %v4949_v43 = vld [vmem:[%s6211_s2 + $0xa8] ss:$16 sps:$4 sm:$0xff]  }
  0x76   : > { %654 = vmatprep.mubr.bf16.mxu0 %v6226_v7  ;;  %727 = vmatprep.mubr.bf16.mxu1 %v6226_v7  ;;  %v4942_v42 = vld [vmem:[%s6211_s2 + $0xa0] ss:$16 sps:$4 sm:$0xff]   ;;  %v4956_v44 = vld [vmem:[%s6211_s2 + $0xc4] ss:$16 sps:$4 sm:$0xff]   ;;  %v4961_v45 = vld [vmem:[%s6211_s2 + $0xcc] ss:$16 sps:$4 sm:$0xff]  }
  0x77   : > { %v3953_v46 = vld [vmem:[%s4764_s30 + $0x18] sm:$0xff]   ;;  %v4969_v47 = vld [vmem:[%s6211_s2 + $0xc0] ss:$16 sps:$4 sm:$0xff]   ;;  %v4983_v49 = vld [vmem:[%s6211_s2 + $0xe4] ss:$16 sps:$4 sm:$0xff]  }
  0x78   : > { %1067 = vmatpush1.bf16.msra.mxu0 %v4836_v24  ;;  %1110 = vmatpush1.bf16.msra.mxu1 %v4843_v25  ;;  %v4976_v48 = vld [vmem:[%s6211_s2 + $0xc8] ss:$16 sps:$4 sm:$0xff]   ;;  %v4988_v50 = vld [vmem:[%s6211_s2 + $0xec] ss:$16 sps:$4 sm:$0xff]   ;;  %v4993_v51 = vld [vmem:[%s6211_s2 + $0xe0] ss:$16 sps:$4 sm:$0xff]  }
  0x79   : > { %1068 = vmatprep.subr.bf16.mxu0 %v4850_v26  ;;  %1111 = vmatprep.subr.bf16.mxu1 %v4858_v28  ;;  %v4998_v52 = vld [vmem:[%s6211_s2 + $0xe8] ss:$16 sps:$4 sm:$0xff]   ;;  %v887_v53 = vld [vmem:[#allocation2] sm:$0xff]  ;;  %v5016_v59 = vld [vmem:[#allocation10 + $0x8] ss:$16 sps:$4 sm:$0xff]  }
  0x7a   : > { %v888_v54 = vld [vmem:[#allocation2 + $0x8] sm:$0xff]  ;;  %v5008_v56 = vld [vmem:[#allocation10 + $0xc] ss:$16 sps:$4 sm:$0xff]   ;;  %v5012_v58 = vld [vmem:[#allocation10] ss:$16 sps:$4 sm:$0xff]  }
  0x7b   : > { %3516 = vmatmul.mubr.msk.bf16.gmra.mrb[4].mxu0 %vm583_vm2, %v3927_v27  ;;  %3520 = vmatmul.mubr.msk.bf16.gmra.mrb[4].mxu1 %vm583_vm2, %v3927_v27  ;;  %v5004_v55 = vld [vmem:[#allocation10 + $0x4] ss:$16 sps:$4 sm:$0xff]   ;;  %v903_v57 = vpack.c.bf16 %v888_v54, %v887_v53  ;;  %v5022_v61 = vld [vmem:[#allocation10 + $0x2c] ss:$16 sps:$4 sm:$0xff]   ;;  %v5024_v62 = vld [vmem:[#allocation10 + $0x20] ss:$16 sps:$4 sm:$0xff]  }
  0x7c   : > { %1069 = vmatpush1.bf16.msra.mxu0 %v4863_v29  ;;  %1112 = vmatpush1.bf16.msra.mxu1 %v4870_v30  ;;  %v5020_v60 = vld [vmem:[#allocation10 + $0x24] ss:$16 sps:$4 sm:$0xff]   ;;  %v5026_v63 = vld [vmem:[#allocation10 + $0x28] ss:$16 sps:$4 sm:$0xff]   ;;  %v5030_v1 = vld [vmem:[#allocation10 + $0x4c] ss:$16 sps:$4 sm:$0xff]  }
  0x7d   : > { %1070 = vmatprep.subr.bf16.mxu0 %v4877_v31  ;;  %1113 = vmatprep.subr.bf16.mxu1 %v4882_v32  ;;  %v5028_v0 = vld [vmem:[#allocation10 + $0x44] ss:$16 sps:$4 sm:$0xff]   ;;  %v5036_v2 = vld [vmem:[#allocation10 + $0x40] ss:$16 sps:$4 sm:$0xff]   ;;  %v5038_v3 = vld [vmem:[#allocation10 + $0x48] ss:$16 sps:$4 sm:$0xff]  }
  0x7e   : > { %664 = vmatprep.mubr.bf16.mxu0 %v6226_v7  ;;  %737 = vmatprep.mubr.bf16.mxu1 %v6226_v7  ;;  %6357 = vst [vmem:[#allocation17_spill] sm:$0xff] %v5038_v3  ;;  %v5042_v4 = vld [vmem:[#allocation10 + $0x64] ss:$16 sps:$4 sm:$0xff]   ;;  %v5044_v5 = vld [vmem:[#allocation10 + $0x6c] ss:$16 sps:$4 sm:$0xff]  }
  0x7f   : > { %6358 = vst [vmem:[#allocation18_spill] sm:$0xff] %v5042_v4  ;;  %6359 = vst [vmem:[#allocation19_spill] sm:$0xff] %v5044_v5  ;;  %v5050_v6 = vld [vmem:[#allocation10 + $0x60] ss:$16 sps:$4 sm:$0xff]   ;;  %v5052_v8 = vld [vmem:[#allocation10 + $0x68] ss:$16 sps:$4 sm:$0xff]  }
  0x80   : > { %1071 = vmatpush1.bf16.msra.mxu0 %v4889_v33  ;;  %1114 = vmatpush1.bf16.msra.mxu1 %v4896_v34  ;;  %6360 = vst [vmem:[#allocation20_spill] sm:$0xff] %v5050_v6  ;;  %6361 = vst [vmem:[#allocation21_spill] sm:$0xff] %v5052_v8  ;;  %v5060_v9 = vld [vmem:[#allocation10 + $0x84] ss:$16 sps:$4 sm:$0xff]   ;;  %v5062_v10 = vld [vmem:[#allocation10 + $0x8c] ss:$16 sps:$4 sm:$0xff]  }
  0x81   : > { %1072 = vmatprep.subr.bf16.mxu0 %v4901_v35  ;;  %1115 = vmatprep.subr.bf16.mxu1 %v4908_v36  ;;  %6362 = vst [vmem:[#allocation22_spill] sm:$0xff] %v5060_v9  ;;  %6363 = vst [vmem:[#allocation23_spill] sm:$0xff] %v5062_v10  ;;  %v5064_v11 = vld [vmem:[#allocation10 + $0x80] ss:$16 sps:$4 sm:$0xff]   ;;  %v5066_v12 = vld [vmem:[#allocation10 + $0x88] ss:$16 sps:$4 sm:$0xff]  }
  0x82   : > { %6364 = vst [vmem:[#allocation24_spill] sm:$0xff] %v5064_v11  ;;  %6365 = vst [vmem:[#allocation25_spill] sm:$0xff] %v5066_v12  ;;  %v5072_v13 = vld [vmem:[#allocation10 + $0xa4] ss:$16 sps:$4 sm:$0xff]   ;;  %v5074_v14 = vld [vmem:[#allocation10 + $0xac] ss:$16 sps:$4 sm:$0xff]  }
  0x83   : > { %3517 = vmatmul.mubr.msk.bf16.gmra.mrb[8].mxu0 %vm583_vm2, %v3940_v37  ;;  %3521 = vmatmul.mubr.msk.bf16.gmra.mrb[8].mxu1 %vm583_vm2, %v3940_v37  ;;  %6366 = vst [vmem:[#allocation26_spill] sm:$0xff] %v5072_v13  ;;  %6367 = vst [vmem:[#allocation27_spill] sm:$0xff] %v5074_v14  ;;  %v5076_v15 = vld [vmem:[#allocation10 + $0xa0] ss:$16 sps:$4 sm:$0xff]   ;;  %v5078_v16 = vld [vmem:[#allocation10 + $0xa8] ss:$16 sps:$4 sm:$0xff]  }
  0x84   : > { %1073 = vmatpush1.bf16.msra.mxu0 %v4916_v38  ;;  %1116 = vmatpush1.bf16.msra.mxu1 %v4921_v39  ;;  %6368 = vst [vmem:[#allocation28_spill] sm:$0xff] %v5076_v15  ;;  %6369 = vst [vmem:[#allocation29_spill] sm:$0xff] %v5078_v16  ;;  %v5084_v17 = vld [vmem:[#allocation10 + $0xc4] ss:$16 sps:$4 sm:$0xff]   ;;  %v5086_v27 = vld [vmem:[#allocation10 + $0xcc] ss:$16 sps:$4 sm:$0xff]  }
  0x85   : > { %1074 = vmatprep.subr.bf16.mxu0 %v4928_v40  ;;  %1117 = vmatprep.subr.bf16.mxu1 %v4935_v41  ;;  %6370 = vst [vmem:[#allocation30_spill] sm:$0xff] %v5084_v17  ;;  %6371 = vst [vmem:[#allocation31_spill] sm:$0xff] %v5086_v27  ;;  %v5088_v37 = vld [vmem:[#allocation10 + $0xc0] ss:$16 sps:$4 sm:$0xff]   ;;  %v5096_v53 = vld [vmem:[#allocation10 + $0xe4] ss:$16 sps:$4 sm:$0xff]  }
  0x86   : > { %674 = vmatprep.mubr.bf16.mxu0 %v6226_v7  ;;  %747 = vmatprep.mubr.bf16.mxu1 %v6226_v7  ;;  %6372 = vst [vmem:[#allocation32_spill] sm:$0xff] %v5088_v37  ;;  %6374 = vst [vmem:[#allocation34_spill] sm:$0xff] %v5096_v53  ;;  %v5098_v54 = vld [vmem:[#allocation10 + $0xec] ss:$16 sps:$4 sm:$0xff]  }
  0x87   : > { %6375 = vst [vmem:[#allocation35_spill] sm:$0xff] %v5098_v54 }
  0x88   : > { %1075 = vmatpush1.bf16.msra.mxu0 %v4942_v42  ;;  %1118 = vmatpush1.bf16.msra.mxu1 %v4949_v43 }
  0x89   : > { %1076 = vmatprep.subr.bf16.mxu0 %v4956_v44  ;;  %1119 = vmatprep.subr.bf16.mxu1 %v4961_v45 }
  0x8b   : > { %3518 = vmatmul.mubr.msk.bf16.gmra.mrb[12].mxu0 %vm583_vm2, %v3953_v46  ;;  %3522 = vmatmul.mubr.msk.bf16.gmra.mrb[12].mxu1 %vm583_vm2, %v3953_v46  ;;  %v5090_v46 = vld [vmem:[#allocation10 + $0xc8] ss:$16 sps:$4 sm:$0xff]  }
  0x8c   : > { %1077 = vmatpush1.bf16.msra.mxu0 %v4969_v47  ;;  %1120 = vmatpush1.bf16.msra.mxu1 %v4976_v48  ;;  %6373 = vst [vmem:[#allocation33_spill] sm:$0xff] %v5090_v46 }
  0x8d   : > { %1078 = vmatprep.subr.bf16.mxu0 %v4983_v49  ;;  %1121 = vmatprep.subr.bf16.mxu1 %v4988_v50 }
  0x8e   : > { %1096 = vmatprep.mubr.bf16.mxu0 %v6226_v7  ;;  %1139 = vmatprep.mubr.bf16.mxu1 %v6226_v7 }
  0x90   : > { %1079 = vmatpush1.bf16.msra.mxu0 %v4993_v51  ;;  %1122 = vmatpush1.bf16.msra.mxu1 %v4998_v52 }
  0x91   : > { %1368 = vmatprep.subr.bf16.mxu0 %v5004_v55  ;;  %1411 = vmatprep.subr.bf16.mxu1 %v5008_v56 }
  0x93   : > { %1097 = vmatmul.mubr.bf16.vlgmr.msra.gmra.mrb[0].mxu0 %v903_v57  ;;  %1140 = vmatmul.mubr.bf16.vlgmr.msra.gmra.mrb[0].mxu1 %v903_v57  ;;  %v5100_v57 = vld [vmem:[#allocation10 + $0xe0] ss:$16 sps:$4 sm:$0xff]  }
  0x94   : > { %1369 = vmatpush1.bf16.msra.mxu0 %v5012_v58  ;;  %1412 = vmatpush1.bf16.msra.mxu1 %v5016_v59  ;;  %6376 = vst [vmem:[#allocation36_spill] sm:$0xff] %v5100_v57 }
  0x95   : > { %1370 = vmatprep.subr.bf16.mxu0 %v5020_v60  ;;  %1413 = vmatprep.subr.bf16.mxu1 %v5022_v61 }
  0x96   : > { %1400 = vmatprep.mubr.bf16.mxu0 %v6226_v7  ;;  %1443 = vmatprep.mubr.bf16.mxu1 %v6226_v7  ;;  %v5102_v7 = vld [vmem:[#allocation10 + $0xe8] ss:$16 sps:$4 sm:$0xff]  }
  0x97   : > { %6377 = vst [vmem:[#allocation37_spill] sm:$0xff] %v5102_v7 }
  0x98   : > { %1371 = vmatpush1.bf16.msra.mxu0 %v5024_v62  ;;  %1414 = vmatpush1.bf16.msra.mxu1 %v5026_v63 }
  0x99   : > { %1372 = vmatprep.subr.bf16.mxu0 %v5028_v0  ;;  %1415 = vmatprep.subr.bf16.mxu1 %v5030_v1 }
  0x9c   : > { %1373 = vmatpush1.bf16.msra.mxu0 %v5036_v2  ;;  %1416 = vmatpush1.bf16.msra.mxu1 %v5038_v3 }
  0x9d   : > { %1374 = vmatprep.subr.bf16.mxu0 %v5042_v4  ;;  %1417 = vmatprep.subr.bf16.mxu1 %v5044_v5 }
  0xa0   : > { %1375 = vmatpush1.bf16.msra.mxu0 %v5050_v6  ;;  %1418 = vmatpush1.bf16.msra.mxu1 %v5052_v8 }
  0xa1   : > { %1376 = vmatprep.subr.bf16.mxu0 %v5060_v9  ;;  %1419 = vmatprep.subr.bf16.mxu1 %v5062_v10 }
  0xa4   : > { %1377 = vmatpush1.bf16.msra.mxu0 %v5064_v11  ;;  %1420 = vmatpush1.bf16.msra.mxu1 %v5066_v12 }
  0xa5   : > { %1378 = vmatprep.subr.bf16.mxu0 %v5072_v13  ;;  %1421 = vmatprep.subr.bf16.mxu1 %v5074_v14 }
  0xa8   : > { %1379 = vmatpush1.bf16.msra.mxu0 %v5076_v15  ;;  %1422 = vmatpush1.bf16.msra.mxu1 %v5078_v16  ;;  %v5138_v16 = vld [vmem:[%s6213_s4 + $0x2c] ss:$16 sps:$4 sm:$0xff]  }
  0xa9   : > { %1380 = vmatprep.subr.bf16.mxu0 %v5084_v17  ;;  %1423 = vmatprep.subr.bf16.mxu1 %v5086_v27  ;;  %v891_v27 = vld [vmem:[#allocation4] sm:$0xff]  ;;  %v892_v17 = vld [vmem:[#allocation4 + $0x8] sm:$0xff]  ;;  %6383 = vst [vmem:[#allocation43_spill] sm:$0xff] %v5138_v16 }
  0xac   : > { %1381 = vmatpush1.bf16.msra.mxu0 %v5088_v37  ;;  %1424 = vmatpush1.bf16.msra.mxu1 %v5090_v46  ;;  %v5111_v46 = vld [vmem:[%s6213_s4 + $0x4] ss:$16 sps:$4 sm:$0xff]   ;;  %v5116_v37 = vld [vmem:[%s6213_s4 + $0xc] ss:$16 sps:$4 sm:$0xff]  }
  0xad   : > { %1382 = vmatprep.subr.bf16.mxu0 %v5096_v53  ;;  %1425 = vmatprep.subr.bf16.mxu1 %v5098_v54  ;;  %6378 = vst [vmem:[#allocation38_spill] sm:$0xff] %v5111_v46  ;;  %6379 = vst [vmem:[#allocation39_spill] sm:$0xff] %v5116_v37  ;;  %v5121_v54 = vld [vmem:[%s6213_s4] ss:$16 sps:$4 sm:$0xff]   ;;  %v5133_v53 = vld [vmem:[%s6213_s4 + $0x24] ss:$16 sps:$4 sm:$0xff]  }
  0xae   : > { %6380 = vst [vmem:[#allocation40_spill] sm:$0xff] %v5121_v54  ;;  %6382 = vst [vmem:[#allocation42_spill] sm:$0xff] %v5133_v53 }
  0xb0   : > { %1383 = vmatpush1.bf16.msra.mxu0 %v5100_v57  ;;  %1426 = vmatpush1.bf16.msra.mxu1 %v5102_v7  ;;  %v5126_v7 = vld [vmem:[%s6213_s4 + $0x8] ss:$16 sps:$4 sm:$0xff]   ;;  %v1207_v57 = vpack.c.bf16 %v892_v17, %v891_v27  ;;  %v5145_v17 = vld [vmem:[%s6213_s4 + $0x20] ss:$16 sps:$4 sm:$0xff]  }
  0xb1   : > { %6381 = vst [vmem:[#allocation41_spill] sm:$0xff] %v5126_v7  ;;  %1614 = vmatprep.subr.bf16.mxu0 %v5111_v46  ;;  %1657 = vmatprep.subr.bf16.mxu1 %v5116_v37  ;;  %6384 = vst [vmem:[#allocation44_spill] sm:$0xff] %v5145_v17  ;;  %v5150_v27 = vld [vmem:[%s6213_s4 + $0x28] ss:$16 sps:$4 sm:$0xff]   ;;  %v505_v46 = vld [vmem:[#allocation8] sm:$0xf] }
  0xb2   : > { %6385 = vst [vmem:[#allocation45_spill] sm:$0xff] %v5150_v27 }
  0xb3   : > { %1401 = vmatmul.mubr.bf16.vlgmr.msra.gmra.mrb[16].mxu0 %v1207_v57  ;;  %1444 = vmatmul.mubr.bf16.vlgmr.msra.gmra.mrb[16].mxu1 %v1207_v57  ;;  %v6386_v57 = vmov 0  }
  0xb4   : > { %1615 = vmatpush1.bf16.msra.mxu0 %v5121_v54  ;;  %1658 = vmatpush1.bf16.msra.mxu1 %v5126_v7  ;;  %v5159_v7 = vld [vmem:[%s6213_s4 + $0x44] ss:$16 sps:$4 sm:$0xff]   ;;  %v5164_v54 = vld [vmem:[%s6213_s4 + $0x4c] ss:$16 sps:$4 sm:$0xff]  }
  0xb5   : > { %1616 = vmatprep.subr.bf16.mxu0 %v5133_v53  ;;  %1659 = vmatprep.subr.bf16.mxu1 %v5138_v16  ;;  %6387 = vst [vmem:[#allocation46_spill] sm:$0xff] %v5159_v7  ;;  %6388 = vst [vmem:[#allocation47_spill] sm:$0xff] %v5164_v54  ;;  %v5171_v16 = vld [vmem:[%s6213_s4 + $0x40] ss:$16 sps:$4 sm:$0xff]   ;;  %v5176_v53 = vld [vmem:[%s6213_s4 + $0x48] ss:$16 sps:$4 sm:$0xff]  }
  0xb6   : > { %1646 = vmatprep.mubr.bf16.mxu0 %v6386_v57  ;;  %1689 = vmatprep.mubr.bf16.mxu1 %v6386_v57  ;;  %6389 = vst [vmem:[#allocation48_spill] sm:$0xff] %v5171_v16  ;;  %6390 = vst [vmem:[#allocation49_spill] sm:$0xff] %v5176_v53 }
  0xb8   : > { %1617 = vmatpush1.bf16.msra.mxu0 %v5145_v17  ;;  %1660 = vmatpush1.bf16.msra.mxu1 %v5150_v27  ;;  %v5183_v17 = vld [vmem:[%s6213_s4 + $0x64] ss:$16 sps:$4 sm:$0xff]   ;;  %v5188_v27 = vld [vmem:[%s6213_s4 + $0x6c] ss:$16 sps:$4 sm:$0xff]  }
  0xb9   : > { %1618 = vmatprep.subr.bf16.mxu0 %v5159_v7  ;;  %1661 = vmatprep.subr.bf16.mxu1 %v5164_v54  ;;  %6391 = vst [vmem:[#allocation50_spill] sm:$0xff] %v5183_v17  ;;  %6392 = vst [vmem:[#allocation51_spill] sm:$0xff] %v5188_v27  ;;  %v5195_v7 = vld [vmem:[%s6213_s4 + $0x60] ss:$16 sps:$4 sm:$0xff]   ;;  %v5200_v54 = vld [vmem:[%s6213_s4 + $0x68] ss:$16 sps:$4 sm:$0xff]  }
  0xba   : > { %6393 = vst [vmem:[#allocation52_spill] sm:$0xff] %v5195_v7  ;;  %6394 = vst [vmem:[#allocation53_spill] sm:$0xff] %v5200_v54 }
  0xbc   : > { %1619 = vmatpush1.bf16.msra.mxu0 %v5171_v16  ;;  %1662 = vmatpush1.bf16.msra.mxu1 %v5176_v53  ;;  %v5207_v16 = vld [vmem:[%s6213_s4 + $0x84] ss:$16 sps:$4 sm:$0xff]   ;;  %v5212_v53 = vld [vmem:[%s6213_s4 + $0x8c] ss:$16 sps:$4 sm:$0xff]  }
  0xbd   : > { %1620 = vmatprep.subr.bf16.mxu0 %v5183_v17  ;;  %1663 = vmatprep.subr.bf16.mxu1 %v5188_v27  ;;  %6395 = vst [vmem:[#allocation54_spill] sm:$0xff] %v5207_v16  ;;  %6396 = vst [vmem:[#allocation55_spill] sm:$0xff] %v5212_v53  ;;  %v5219_v17 = vld [vmem:[%s6213_s4 + $0x80] ss:$16 sps:$4 sm:$0xff]   ;;  %v5224_v27 = vld [vmem:[%s6213_s4 + $0x88] ss:$16 sps:$4 sm:$0xff]  }
  0xbe   : > { %6397 = vst [vmem:[#allocation56_spill] sm:$0xff] %v5219_v17  ;;  %6398 = vst [vmem:[#allocation57_spill] sm:$0xff] %v5224_v27 }
  0xc0   : > { %1621 = vmatpush1.bf16.msra.mxu0 %v5195_v7  ;;  %1664 = vmatpush1.bf16.msra.mxu1 %v5200_v54  ;;  %v5231_v7 = vld [vmem:[%s6213_s4 + $0xa4] ss:$16 sps:$4 sm:$0xff]   ;;  %v5236_v54 = vld [vmem:[%s6213_s4 + $0xac] ss:$16 sps:$4 sm:$0xff]  }
  0xc1   : > { %1622 = vmatprep.subr.bf16.mxu0 %v5207_v16  ;;  %1665 = vmatprep.subr.bf16.mxu1 %v5212_v53  ;;  %6399 = vst [vmem:[#allocation58_spill] sm:$0xff] %v5231_v7  ;;  %6400 = vst [vmem:[#allocation59_spill] sm:$0xff] %v5236_v54  ;;  %v5243_v16 = vld [vmem:[%s6213_s4 + $0xa0] ss:$16 sps:$4 sm:$0xff]   ;;  %v5248_v53 = vld [vmem:[%s6213_s4 + $0xa8] ss:$16 sps:$4 sm:$0xff]  }
  0xc2   : > { %6401 = vst [vmem:[#allocation60_spill] sm:$0xff] %v5243_v16  ;;  %6402 = vst [vmem:[#allocation61_spill] sm:$0xff] %v5248_v53 }
  0xc4   : > { %1623 = vmatpush1.bf16.msra.mxu0 %v5219_v17  ;;  %1666 = vmatpush1.bf16.msra.mxu1 %v5224_v27  ;;  %v5255_v17 = vld [vmem:[%s6213_s4 + $0xc4] ss:$16 sps:$4 sm:$0xff]   ;;  %v5260_v27 = vld [vmem:[%s6213_s4 + $0xcc] ss:$16 sps:$4 sm:$0xff]  }
  0xc5   : > { %1624 = vmatprep.subr.bf16.mxu0 %v5231_v7  ;;  %1667 = vmatprep.subr.bf16.mxu1 %v5236_v54  ;;  %6403 = vst [vmem:[#allocation62_spill] sm:$0xff] %v5255_v17  ;;  %6404 = vst [vmem:[#allocation63_spill] sm:$0xff] %v5260_v27  ;;  %v5267_v7 = vld [vmem:[%s6213_s4 + $0xc0] ss:$16 sps:$4 sm:$0xff]   ;;  %v5272_v54 = vld [vmem:[%s6213_s4 + $0xc8] ss:$16 sps:$4 sm:$0xff]  }
  0xc6   : > { %6405 = vst [vmem:[#allocation64_spill] sm:$0xff] %v5267_v7  ;;  %6406 = vst [vmem:[#allocation65_spill] sm:$0xff] %v5272_v54 }
  0xc8   : > { %1625 = vmatpush1.bf16.msra.mxu0 %v5243_v16  ;;  %1668 = vmatpush1.bf16.msra.mxu1 %v5248_v53  ;;  %v5279_v16 = vld [vmem:[%s6213_s4 + $0xe4] ss:$16 sps:$4 sm:$0xff]   ;;  %v5284_v53 = vld [vmem:[%s6213_s4 + $0xec] ss:$16 sps:$4 sm:$0xff]  }
  0xc9   : > { %1626 = vmatprep.subr.bf16.mxu0 %v5255_v17  ;;  %1669 = vmatprep.subr.bf16.mxu1 %v5260_v27  ;;  %6407 = vst [vmem:[#allocation66_spill] sm:$0xff] %v5279_v16  ;;  %6408 = vst [vmem:[#allocation67_spill] sm:$0xff] %v5284_v53  ;;  %v5291_v17 = vld [vmem:[%s6213_s4 + $0xe0] ss:$16 sps:$4 sm:$0xff]   ;;  %v5296_v27 = vld [vmem:[%s6213_s4 + $0xe8] ss:$16 sps:$4 sm:$0xff]  }
  0xca   : > { %6409 = vst [vmem:[#allocation68_spill] sm:$0xff] %v5291_v17  ;;  %6410 = vst [vmem:[#allocation69_spill] sm:$0xff] %v5296_v27 }
  0xcc   : > { %1627 = vmatpush1.bf16.msra.mxu0 %v5267_v7  ;;  %1670 = vmatpush1.bf16.msra.mxu1 %v5272_v54  ;;  %v507_v54 = vlaneseq }
  0xcd   : > { %1628 = vmatprep.subr.bf16.mxu0 %v5279_v16  ;;  %1671 = vmatprep.subr.bf16.mxu1 %v5284_v53 }
  0xce   : > { %v5304_v7 = vshrl.u32 %v507_v54, 7 }
  0xd0   : > { %1629 = vmatpush1.bf16.msra.mxu0 %v5291_v17  ;;  %1672 = vmatpush1.bf16.msra.mxu1 %v5296_v27  ;;  %v5307_v37 = vsub.s32 0, %v5304_v7  ;;  %v5310_v15 = vsub.s32 1, %v5304_v7  ;;  %v6306_v9 = vsub.s32 2, %v5304_v7 }
  0xd1   : > { %1788 = vmatprep.subr.bf16.mxu0 %v4802_v18  ;;  %1831 = vmatprep.subr.bf16.mxu1 %v4807_v19  ;;  %v6303_v19 = vsub.s32 3, %v5304_v7 }
  0xd2   : > { %6411 = vst [vmem:[#allocation70_spill] sm:$0xff] %v5307_v37  ;;  %6412 = vst [vmem:[#allocation71_spill] sm:$0xff] %v5310_v15  ;;  %v5313_v53 = vrot.slane %v505_v46, %v5307_v37  ;;  %v5316_v17 = vrot.slane %v505_v46, %v5310_v15 }
  0xd3   : > { %v5325_v5 = vrot.slane %v505_v46, %v6303_v19 }
  0xd4   : > { %6413 = vst [vmem:[#allocation72_spill] sm:$0xff] %v5313_v53 }
 0x166   : > { %v1098_v27 = vpop.f32.mrb[0].mxu0  ;;  %v1141_v18 = vpop.f32.mrb[0].mxu1 }
 0x167   : > { %v3744_v54 = vadd.f32 %v1098_v27, %v5313_v53  ;;  %v1100_v16 = vpop.f32.mrb[1].mxu0  ;;  %v1143_v14 = vpop.f32.mrb[1].mxu1 }
 0x168   : > { %v3745_v13 = vadd.f32 %v1100_v16, %v5316_v17  ;;  %v1102_v12 = vpop.f32.mrb[2].mxu0  ;;  %v1145_v11 = vpop.f32.mrb[2].mxu1  ;;  %v3761_v3 = vadd.f32 %v1143_v14, %v5325_v5 }
 0x169   : > { %v3555_v10 = vmul.f32 -1.442695, %v3744_v54  ;;  %v3746_v37 = vadd.f32 %v1102_v12, %v5313_v53  ;;  %v1104_v8 = vpop.f32.mrb[3].mxu0  ;;  %v1147_v15 = vpop.f32.mrb[3].mxu1  ;;  %v5330_v54 = vrot.slane %v505_v46, %v6306_v9 }
 0x16a   : > { %v3557_v6 = vmul.f32 -1.442695, %v3745_v13  ;;  %v3747_v27 = vadd.f32 %v1104_v8, %v5316_v17  ;;  %v3559_v13 = vmul.f32 -1.442695, %v3761_v3  ;;  %v3763_v19 = vadd.f32 %v1147_v15, %v5325_v5 }
 0x16b   : > { %4102 = vpow2.f32 %v3555_v10  ;;  %v3556_v4 = vmul.f32 -1.442695, %v3746_v37  ;;  %6414 = vst [vmem:[#allocation73_spill] sm:$0xff] %v5330_v54  ;;  %v3760_v12 = vadd.f32 %v1141_v18, %v5330_v54  ;;  %v3762_v53 = vadd.f32 %v1145_v11, %v5330_v54  ;;  %v890_v54 = vld [vmem:[#allocation3 + $0x8] sm:$0xff] }
 0x16c   : > { %4104 = vpow2.f32 %v3557_v6  ;;  %v3558_v16 = vmul.f32 -1.442695, %v3747_v27  ;;  %v3560_v37 = vmul.f32 -1.442695, %v3763_v19 }
 0x16d   : > { %4106 = vpow2.f32 %v3556_v4 }
 0x16e   : > { %4108 = vpow2.f32 %v3558_v16  ;;  %v889_v16 = vld [vmem:[#allocation3] sm:$0xff] }
 0x16f   : > { %4110 = vtanh.f32 %v3760_v12 }
 0x170   : > { %4112 = vpow2.f32 %v3559_v13 }
 0x171   : > { %4114 = vtanh.f32 %v3762_v53 }
 0x175   : > { %v4103_v8 = vpop.eup %4102 }
 0x176   : > { %v4105_v10 = vpop.eup %4104  ;;  %v1164_v6 = vadd.f32 1.0, %v4103_v8 }
 0x177   : > { %v1176_v27 = vadd.f32 1.0, %v4105_v10  ;;  %v4107_v46 = vpop.eup %4106 }
 0x178   : > { %4116 = vrcp.f32 %v1164_v6  ;;  %v1165_v4 = vadd.f32 1.0, %v4107_v46  ;;  %v4109_v14 = vpop.eup %4108 }
 0x179   : > { %4118 = vrcp.f32 %v1176_v27  ;;  %v1177_v3 = vadd.f32 1.0, %v4109_v14  ;;  %v4111_v15 = vpop.eup %4110 }
 0x17a   : > { %4120 = vpow2.f32 %v3560_v37  ;;  %v4113_v18 = vpop.eup %4112 }
 0x17b   : > { %4122 = vrcp.f32 %v1165_v4  ;;  %v4115_v11 = vpop.eup %4114  ;;  %v1190_v53 = vadd.f32 1.0, %v4113_v18 }
 0x17c   : > { %4124 = vrcp.f32 %v1177_v3 }
 0x17d   : > { %4126 = vrcp.f32 %v1190_v53  ;;  %v6442_v53 = vsub.s32 2, %v5304_v7 }
 0x182   : > { %v4117_v12 = vpop.eup %4116 }
 0x183   : > { %v4119_v9 = vpop.eup %4118  ;;  %v1198_v8 = vmul.f32 %v4117_v12, %v4111_v15 }
 0x184   : > { %v4121_v13 = vpop.eup %4120  ;;  %v1196_v19 = vmul.f32 %v4119_v9, %v889_v16 }
 0x185   : > { %v4123_v10 = vpop.eup %4122  ;;  %v1191_v37 = vadd.f32 1.0, %v4121_v13 }
 0x186   : > { %v5336_v6 = vadd.f32 %v1198_v8, %v1196_v19  ;;  %v1199_v27 = vmul.f32 %v4123_v10, %v4115_v11  ;;  %v4125_v46 = vpop.eup %4124 }
 0x187   : > { %v1197_v4 = vmul.f32 %v4125_v46, %v890_v54  ;;  %v4127_v3 = vpop.eup %4126  ;;  %v6441_v54 = vsub.s32 3, %v5304_v7 }
 0x188   : > { %4128 = vtanh.f32 %v5336_v6 }
 0x189   : > { %v5339_v14 = vadd.f32 %v1199_v27, %v1197_v4  ;;  %4130 = vrcp.f32 %v1191_v37 }
 0x18b   : > { %4132 = vtanh.f32 %v5339_v14 }
 0x192   : > { %v4129_v15 = vpop.eup %4128 }
 0x193   : > { %v4131_v9 = vpop.eup %4130  ;;  %v1204_v18 = vmul.f32 %v4129_v15, %v4127_v3 }
 0x195   : > { %v4133_v16 = vpop.eup %4132 }
 0x196   : > { %v1205_v12 = vmul.f32 %v4133_v16, %v4131_v9 }
 0x198   : > { %v1206_v8 = vpack.c.bf16 %v1205_v12, %v1204_v18 }
 0x19a   : > { %1647 = vmatmul.mubr.bf16.vlgmr.msra.gmra.mrb[16].mxu0 %v1206_v8  ;;  %1690 = vmatmul.mubr.bf16.vlgmr.msra.gmra.mrb[16].mxu1 %v1206_v8 }
 0x19b   : > { %1789 = vmatpush1.bf16.msra.mxu0 %v4812_v20  ;;  %1832 = vmatpush1.bf16.msra.mxu1 %v4817_v21  ;;  %v6415_v20 = vld [vmem:[#allocation17_spill] sm:$0xff]  ;;  %v6416_v21 = vld [vmem:[#allocation18_spill] sm:$0xff] }
 0x19c   : > { %1790 = vmatprep.subr.bf16.mxu0 %v4824_v22  ;;  %1833 = vmatprep.subr.bf16.mxu1 %v4829_v23  ;;  %v6417_v22 = vld [vmem:[#allocation19_spill] sm:$0xff]  ;;  %v6418_v23 = vld [vmem:[#allocation20_spill] sm:$0xff] }
 0x19d   : > { %1820 = vmatprep.mubr.bf16.mxu0 %v6386_v57  ;;  %1863 = vmatprep.mubr.bf16.mxu1 %v6386_v57 }
 0x19f   : > { %1791 = vmatpush1.bf16.msra.mxu0 %v4836_v24  ;;  %1834 = vmatpush1.bf16.msra.mxu1 %v4843_v25  ;;  %v6419_v24 = vld [vmem:[#allocation21_spill] sm:$0xff]  ;;  %v6420_v25 = vld [vmem:[#allocation22_spill] sm:$0xff] }
 0x1a0   : > { %1792 = vmatprep.subr.bf16.mxu0 %v4850_v26  ;;  %1835 = vmatprep.subr.bf16.mxu1 %v4858_v28  ;;  %v6421_v26 = vld [vmem:[#allocation23_spill] sm:$0xff]  ;;  %v6422_v28 = vld [vmem:[#allocation24_spill] sm:$0xff] }
 0x1a3   : > { %1793 = vmatpush1.bf16.msra.mxu0 %v4863_v29  ;;  %1836 = vmatpush1.bf16.msra.mxu1 %v4870_v30  ;;  %v6423_v29 = vld [vmem:[#allocation25_spill] sm:$0xff]  ;;  %v6424_v30 = vld [vmem:[#allocation26_spill] sm:$0xff] }
 0x1a4   : > { %1794 = vmatprep.subr.bf16.mxu0 %v4877_v31  ;;  %1837 = vmatprep.subr.bf16.mxu1 %v4882_v32  ;;  %v6425_v31 = vld [vmem:[#allocation27_spill] sm:$0xff]  ;;  %v6426_v32 = vld [vmem:[#allocation28_spill] sm:$0xff] }
 0x1a7   : > { %1795 = vmatpush1.bf16.msra.mxu0 %v4889_v33  ;;  %1838 = vmatpush1.bf16.msra.mxu1 %v4896_v34  ;;  %v6427_v33 = vld [vmem:[#allocation29_spill] sm:$0xff]  ;;  %v6428_v34 = vld [vmem:[#allocation30_spill] sm:$0xff] }
 0x1a8   : > { %1796 = vmatprep.subr.bf16.mxu0 %v4901_v35  ;;  %1839 = vmatprep.subr.bf16.mxu1 %v4908_v36  ;;  %v6429_v35 = vld [vmem:[#allocation31_spill] sm:$0xff]  ;;  %v6430_v36 = vld [vmem:[#allocation32_spill] sm:$0xff] }
 0x1ab   : > { %1797 = vmatpush1.bf16.msra.mxu0 %v4916_v38  ;;  %1840 = vmatpush1.bf16.msra.mxu1 %v4921_v39  ;;  %v6431_v38 = vld [vmem:[#allocation33_spill] sm:$0xff]  ;;  %v6432_v39 = vld [vmem:[#allocation34_spill] sm:$0xff] }
 0x1ac   : > { %1798 = vmatprep.subr.bf16.mxu0 %v4928_v40  ;;  %1841 = vmatprep.subr.bf16.mxu1 %v4935_v41  ;;  %v6433_v40 = vld [vmem:[#allocation35_spill] sm:$0xff]  ;;  %v6434_v41 = vld [vmem:[#allocation36_spill] sm:$0xff] }
 0x1af   : > { %1799 = vmatpush1.bf16.msra.mxu0 %v4942_v42  ;;  %1842 = vmatpush1.bf16.msra.mxu1 %v4949_v43  ;;  %v6435_v42 = vld [vmem:[#allocation37_spill] sm:$0xff]  ;;  %v6436_v43 = vld [vmem:[#allocation38_spill] sm:$0xff] }
 0x1b0   : > { %1800 = vmatprep.subr.bf16.mxu0 %v4956_v44  ;;  %1843 = vmatprep.subr.bf16.mxu1 %v4961_v45  ;;  %v6437_v44 = vld [vmem:[#allocation39_spill] sm:$0xff]  ;;  %v886_v45 = vld [vmem:[%s6215_s6] sm:$0xf] }
 0x1b1   : > { %v5424_v11 = vrot.slane %v886_v45, %v6441_v54  ;;  %v5429_v27 = vrot.slane %v886_v45, %v6442_v53 }
 0x1b3   : > { %1801 = vmatpush1.bf16.msra.mxu0 %v4969_v47  ;;  %1844 = vmatpush1.bf16.msra.mxu1 %v4976_v48  ;;  %v6438_v47 = vld [vmem:[#allocation70_spill] sm:$0xff]  ;;  %6443 = vst [vmem:[#allocation18_spill] sm:$0xff] %v5429_v27 }
 0x1b4   : > { %1802 = vmatprep.subr.bf16.mxu0 %v4983_v49  ;;  %1845 = vmatprep.subr.bf16.mxu1 %v4988_v50  ;;  %v5414_v48 = vrot.slane %v886_v45, %v6438_v47  ;;  %v6440_v49 = vld [vmem:[#allocation71_spill] sm:$0xff]  ;;  %v5682_v47 = vld [vmem:[%s6211_s2 + $0xe0] ss:$16 sps:$4 sm:$0xff]  }
 0x1b5   : > { %v5417_v50 = vrot.slane %v886_v45, %v6440_v49  ;;  %v5676_v49 = vld [vmem:[%s6211_s2 + $0xec] ss:$16 sps:$4 sm:$0xff]   ;;  %6480 = vst [vmem:[#allocation23_spill] sm:$0xff] %v5682_v47 }
 0x1b6   : > { %6439 = vst [vmem:[#allocation17_spill] sm:$0xff] %v5414_v48  ;;  %6479 = vst [vmem:[#allocation22_spill] sm:$0xff] %v5676_v49 }
 0x1b7   : > { %1803 = vmatpush1.bf16.msra.mxu0 %v4993_v51  ;;  %1846 = vmatpush1.bf16.msra.mxu1 %v4998_v52 }
 0x1b8   : > { %1932 = vmatprep.subr.bf16.mxu0 %v5004_v55  ;;  %1975 = vmatprep.subr.bf16.mxu1 %v5008_v56 }
 0x1ba   : > { %1821 = vmatmul.mubr.bf16.vlgmr.msra.gmra.mrb[4].mxu0 %v1206_v8  ;;  %1864 = vmatmul.mubr.bf16.vlgmr.msra.gmra.mrb[4].mxu1 %v1206_v8 }
 0x1bb   : > { %1933 = vmatpush1.bf16.msra.mxu0 %v5012_v58  ;;  %1976 = vmatpush1.bf16.msra.mxu1 %v5016_v59 }
 0x1bc   : > { %1934 = vmatprep.subr.bf16.mxu0 %v5020_v60  ;;  %1977 = vmatprep.subr.bf16.mxu1 %v5022_v61 }
 0x1bd   : > { %1964 = vmatprep.mubr.bf16.mxu0 %v6386_v57  ;;  %2007 = vmatprep.mubr.bf16.mxu1 %v6386_v57 }
 0x1bf   : > { %1935 = vmatpush1.bf16.msra.mxu0 %v5024_v62  ;;  %1978 = vmatpush1.bf16.msra.mxu1 %v5026_v63 }
 0x1c0   : > { %1936 = vmatprep.subr.bf16.mxu0 %v5028_v0  ;;  %1979 = vmatprep.subr.bf16.mxu1 %v5030_v1 }
 0x1c3   : > { %1937 = vmatpush1.bf16.msra.mxu0 %v5036_v2  ;;  %1980 = vmatpush1.bf16.msra.mxu1 %v6415_v20 }
 0x1c4   : > { %1938 = vmatprep.subr.bf16.mxu0 %v6416_v21  ;;  %1981 = vmatprep.subr.bf16.mxu1 %v6417_v22 }
 0x1c7   : > { %1939 = vmatpush1.bf16.msra.mxu0 %v6418_v23  ;;  %1982 = vmatpush1.bf16.msra.mxu1 %v6419_v24 }
 0x1c8   : > { %1940 = vmatprep.subr.bf16.mxu0 %v6420_v25  ;;  %1983 = vmatprep.subr.bf16.mxu1 %v6421_v26 }
 0x1cb   : > { %1941 = vmatpush1.bf16.msra.mxu0 %v6422_v28  ;;  %1984 = vmatpush1.bf16.msra.mxu1 %v6423_v29 }
 0x1cc   : > { %1942 = vmatprep.subr.bf16.mxu0 %v6424_v30  ;;  %1985 = vmatprep.subr.bf16.mxu1 %v6425_v31 }
 0x1cf   : > { %1943 = vmatpush1.bf16.msra.mxu0 %v6426_v32  ;;  %1986 = vmatpush1.bf16.msra.mxu1 %v6427_v33 }
 0x1d0   : > { %1944 = vmatprep.subr.bf16.mxu0 %v6428_v34  ;;  %1987 = vmatprep.subr.bf16.mxu1 %v6429_v35 }
 0x1d3   : > { %1945 = vmatpush1.bf16.msra.mxu0 %v6430_v36  ;;  %1988 = vmatpush1.bf16.msra.mxu1 %v6431_v38 }
 0x1d4   : > { %1946 = vmatprep.subr.bf16.mxu0 %v6432_v39  ;;  %1989 = vmatprep.subr.bf16.mxu1 %v6433_v40 }
 0x1d7   : > { %1947 = vmatpush1.bf16.msra.mxu0 %v6434_v41  ;;  %1990 = vmatpush1.bf16.msra.mxu1 %v6435_v42 }
 0x1d8   : > { %2018 = vmatprep.subr.bf16.mxu0 %v6436_v43  ;;  %2061 = vmatprep.subr.bf16.mxu1 %v6437_v44 }
 0x26d   : > { %v1648_v51 = vpop.f32.mrb[16].mxu0  ;;  %v1691_v52 = vpop.f32.mrb[16].mxu1 }
 0x26e   : > { %v1721_v55 = vadd.f32 %v5414_v48, %v1648_v51  ;;  %v1650_v56 = vpop.f32.mrb[17].mxu0  ;;  %v1693_v58 = vpop.f32.mrb[17].mxu1  ;;  %v1723_v4 = vadd.f32 %v5429_v27, %v1691_v52  ;;  %v893_v51 = vld [vmem:[#allocation5] sm:$0xff] }
 0x26f   : > { %v1722_v59 = vadd.f32 %v5417_v50, %v1650_v56  ;;  %v1652_v60 = vpop.f32.mrb[18].mxu0  ;;  %v1695_v61 = vpop.f32.mrb[18].mxu1  ;;  %v1724_v46 = vadd.f32 %v5424_v11, %v1693_v58 }
 0x270   : > { %v3625_v62 = vmul.f32 -1.442695, %v1721_v55  ;;  %v1725_v63 = vadd.f32 %v5414_v48, %v1652_v60  ;;  %v1654_v0 = vpop.f32.mrb[19].mxu0  ;;  %v1697_v1 = vpop.f32.mrb[19].mxu1  ;;  %v1727_v12 = vadd.f32 %v5429_v27, %v1695_v61 }
 0x271   : > { %v3627_v2 = vmul.f32 -1.442695, %v1722_v59  ;;  %v1726_v13 = vadd.f32 %v5417_v50, %v1654_v0  ;;  %v1728_v37 = vadd.f32 %v5424_v11, %v1697_v1  ;;  %v3629_v3 = vmul.f32 -1.442695, %v1724_v46 }
 0x272   : > { %4134 = vpow2.f32 %v3625_v62  ;;  %v3626_v19 = vmul.f32 -1.442695, %v1725_v63  ;;  %v894_v62 = vld [vmem:[#allocation5 + $0x8] sm:$0xff] }
 0x273   : > { %4136 = vpow2.f32 %v3627_v2  ;;  %v3628_v10 = vmul.f32 -1.442695, %v1726_v13  ;;  %v3630_v15 = vmul.f32 -1.442695, %v1728_v37 }
 0x274   : > { %4138 = vpow2.f32 %v3626_v19  ;;  %v6444_v19 = vld [vmem:[#allocation72_spill] sm:$0xff] }
 0x275   : > { %4140 = vpow2.f32 %v3628_v10 }
 0x276   : > { %4142 = vtanh.f32 %v1723_v4 }
 0x277   : > { %4144 = vpow2.f32 %v3629_v3 }
 0x278   : > { %4146 = vpow2.f32 %v3630_v15 }
 0x27c   : > { %v4135_v9 = vpop.eup %4134 }
 0x27d   : > { %v4137_v16 = vpop.eup %4136  ;;  %v1735_v18 = vadd.f32 1.0, %v4135_v9 }
 0x27e   : > { %v1747_v7 = vadd.f32 1.0, %v4137_v16  ;;  %v4139_v8 = vpop.eup %4138 }
 0x27f   : > { %4148 = vrcp.f32 %v1735_v18  ;;  %v1736_v20 = vadd.f32 1.0, %v4139_v8  ;;  %v4141_v21 = vpop.eup %4140 }
 0x280   : > { %4150 = vrcp.f32 %v1747_v7  ;;  %v1748_v22 = vadd.f32 1.0, %v4141_v21  ;;  %v4143_v23 = vpop.eup %4142 }
 0x281   : > { %4152 = vtanh.f32 %v1727_v12  ;;  %v4145_v24 = vpop.eup %4144 }
 0x282   : > { %4154 = vrcp.f32 %v1736_v20  ;;  %v4147_v45 = vpop.eup %4146  ;;  %v1761_v60 = vadd.f32 1.0, %v4145_v24 }
 0x283   : > { %4156 = vrcp.f32 %v1748_v22  ;;  %v1762_v63 = vadd.f32 1.0, %v4147_v45  ;;  %v6445_v45 = vld [vmem:[#allocation73_spill] sm:$0xff] }
 0x284   : > { %4158 = vrcp.f32 %v1761_v60 }
 0x285   : > { %4160 = vrcp.f32 %v1762_v63 }
 0x289   : > { %v4149_v52 = vpop.eup %4148 }
 0x28a   : > { %v4151_v55 = vpop.eup %4150  ;;  %v1769_v56 = vmul.f32 %v4149_v52, %v4143_v23 }
 0x28b   : > { %v4153_v58 = vpop.eup %4152  ;;  %v1767_v59 = vmul.f32 %v4151_v55, %v893_v51 }
 0x28c   : > { %v4155_v61 = vpop.eup %4154 }
 0x28d   : > { %v5435_v0 = vadd.f32 %v1769_v56, %v1767_v59  ;;  %v1770_v1 = vmul.f32 %v4155_v61, %v4153_v58  ;;  %v1822_v2 = vpop.f32.mrb[4].mxu0  ;;  %v1865_v54 = vpop.f32.mrb[4].mxu1 }
 0x28e   : > { %v4157_v13 = vpop.eup %4156  ;;  %v3748_v10 = vadd.f32 %v1822_v2, %v6444_v19  ;;  %v1824_v53 = vpop.f32.mrb[5].mxu0  ;;  %v3764_v51 = vadd.f32 %v1865_v54, %v6445_v45 }
 0x28f   : > { %v1867_v46 = vpop.f32.mrb[5].mxu1  ;;  %v1768_v37 = vmul.f32 %v4157_v13, %v894_v62  ;;  %v3749_v4 = vadd.f32 %v1824_v53, %v5316_v17  ;;  %v1826_v3 = vpop.f32.mrb[6].mxu0  ;;  %4162 = vtanh.f32 %v5435_v0 }
 0x290   : > { %v1869_v15 = vpop.f32.mrb[6].mxu1  ;;  %v3631_v9 = vmul.f32 -1.442695, %v3748_v10  ;;  %v3750_v16 = vadd.f32 %v1826_v3, %v6444_v19  ;;  %v1828_v18 = vpop.f32.mrb[7].mxu0  ;;  %v3765_v23 = vadd.f32 %v1867_v46, %v5325_v5  ;;  %v6447_v3 = vld [vmem:[#allocation40_spill] sm:$0xff] }
 0x291   : > { %v1871_v12 = vpop.f32.mrb[7].mxu1  ;;  %v5441_v7 = vadd.f32 %v1770_v1, %v1768_v37  ;;  %v3633_v8 = vmul.f32 -1.442695, %v3749_v4  ;;  %v3751_v20 = vadd.f32 %v1828_v18, %v5316_v17  ;;  %v4159_v24 = vpop.eup %4158  ;;  %v3766_v60 = vadd.f32 %v1869_v15, %v6445_v45  ;;  %v6448_v15 = vld [vmem:[#allocation41_spill] sm:$0xff] }
 0x292   : > { %4164 = vpow2.f32 %v3631_v9  ;;  %v3632_v21 = vmul.f32 -1.442695, %v3750_v16  ;;  %v4161_v52 = vpop.eup %4160  ;;  %v3635_v55 = vmul.f32 -1.442695, %v3765_v23  ;;  %v3767_v56 = vadd.f32 %v1871_v12, %v5325_v5  ;;  %v6449_v9 = vld [vmem:[#allocation42_spill] sm:$0xff]  ;;  %v6450_v16 = vld [vmem:[#allocation43_spill] sm:$0xff] }
 0x293   : > { %4166 = vtanh.f32 %v5441_v7  ;;  %v3634_v22 = vmul.f32 -1.442695, %v3751_v20  ;;  %v6451_v12 = vld [vmem:[#allocation44_spill] sm:$0xff] }
 0x294   : > { %4168 = vpow2.f32 %v3633_v8  ;;  %v3636_v1 = vmul.f32 -1.442695, %v3767_v56  ;;  %v6452_v8 = vld [vmem:[#allocation45_spill] sm:$0xff] }
 0x295   : > { %4170 = vpow2.f32 %v3632_v21  ;;  %v6453_v21 = vld [vmem:[#allocation46_spill] sm:$0xff]  ;;  %v6456_v56 = vld [vmem:[#allocation49_spill] sm:$0xff] }
 0x296   : > { %4172 = vpow2.f32 %v3634_v22  ;;  %v6454_v22 = vld [vmem:[#allocation47_spill] sm:$0xff] }
 0x297   : > { %4174 = vtanh.f32 %v3764_v51 }
 0x298   : > { %4176 = vpow2.f32 %v3635_v55  ;;  %v6455_v55 = vld [vmem:[#allocation48_spill] sm:$0xff] }
 0x299   : > { %v4163_v58 = vpop.eup %4162 }
 0x29a   : > { %v1775_v2 = vmul.f32 %v4163_v58, %v4159_v24 }
 0x29c   : > { %v4165_v59 = vpop.eup %4164 }
 0x29d   : > { %v4167_v61 = vpop.eup %4166  ;;  %v1888_v62 = vadd.f32 1.0, %v4165_v59 }
 0x29e   : > { %v4169_v63 = vpop.eup %4168  ;;  %v1776_v13 = vmul.f32 %v4167_v61, %v4161_v52  ;;  %v6458_v61 = vld [vmem:[#allocation51_spill] sm:$0xff] }
 0x29f   : > { %4178 = vrcp.f32 %v1888_v62  ;;  %v1900_v10 = vadd.f32 1.0, %v4169_v63  ;;  %v4171_v53 = vpop.eup %4170 }
 0x2a0   : > { %4180 = vtanh.f32 %v3766_v60  ;;  %v5449_v54 = vpack.c.bf16 %v1776_v13, %v1775_v2  ;;  %v1889_v46 = vadd.f32 1.0, %v4171_v53  ;;  %v4173_v37 = vpop.eup %4172  ;;  %v6457_v60 = vld [vmem:[#allocation50_spill] sm:$0xff]  ;;  %v6459_v53 = vld [vmem:[#allocation52_spill] sm:$0xff] }
 0x2a1   : > { %4182 = vrcp.f32 %v1900_v10  ;;  %v1901_v4 = vadd.f32 1.0, %v4173_v37  ;;  %v4175_v18 = vpop.eup %4174 }
 0x2a2   : > { %6446 = vst [vmem:[#allocation19_spill] sm:$0xff] %v5449_v54  ;;  %4184 = vpow2.f32 %v3636_v1  ;;  %1965 = vmatmul.mubr.bf16.vlgmr.msra.gmra.mrb[20].mxu0 %v5449_v54  ;;  %2008 = vmatmul.mubr.bf16.vlgmr.msra.gmra.mrb[20].mxu1 %v5449_v54  ;;  %v4177_v20 = vpop.eup %4176  ;;  %v5688_v54 = vld [vmem:[%s6211_s2 + $0xe8] ss:$16 sps:$4 sm:$0xff]  }
 0x2a3   : > { %4186 = vrcp.f32 %v1889_v46  ;;  %2019 = vmatpush1.bf16.msra.mxu0 %v6447_v3  ;;  %2062 = vmatpush1.bf16.msra.mxu1 %v6448_v15  ;;  %v1914_v63 = vadd.f32 1.0, %v4177_v20  ;;  %v6460_v46 = vld [vmem:[#allocation53_spill] sm:$0xff]  ;;  %v6463_v15 = vld [vmem:[#allocation56_spill] sm:$0xff]  ;;  %v6470_v20 = vld [vmem:[#allocation63_spill] sm:$0xff]  ;;  %6481 = vst [vmem:[#allocation24_spill] sm:$0xff] %v5688_v54 }
 0x2a4   : > { %2020 = vmatprep.subr.bf16.mxu0 %v6449_v9  ;;  %2063 = vmatprep.subr.bf16.mxu1 %v6450_v16  ;;  %4188 = vrcp.f32 %v1901_v4  ;;  %v6461_v4 = vld [vmem:[#allocation54_spill] sm:$0xff]  ;;  %v6464_v9 = vld [vmem:[#allocation57_spill] sm:$0xff] }
 0x2a5   : > { %2050 = vmatprep.mubr.bf16.mxu0 %v6386_v57  ;;  %2093 = vmatprep.mubr.bf16.mxu1 %v6386_v57  ;;  %4190 = vrcp.f32 %v1914_v63  ;;  %v6465_v16 = vld [vmem:[#allocation58_spill] sm:$0xff] }
 0x2a6   : > { %v5502_v63 = vld [vmem:[%s6211_s2 + $0xc] ss:$16 sps:$4 sm:$0xff]  }
 0x2a7   : > { %2021 = vmatpush1.bf16.msra.mxu0 %v6451_v12  ;;  %2064 = vmatpush1.bf16.msra.mxu1 %v6452_v8  ;;  %v6468_v12 = vld [vmem:[#allocation61_spill] sm:$0xff]  ;;  %v6469_v8 = vld [vmem:[#allocation62_spill] sm:$0xff] }
 0x2a8   : > { %2022 = vmatprep.subr.bf16.mxu0 %v6453_v21  ;;  %2065 = vmatprep.subr.bf16.mxu1 %v6454_v22  ;;  %v6471_v22 = vld [vmem:[#allocation64_spill] sm:$0xff] }
 0x2a9   : > { %v4179_v23 = vpop.eup %4178 }
 0x2aa   : > { %v4181_v24 = vpop.eup %4180  ;;  %v1922_v51 = vmul.f32 %v4179_v23, %v4175_v18  ;;  %v6466_v18 = vld [vmem:[#allocation59_spill] sm:$0xff]  ;;  %v6472_v23 = vld [vmem:[#allocation65_spill] sm:$0xff] }
 0x2ab   : > { %v4183_v52 = vpop.eup %4182  ;;  %2023 = vmatpush1.bf16.msra.mxu0 %v6455_v55  ;;  %2066 = vmatpush1.bf16.msra.mxu1 %v6456_v56 }
 0x2ac   : > { %v4185_v58 = vpop.eup %4184  ;;  %v1920_v59 = vmul.f32 %v4183_v52, %v5336_v6  ;;  %2024 = vmatprep.subr.bf16.mxu0 %v6457_v60  ;;  %2067 = vmatprep.subr.bf16.mxu1 %v6458_v61  ;;  %v6462_v6 = vld [vmem:[#allocation55_spill] sm:$0xff] }
 0x2ad   : > { %v4187_v62 = vpop.eup %4186  ;;  %v1915_v10 = vadd.f32 1.0, %v4185_v58  ;;  %v6474_v52 = vld [vmem:[#allocation67_spill] sm:$0xff]  ;;  %v6475_v58 = vld [vmem:[#allocation68_spill] sm:$0xff] }
 0x2ae   : > { %v5468_v1 = vadd.f32 %v1922_v51, %v1920_v59  ;;  %v1923_v2 = vmul.f32 %v4187_v62, %v4181_v24  ;;  %v4189_v13 = vpop.eup %4188  ;;  %v6473_v51 = vld [vmem:[#allocation66_spill] sm:$0xff]  ;;  %v6476_v59 = vld [vmem:[#allocation69_spill] sm:$0xff] }
 0x2af   : > { %2025 = vmatpush1.bf16.msra.mxu0 %v6459_v53  ;;  %2068 = vmatpush1.bf16.msra.mxu1 %v6460_v46  ;;  %v1921_v37 = vmul.f32 %v4189_v13, %v5339_v14  ;;  %v6467_v14 = vld [vmem:[#allocation60_spill] sm:$0xff]  ;;  %v4191_v21 = vpop.eup %4190  ;;  %v5496_v62 = vld [vmem:[%s6211_s2 + $0x4] ss:$16 sps:$4 sm:$0xff]  }
 0x2b0   : > { %2026 = vmatprep.subr.bf16.mxu0 %v6461_v4  ;;  %2069 = vmatprep.subr.bf16.mxu1 %v6462_v6  ;;  %4192 = vtanh.f32 %v5468_v1  ;;  %v5512_v13 = vld [vmem:[%s6211_s2] ss:$16 sps:$4 sm:$0xff]   ;;  %v5524_v53 = vld [vmem:[%s6211_s2 + $0x24] ss:$16 sps:$4 sm:$0xff]   ;;  %v5530_v46 = vld [vmem:[%s6211_s2 + $0x2c] ss:$16 sps:$4 sm:$0xff]  }
 0x2b1   : > { %v5476_v3 = vadd.f32 %v1923_v2, %v1921_v37  ;;  %4194 = vrcp.f32 %v1915_v10  ;;  %v5518_v10 = vld [vmem:[%s6211_s2 + $0x8] ss:$16 sps:$4 sm:$0xff]   ;;  %v5538_v37 = vld [vmem:[%s6211_s2 + $0x20] ss:$16 sps:$4 sm:$0xff]   ;;  %v5550_v6 = vld [vmem:[%s6211_s2 + $0x44] ss:$16 sps:$4 sm:$0xff]  }
 0x2b2   : > { %v5544_v4 = vld [vmem:[%s6211_s2 + $0x28] ss:$16 sps:$4 sm:$0xff]  }
 0x2b3   : > { %2027 = vmatpush1.bf16.msra.mxu0 %v6463_v15  ;;  %2070 = vmatpush1.bf16.msra.mxu1 %v6464_v9  ;;  %4196 = vtanh.f32 %v5476_v3  ;;  %v5556_v15 = vld [vmem:[%s6211_s2 + $0x4c] ss:$16 sps:$4 sm:$0xff]   ;;  %v5562_v9 = vld [vmem:[%s6211_s2 + $0x40] ss:$16 sps:$4 sm:$0xff]  }
 0x2b4   : > { %2028 = vmatprep.subr.bf16.mxu0 %v6465_v16  ;;  %2071 = vmatprep.subr.bf16.mxu1 %v6466_v18  ;;  %v5568_v16 = vld [vmem:[%s6211_s2 + $0x48] ss:$16 sps:$4 sm:$0xff]   ;;  %v5574_v18 = vld [vmem:[%s6211_s2 + $0x64] ss:$16 sps:$4 sm:$0xff]  }
 0x2b7   : > { %2029 = vmatpush1.bf16.msra.mxu0 %v6467_v14  ;;  %2072 = vmatpush1.bf16.msra.mxu1 %v6468_v12  ;;  %v5580_v14 = vld [vmem:[%s6211_s2 + $0x6c] ss:$16 sps:$4 sm:$0xff]   ;;  %v5586_v12 = vld [vmem:[%s6211_s2 + $0x60] ss:$16 sps:$4 sm:$0xff]  }
 0x2b8   : > { %2030 = vmatprep.subr.bf16.mxu0 %v6469_v8  ;;  %2073 = vmatprep.subr.bf16.mxu1 %v6470_v20  ;;  %v5592_v8 = vld [vmem:[%s6211_s2 + $0x68] ss:$16 sps:$4 sm:$0xff]   ;;  %v5598_v20 = vld [vmem:[%s6211_s2 + $0x84] ss:$16 sps:$4 sm:$0xff]  }
 0x2ba   : > { %v4193_v24 = vpop.eup %4192 }
 0x2bb   : > { %2031 = vmatpush1.bf16.msra.mxu0 %v6471_v22  ;;  %2074 = vmatpush1.bf16.msra.mxu1 %v6472_v23  ;;  %v4195_v55 = vpop.eup %4194  ;;  %v1928_v60 = vmul.f32 %v4193_v24, %v4191_v21  ;;  %v5604_v21 = vld [vmem:[%s6211_s2 + $0x8c] ss:$16 sps:$4 sm:$0xff]   ;;  %v5610_v22 = vld [vmem:[%s6211_s2 + $0x80] ss:$16 sps:$4 sm:$0xff]   ;;  %v5616_v23 = vld [vmem:[%s6211_s2 + $0x88] ss:$16 sps:$4 sm:$0xff]  }
 0x2bc   : > { %2032 = vmatprep.subr.bf16.mxu0 %v6473_v51  ;;  %2075 = vmatprep.subr.bf16.mxu1 %v6474_v52  ;;  %v5622_v24 = vld [vmem:[%s6211_s2 + $0xa4] ss:$16 sps:$4 sm:$0xff]   ;;  %v5628_v51 = vld [vmem:[%s6211_s2 + $0xac] ss:$16 sps:$4 sm:$0xff]   ;;  %v5634_v52 = vld [vmem:[%s6211_s2 + $0xa0] ss:$16 sps:$4 sm:$0xff]  }
 0x2bd   : > { %v4197_v56 = vpop.eup %4196 }
 0x2be   : > { %v1929_v61 = vmul.f32 %v4197_v56, %v4195_v55  ;;  %v5640_v55 = vld [vmem:[%s6211_s2 + $0xa8] ss:$16 sps:$4 sm:$0xff]   ;;  %v5646_v56 = vld [vmem:[%s6211_s2 + $0xc4] ss:$16 sps:$4 sm:$0xff]  }
 0x2bf   : > { %2033 = vmatpush1.bf16.msra.mxu0 %v6475_v58  ;;  %2076 = vmatpush1.bf16.msra.mxu1 %v6476_v59  ;;  %v5652_v58 = vld [vmem:[%s6211_s2 + $0xcc] ss:$16 sps:$4 sm:$0xff]   ;;  %v5658_v59 = vld [vmem:[%s6211_s2 + $0xc0] ss:$16 sps:$4 sm:$0xff]  }
 0x2c0   : > { %2172 = vmatprep.subr.bf16.mxu0 %v5496_v62  ;;  %2215 = vmatprep.subr.bf16.mxu1 %v5502_v63  ;;  %v5505_v2 = vpack.c.bf16 %v1929_v61, %v1928_v60  ;;  %v5664_v60 = vld [vmem:[%s6211_s2 + $0xc8] ss:$16 sps:$4 sm:$0xff]   ;;  %v5670_v61 = vld [vmem:[%s6211_s2 + $0xe4] ss:$16 sps:$4 sm:$0xff]  }
 0x2c1   : > { %6477 = vst [vmem:[#allocation20_spill] sm:$0xff] %v5664_v60  ;;  %6478 = vst [vmem:[#allocation21_spill] sm:$0xff] %v5670_v61 }
 0x2c2   : > { %2051 = vmatmul.mubr.bf16.vlgmr.msra.gmra.mrb[20].mxu0 %v5505_v2  ;;  %2094 = vmatmul.mubr.bf16.vlgmr.msra.gmra.mrb[20].mxu1 %v5505_v2 }
 0x2c3   : > { %2173 = vmatpush1.bf16.msra.mxu0 %v5512_v13  ;;  %2216 = vmatpush1.bf16.msra.mxu1 %v5518_v10 }
 0x2c4   : > { %2174 = vmatprep.subr.bf16.mxu0 %v5524_v53  ;;  %2217 = vmatprep.subr.bf16.mxu1 %v5530_v46 }
 0x2c5   : > { %2204 = vmatprep.mubr.bf16.mxu0 %v6386_v57  ;;  %2247 = vmatprep.mubr.bf16.mxu1 %v6386_v57 }
 0x2c7   : > { %2175 = vmatpush1.bf16.msra.mxu0 %v5538_v37  ;;  %2218 = vmatpush1.bf16.msra.mxu1 %v5544_v4 }
 0x2c8   : > { %2176 = vmatprep.subr.bf16.mxu0 %v5550_v6  ;;  %2219 = vmatprep.subr.bf16.mxu1 %v5556_v15 }
 0x2cb   : > { %2177 = vmatpush1.bf16.msra.mxu0 %v5562_v9  ;;  %2220 = vmatpush1.bf16.msra.mxu1 %v5568_v16 }
 0x2cc   : > { %2178 = vmatprep.subr.bf16.mxu0 %v5574_v18  ;;  %2221 = vmatprep.subr.bf16.mxu1 %v5580_v14 }
 0x2cf   : > { %2179 = vmatpush1.bf16.msra.mxu0 %v5586_v12  ;;  %2222 = vmatpush1.bf16.msra.mxu1 %v5592_v8 }
 0x2d0   : > { %2180 = vmatprep.subr.bf16.mxu0 %v5598_v20  ;;  %2223 = vmatprep.subr.bf16.mxu1 %v5604_v21 }
 0x2d3   : > { %2181 = vmatpush1.bf16.msra.mxu0 %v5610_v22  ;;  %2224 = vmatpush1.bf16.msra.mxu1 %v5616_v23 }
 0x2d4   : > { %2182 = vmatprep.subr.bf16.mxu0 %v5622_v24  ;;  %2225 = vmatprep.subr.bf16.mxu1 %v5628_v51 }
 0x2d7   : > { %2183 = vmatpush1.bf16.msra.mxu0 %v5634_v52  ;;  %2226 = vmatpush1.bf16.msra.mxu1 %v5640_v55 }
 0x2d8   : > { %2184 = vmatprep.subr.bf16.mxu0 %v5646_v56  ;;  %2227 = vmatprep.subr.bf16.mxu1 %v5652_v58 }
 0x2db   : > { %2185 = vmatpush1.bf16.msra.mxu0 %v5658_v59  ;;  %2228 = vmatpush1.bf16.msra.mxu1 %v5664_v60  ;;  %v5694_v60 = vld [vmem:[#allocation10 + $0xc] ss:$16 sps:$4 sm:$0xff]  }
 0x2dc   : > { %2186 = vmatprep.subr.bf16.mxu0 %v5670_v61  ;;  %2229 = vmatprep.subr.bf16.mxu1 %v5676_v49  ;;  %v5691_v61 = vld [vmem:[#allocation10 + $0x4] ss:$16 sps:$4 sm:$0xff]   ;;  %6483 = vst [vmem:[#allocation26_spill] sm:$0xff] %v5694_v60  ;;  %v5702_v49 = vld [vmem:[#allocation10 + $0x8] ss:$16 sps:$4 sm:$0xff]  }
 0x2dd   : > { %6482 = vst [vmem:[#allocation25_spill] sm:$0xff] %v5691_v61  ;;  %6485 = vst [vmem:[#allocation28_spill] sm:$0xff] %v5702_v49 }
 0x2df   : > { %2187 = vmatpush1.bf16.msra.mxu0 %v5682_v47  ;;  %2230 = vmatpush1.bf16.msra.mxu1 %v5688_v54  ;;  %v5699_v47 = vld [vmem:[#allocation10] ss:$16 sps:$4 sm:$0xff]   ;;  %v5705_v54 = vld [vmem:[#allocation10 + $0x24] ss:$16 sps:$4 sm:$0xff]  }
 0x2e0   : > { %2316 = vmatprep.subr.bf16.mxu0 %v5691_v61  ;;  %2359 = vmatprep.subr.bf16.mxu1 %v5694_v60  ;;  %6484 = vst [vmem:[#allocation27_spill] sm:$0xff] %v5699_v47  ;;  %6486 = vst [vmem:[#allocation29_spill] sm:$0xff] %v5705_v54  ;;  %v5708_v61 = vld [vmem:[#allocation10 + $0x2c] ss:$16 sps:$4 sm:$0xff]   ;;  %v5728_v60 = vld [vmem:[#allocation10 + $0x48] ss:$16 sps:$4 sm:$0xff]  }
 0x2e1   : > { %6487 = vst [vmem:[#allocation30_spill] sm:$0xff] %v5708_v61 }
 0x2e2   : > { %2205 = vmatmul.mubr.bf16.vlgmr.msra.gmra.mrb[8].mxu0 %v5505_v2  ;;  %2248 = vmatmul.mubr.bf16.vlgmr.msra.gmra.mrb[8].mxu1 %v5505_v2  ;;  %v5713_v2 = vld [vmem:[#allocation10 + $0x20] ss:$16 sps:$4 sm:$0xff]  }
 0x2e3   : > { %2317 = vmatpush1.bf16.msra.mxu0 %v5699_v47  ;;  %2360 = vmatpush1.bf16.msra.mxu1 %v5702_v49  ;;  %6488 = vst [vmem:[#allocation31_spill] sm:$0xff] %v5713_v2  ;;  %v5716_v47 = vld [vmem:[#allocation10 + $0x28] ss:$16 sps:$4 sm:$0xff]   ;;  %v5719_v49 = vld [vmem:[#allocation10 + $0x44] ss:$16 sps:$4 sm:$0xff]  }
 0x2e4   : > { %2318 = vmatprep.subr.bf16.mxu0 %v5705_v54  ;;  %2361 = vmatprep.subr.bf16.mxu1 %v5708_v61  ;;  %6489 = vst [vmem:[#allocation32_spill] sm:$0xff] %v5716_v47  ;;  %6490 = vst [vmem:[#allocation33_spill] sm:$0xff] %v5719_v49  ;;  %v5722_v54 = vld [vmem:[#allocation10 + $0x4c] ss:$16 sps:$4 sm:$0xff]   ;;  %v5725_v61 = vld [vmem:[#allocation10 + $0x40] ss:$16 sps:$4 sm:$0xff]  }
 0x2e5   : > { %2348 = vmatprep.mubr.bf16.mxu0 %v6386_v57  ;;  %2391 = vmatprep.mubr.bf16.mxu1 %v6386_v57  ;;  %6491 = vst [vmem:[#allocation34_spill] sm:$0xff] %v5722_v54 }
 0x2e7   : > { %2319 = vmatpush1.bf16.msra.mxu0 %v5713_v2  ;;  %2362 = vmatpush1.bf16.msra.mxu1 %v5716_v47  ;;  %v5731_v2 = vld [vmem:[#allocation10 + $0x64] ss:$16 sps:$4 sm:$0xff]   ;;  %v5734_v47 = vld [vmem:[#allocation10 + $0x6c] ss:$16 sps:$4 sm:$0xff]  }
 0x2e8   : > { %2320 = vmatprep.subr.bf16.mxu0 %v5719_v49  ;;  %2363 = vmatprep.subr.bf16.mxu1 %v5722_v54  ;;  %v5737_v49 = vld [vmem:[#allocation10 + $0x60] ss:$16 sps:$4 sm:$0xff]   ;;  %v5740_v54 = vld [vmem:[#allocation10 + $0x68] ss:$16 sps:$4 sm:$0xff]  }
 0x2eb   : > { %2321 = vmatpush1.bf16.msra.mxu0 %v5725_v61  ;;  %2364 = vmatpush1.bf16.msra.mxu1 %v5728_v60 }
 0x2ec   : > { %2322 = vmatprep.subr.bf16.mxu0 %v5731_v2  ;;  %2365 = vmatprep.subr.bf16.mxu1 %v5734_v47 }
 0x2ef   : > { %2323 = vmatpush1.bf16.msra.mxu0 %v5737_v49  ;;  %2366 = vmatpush1.bf16.msra.mxu1 %v5740_v54 }
 0x2f0   : > { %2324 = vmatprep.subr.bf16.mxu0 %v6420_v25  ;;  %2367 = vmatprep.subr.bf16.mxu1 %v6421_v26 }
 0x2f3   : > { %2325 = vmatpush1.bf16.msra.mxu0 %v6422_v28  ;;  %2368 = vmatpush1.bf16.msra.mxu1 %v6423_v29 }
 0x2f4   : > { %2326 = vmatprep.subr.bf16.mxu0 %v6424_v30  ;;  %2369 = vmatprep.subr.bf16.mxu1 %v6425_v31 }
 0x2f7   : > { %2327 = vmatpush1.bf16.msra.mxu0 %v6426_v32  ;;  %2370 = vmatpush1.bf16.msra.mxu1 %v6427_v33 }
 0x2f8   : > { %2328 = vmatprep.subr.bf16.mxu0 %v6428_v34  ;;  %2371 = vmatprep.subr.bf16.mxu1 %v6429_v35 }
 0x2fb   : > { %2329 = vmatpush1.bf16.msra.mxu0 %v6430_v36  ;;  %2372 = vmatpush1.bf16.msra.mxu1 %v6431_v38 }
 0x2fc   : > { %2330 = vmatprep.subr.bf16.mxu0 %v6432_v39  ;;  %2373 = vmatprep.subr.bf16.mxu1 %v6433_v40 }
 0x2ff   : > { %2331 = vmatpush1.bf16.msra.mxu0 %v6434_v41  ;;  %2374 = vmatpush1.bf16.msra.mxu1 %v6435_v42 }
 0x300   : > { %2402 = vmatprep.subr.bf16.mxu0 %v6436_v43  ;;  %2445 = vmatprep.subr.bf16.mxu1 %v6437_v44 }
 0x395   : > { %v2052_v25 = vpop.f32.mrb[20].mxu0  ;;  %v2095_v26 = vpop.f32.mrb[20].mxu1 }
 0x396   : > { %v2104_v28 = vadd.f32 %v2052_v25, %v5414_v48  ;;  %v2054_v29 = vpop.f32.mrb[21].mxu0  ;;  %v2097_v30 = vpop.f32.mrb[21].mxu1  ;;  %v2106_v25 = vadd.f32 %v2095_v26, %v5429_v27 }
 0x397   : > { %v2105_v31 = vadd.f32 %v2054_v29, %v5417_v50  ;;  %v2056_v32 = vpop.f32.mrb[22].mxu0  ;;  %v2099_v33 = vpop.f32.mrb[22].mxu1  ;;  %v2107_v43 = vadd.f32 %v2097_v30, %v5424_v11 }
 0x398   : > { %v3637_v34 = vmul.f32 -1.442695, %v2104_v28  ;;  %v2108_v35 = vadd.f32 %v2056_v32, %v5414_v48  ;;  %v2058_v36 = vpop.f32.mrb[23].mxu0  ;;  %v2101_v38 = vpop.f32.mrb[23].mxu1 }
 0x399   : > { %v3639_v39 = vmul.f32 -1.442695, %v2105_v31  ;;  %v2109_v40 = vadd.f32 %v2058_v36, %v5417_v50  ;;  %v2111_v44 = vadd.f32 %v2101_v38, %v5424_v11  ;;  %v3641_v28 = vmul.f32 -1.442695, %v2107_v43 }
 0x39a   : > { %4198 = vpow2.f32 %v3637_v34  ;;  %v3638_v41 = vmul.f32 -1.442695, %v2108_v35  ;;  %v2110_v34 = vadd.f32 %v2099_v33, %v5429_v27 }
 0x39b   : > { %4200 = vpow2.f32 %v3639_v39  ;;  %v3640_v42 = vmul.f32 -1.442695, %v2109_v40  ;;  %v3642_v29 = vmul.f32 -1.442695, %v2111_v44 }
 0x39c   : > { %4202 = vpow2.f32 %v3638_v41 }
 0x39d   : > { %4204 = vpow2.f32 %v3640_v42 }
 0x39e   : > { %4206 = vtanh.f32 %v2106_v25 }
 0x39f   : > { %4208 = vpow2.f32 %v3641_v28 }
 0x3a0   : > { %4210 = vpow2.f32 %v3642_v29 }
 0x3a4   : > { %v4199_v32 = vpop.eup %4198 }
 0x3a5   : > { %v4201_v48 = vpop.eup %4200  ;;  %v2118_v31 = vadd.f32 1.0, %v4199_v32 }
 0x3a6   : > { %v2130_v35 = vadd.f32 1.0, %v4201_v48  ;;  %v4203_v36 = vpop.eup %4202 }
 0x3a7   : > { %4212 = vrcp.f32 %v2118_v31  ;;  %v2119_v30 = vadd.f32 1.0, %v4203_v36  ;;  %v4205_v39 = vpop.eup %4204 }
 0x3a8   : > { %4214 = vrcp.f32 %v2130_v35  ;;  %v2131_v38 = vadd.f32 1.0, %v4205_v39  ;;  %v4207_v26 = vpop.eup %4206 }
 0x3a9   : > { %4216 = vtanh.f32 %v2110_v34  ;;  %v4209_v40 = vpop.eup %4208 }
 0x3aa   : > { %4218 = vrcp.f32 %v2119_v30  ;;  %v4211_v41 = vpop.eup %4210  ;;  %v2144_v48 = vadd.f32 1.0, %v4209_v40 }
 0x3ab   : > { %4220 = vrcp.f32 %v2131_v38  ;;  %v2145_v29 = vadd.f32 1.0, %v4211_v41 }
 0x3ac   : > { %4222 = vrcp.f32 %v2144_v48 }
 0x3ad   : > { %4224 = vrcp.f32 %v2145_v29 }
 0x3b1   : > { %v4213_v42 = vpop.eup %4212 }
 0x3b2   : > { %v4215_v43 = vpop.eup %4214  ;;  %v2152_v44 = vmul.f32 %v4213_v42, %v4207_v26 }
 0x3b3   : > { %v4217_v25 = vpop.eup %4216  ;;  %v2150_v33 = vmul.f32 %v4215_v43, %v5435_v0 }
 0x3b4   : > { %v4219_v28 = vpop.eup %4218 }
 0x3b5   : > { %v5770_v32 = vadd.f32 %v2152_v44, %v2150_v33  ;;  %v2153_v31 = vmul.f32 %v4219_v28, %v4217_v25  ;;  %v2206_v35 = vpop.f32.mrb[8].mxu0  ;;  %v2249_v34 = vpop.f32.mrb[8].mxu1 }
 0x3b6   : > { %v4221_v36 = vpop.eup %4220  ;;  %v3752_v30 = vadd.f32 %v2206_v35, %v6444_v19  ;;  %v2208_v39 = vpop.f32.mrb[9].mxu0 }
 0x3b7   : > { %v2251_v38 = vpop.f32.mrb[9].mxu1  ;;  %v2151_v27 = vmul.f32 %v4221_v36, %v5441_v7  ;;  %v3753_v26 = vadd.f32 %v2208_v39, %v5316_v17  ;;  %v2210_v42 = vpop.f32.mrb[10].mxu0  ;;  %4226 = vtanh.f32 %v5770_v32  ;;  %v3768_v36 = vadd.f32 %v2249_v34, %v6445_v45 }
 0x3b8   : > { %v2253_v0 = vpop.f32.mrb[10].mxu1  ;;  %v3643_v40 = vmul.f32 -1.442695, %v3752_v30  ;;  %v3754_v41 = vadd.f32 %v2210_v42, %v6444_v19  ;;  %v2212_v43 = vpop.f32.mrb[11].mxu0  ;;  %v3769_v29 = vadd.f32 %v2251_v38, %v5325_v5 }
 0x3b9   : > { %v2255_v44 = vpop.f32.mrb[11].mxu1  ;;  %v5777_v25 = vadd.f32 %v2153_v31, %v2151_v27  ;;  %v3645_v33 = vmul.f32 -1.442695, %v3753_v26  ;;  %v3755_v28 = vadd.f32 %v2212_v43, %v5316_v17  ;;  %v4223_v35 = vpop.eup %4222  ;;  %v3770_v42 = vadd.f32 %v2253_v0, %v6445_v45 }
 0x3ba   : > { %4228 = vpow2.f32 %v3643_v40  ;;  %v3644_v48 = vmul.f32 -1.442695, %v3754_v41  ;;  %v4225_v30 = vpop.eup %4224  ;;  %v3647_v39 = vmul.f32 -1.442695, %v3769_v29  ;;  %v3771_v27 = vadd.f32 %v2255_v44, %v5325_v5 }
 0x3bb   : > { %4230 = vtanh.f32 %v5777_v25  ;;  %v3646_v7 = vmul.f32 -1.442695, %v3755_v28 }
 0x3bc   : > { %4232 = vpow2.f32 %v3645_v33  ;;  %v3648_v33 = vmul.f32 -1.442695, %v3771_v27 }
 0x3bd   : > { %4234 = vpow2.f32 %v3644_v48 }
 0x3be   : > { %4236 = vpow2.f32 %v3646_v7 }
 0x3bf   : > { %4238 = vtanh.f32 %v3768_v36  ;;  %v5798_v36 = vld [vmem:[%s6213_s4 + $0x8] ss:$16 sps:$4 sm:$0xff]  }
 0x3c0   : > { %4240 = vpow2.f32 %v3647_v39  ;;  %v5810_v39 = vld [vmem:[%s6213_s4 + $0x2c] ss:$16 sps:$4 sm:$0xff]  }
 0x3c1   : > { %v4227_v31 = vpop.eup %4226 }
 0x3c2   : > { %v2158_v38 = vmul.f32 %v4227_v31, %v4223_v35  ;;  %v5792_v35 = vld [vmem:[%s6213_s4] ss:$16 sps:$4 sm:$0xff]  }
 0x3c3   : > { %v5818_v31 = vld [vmem:[%s6213_s4 + $0x20] ss:$16 sps:$4 sm:$0xff]  }
 0x3c4   : > { %v4229_v26 = vpop.eup %4228 }
 0x3c5   : > { %v4231_v40 = vpop.eup %4230  ;;  %v2272_v41 = vadd.f32 1.0, %v4229_v26  ;;  %v5824_v26 = vld [vmem:[%s6213_s4 + $0x28] ss:$16 sps:$4 sm:$0xff]  }
 0x3c6   : > { %v4233_v43 = vpop.eup %4232  ;;  %v2159_v28 = vmul.f32 %v4231_v40, %v4225_v30  ;;  %v5804_v30 = vld [vmem:[%s6213_s4 + $0x24] ss:$16 sps:$4 sm:$0xff]  }
 0x3c7   : > { %4242 = vrcp.f32 %v2272_v41  ;;  %v2284_v48 = vadd.f32 1.0, %v4233_v43  ;;  %v4235_v7 = vpop.eup %4234  ;;  %v5830_v40 = vld [vmem:[%s6213_s4 + $0x44] ss:$16 sps:$4 sm:$0xff]   ;;  %v5836_v41 = vld [vmem:[%s6213_s4 + $0x4c] ss:$16 sps:$4 sm:$0xff]  }
 0x3c8   : > { %4244 = vtanh.f32 %v3770_v42  ;;  %v5785_v34 = vpack.c.bf16 %v2159_v28, %v2158_v38  ;;  %v2273_v44 = vadd.f32 1.0, %v4235_v7  ;;  %v4237_v29 = vpop.eup %4236  ;;  %6493 = vst [vmem:[#allocation36_spill] sm:$0xff] %v5836_v41  ;;  %v5848_v7 = vld [vmem:[%s6213_s4 + $0x48] ss:$16 sps:$4 sm:$0xff]  }
 0x3c9   : > { %4246 = vrcp.f32 %v2284_v48  ;;  %v2285_v0 = vadd.f32 1.0, %v4237_v29  ;;  %v4239_v27 = vpop.eup %4238  ;;  %v5842_v48 = vld [vmem:[%s6213_s4 + $0x40] ss:$16 sps:$4 sm:$0xff]   ;;  %6495 = vst [vmem:[#allocation38_spill] sm:$0xff] %v5848_v7 }
 0x3ca   : > { %6492 = vst [vmem:[#allocation35_spill] sm:$0xff] %v5785_v34  ;;  %4248 = vpow2.f32 %v3648_v33  ;;  %2349 = vmatmul.mubr.bf16.vlgmr.msra.gmra.mrb[24].mxu0 %v5785_v34  ;;  %2392 = vmatmul.mubr.bf16.vlgmr.msra.gmra.mrb[24].mxu1 %v5785_v34  ;;  %v4241_v42 = vpop.eup %4240  ;;  %6494 = vst [vmem:[#allocation37_spill] sm:$0xff] %v5842_v48 }
 0x3cb   : > { %4250 = vrcp.f32 %v2273_v44  ;;  %2403 = vmatpush1.bf16.msra.mxu0 %v5792_v35  ;;  %2446 = vmatpush1.bf16.msra.mxu1 %v5798_v36  ;;  %v2298_v34 = vadd.f32 1.0, %v4241_v42 }
 0x3cc   : > { %2404 = vmatprep.subr.bf16.mxu0 %v5804_v30  ;;  %2447 = vmatprep.subr.bf16.mxu1 %v5810_v39  ;;  %4252 = vrcp.f32 %v2285_v0  ;;  %v5855_v0 = vld [vmem:[%s6213_s4 + $0x64] ss:$16 sps:$4 sm:$0xff]  }
 0x3cd   : > { %2434 = vmatprep.mubr.bf16.mxu0 %v6386_v57  ;;  %2477 = vmatprep.mubr.bf16.mxu1 %v6386_v57  ;;  %6496 = vst [vmem:[#allocation39_spill] sm:$0xff] %v5855_v0  ;;  %4254 = vrcp.f32 %v2298_v34  ;;  %v5910_v34 = vld [vmem:[%s6213_s4 + $0xa4] ss:$16 sps:$4 sm:$0xff]  }
 0x3ce   : > { %6500 = vst [vmem:[#allocation41_spill] sm:$0xff] %v5910_v34 }
 0x3cf   : > { %2405 = vmatpush1.bf16.msra.mxu0 %v5818_v31  ;;  %2448 = vmatpush1.bf16.msra.mxu1 %v5824_v26 }
 0x3d0   : > { %2406 = vmatprep.subr.bf16.mxu0 %v5830_v40  ;;  %2449 = vmatprep.subr.bf16.mxu1 %v5836_v41  ;;  %v5869_v41 = vld [vmem:[%s6213_s4 + $0x60] ss:$16 sps:$4 sm:$0xff]  }
 0x3d1   : > { %v4243_v43 = vpop.eup %4242 }
 0x3d2   : > { %v4245_v33 = vpop.eup %4244  ;;  %v2306_v38 = vmul.f32 %v4243_v43, %v4239_v27  ;;  %v5861_v27 = vld [vmem:[%s6213_s4 + $0x6c] ss:$16 sps:$4 sm:$0xff]  }
 0x3d3   : > { %v4247_v28 = vpop.eup %4246  ;;  %2407 = vmatpush1.bf16.msra.mxu0 %v5842_v48  ;;  %2450 = vmatpush1.bf16.msra.mxu1 %v5848_v7 }
 0x3d4   : > { %v4249_v44 = vpop.eup %4248  ;;  %v2304_v29 = vmul.f32 %v4247_v28, %v5468_v1  ;;  %2408 = vmatprep.subr.bf16.mxu0 %v5855_v0  ;;  %2451 = vmatprep.subr.bf16.mxu1 %v5861_v27  ;;  %v5875_v0 = vld [vmem:[%s6213_s4 + $0x68] ss:$16 sps:$4 sm:$0xff]  }
 0x3d5   : > { %v4251_v43 = vpop.eup %4250  ;;  %v2299_v28 = vadd.f32 1.0, %v4249_v44 }
 0x3d6   : > { %v5864_v7 = vadd.f32 %v2306_v38, %v2304_v29  ;;  %v2307_v48 = vmul.f32 %v4251_v43, %v4245_v33  ;;  %v4253_v1 = vpop.eup %4252  ;;  %v5882_v33 = vld [vmem:[%s6213_s4 + $0x84] ss:$16 sps:$4 sm:$0xff]   ;;  %v5888_v38 = vld [vmem:[%s6213_s4 + $0x8c] ss:$16 sps:$4 sm:$0xff]   ;;  %v5903_v29 = vld [vmem:[%s6213_s4 + $0x88] ss:$16 sps:$4 sm:$0xff]  }
 0x3d7   : > { %2409 = vmatpush1.bf16.msra.mxu0 %v5869_v41  ;;  %2452 = vmatpush1.bf16.msra.mxu1 %v5875_v0  ;;  %v2305_v42 = vmul.f32 %v4253_v1, %v5476_v3  ;;  %6497 = vst [vmem:[#allocation72_spill] sm:$0xff] %v5888_v38  ;;  %v5897_v3 = vld [vmem:[%s6213_s4 + $0x80] ss:$16 sps:$4 sm:$0xff]   ;;  %6499 = vst [vmem:[#allocation40_spill] sm:$0xff] %v5903_v29  ;;  %v5928_v1 = vld [vmem:[%s6213_s4 + $0xa8] ss:$16 sps:$4 sm:$0xff]  }
 0x3d8   : > { %2410 = vmatprep.subr.bf16.mxu0 %v5882_v33  ;;  %2453 = vmatprep.subr.bf16.mxu1 %v5888_v38  ;;  %4256 = vtanh.f32 %v5864_v7  ;;  %6498 = vst [vmem:[#allocation73_spill] sm:$0xff] %v5897_v3  ;;  %v5922_v43 = vld [vmem:[%s6213_s4 + $0xa0] ss:$16 sps:$4 sm:$0xff]   ;;  %6503 = vst [vmem:[#allocation44_spill] sm:$0xff] %v5928_v1 }
 0x3d9   : > { %v5892_v44 = vadd.f32 %v2307_v48, %v2305_v42  ;;  %4258 = vrcp.f32 %v2299_v28  ;;  %v5916_v48 = vld [vmem:[%s6213_s4 + $0xac] ss:$16 sps:$4 sm:$0xff]   ;;  %6502 = vst [vmem:[#allocation43_spill] sm:$0xff] %v5922_v43  ;;  %v5934_v28 = vld [vmem:[%s6213_s4 + $0xc4] ss:$16 sps:$4 sm:$0xff]  }
 0x3da   : > { %6501 = vst [vmem:[#allocation42_spill] sm:$0xff] %v5916_v48  ;;  %6504 = vst [vmem:[#allocation45_spill] sm:$0xff] %v5934_v28  ;;  %v5940_v42 = vld [vmem:[%s6213_s4 + $0xcc] ss:$16 sps:$4 sm:$0xff]  }
 0x3db   : > { %2411 = vmatpush1.bf16.msra.mxu0 %v5897_v3  ;;  %2454 = vmatpush1.bf16.msra.mxu1 %v5903_v29  ;;  %4260 = vtanh.f32 %v5892_v44  ;;  %6505 = vst [vmem:[#allocation46_spill] sm:$0xff] %v5940_v42 }
 0x3dc   : > { %2412 = vmatprep.subr.bf16.mxu0 %v5910_v34  ;;  %2455 = vmatprep.subr.bf16.mxu1 %v5916_v48  ;;  %v5946_v48 = vld [vmem:[%s6213_s4 + $0xc0] ss:$16 sps:$4 sm:$0xff]   ;;  %v5964_v34 = vld [vmem:[%s6213_s4 + $0xec] ss:$16 sps:$4 sm:$0xff]  }
 0x3dd   : > { %6506 = vst [vmem:[#allocation47_spill] sm:$0xff] %v5946_v48  ;;  %6509 = vst [vmem:[#allocation50_spill] sm:$0xff] %v5964_v34 }
 0x3df   : > { %2413 = vmatpush1.bf16.msra.mxu0 %v5922_v43  ;;  %2456 = vmatpush1.bf16.msra.mxu1 %v5928_v1  ;;  %v4255_v43 = vpop.eup %4254  ;;  %v5952_v1 = vld [vmem:[%s6213_s4 + $0xc8] ss:$16 sps:$4 sm:$0xff]  }
 0x3e0   : > { %2414 = vmatprep.subr.bf16.mxu0 %v5934_v28  ;;  %2457 = vmatprep.subr.bf16.mxu1 %v5940_v42  ;;  %6507 = vst [vmem:[#allocation48_spill] sm:$0xff] %v5952_v1  ;;  %v5958_v42 = vld [vmem:[%s6213_s4 + $0xe4] ss:$16 sps:$4 sm:$0xff]  }
 0x3e1   : > { %6508 = vst [vmem:[#allocation49_spill] sm:$0xff] %v5958_v42 }
 0x3e2   : > { %v4257_v28 = vpop.eup %4256 }
 0x3e3   : > { %2415 = vmatpush1.bf16.msra.mxu0 %v5946_v48  ;;  %2458 = vmatpush1.bf16.msra.mxu1 %v5952_v1  ;;  %v4259_v48 = vpop.eup %4258  ;;  %v5970_v1 = vld [vmem:[%s6213_s4 + $0xe0] ss:$16 sps:$4 sm:$0xff]   ;;  %v2312_v3 = vmul.f32 %v4257_v28, %v4255_v43 }
 0x3e4   : > { %2416 = vmatprep.subr.bf16.mxu0 %v5958_v42  ;;  %2459 = vmatprep.subr.bf16.mxu1 %v5964_v34  ;;  %v5976_v42 = vld [vmem:[%s6213_s4 + $0xe8] ss:$16 sps:$4 sm:$0xff]  }
 0x3e5   : > { %v4261_v29 = vpop.eup %4260 }
 0x3e6   : > { %v2313_v38 = vmul.f32 %v4261_v29, %v4259_v48  ;;  %v6525_v29 = vld [vmem:[#allocation17_spill] sm:$0xff] }
 0x3e7   : > { %2417 = vmatpush1.bf16.msra.mxu0 %v5970_v1  ;;  %2460 = vmatpush1.bf16.msra.mxu1 %v5976_v42 }
 0x3e8   : > { %2556 = vmatprep.subr.bf16.mxu0 %v5496_v62  ;;  %2599 = vmatprep.subr.bf16.mxu1 %v5502_v63  ;;  %v2314_v34 = vpack.c.bf16 %v2313_v38, %v2312_v3  ;;  %v6510_v62 = vld [vmem:[#allocation20_spill] sm:$0xff]  ;;  %v6511_v63 = vld [vmem:[#allocation21_spill] sm:$0xff] }
 0x3ea   : > { %2435 = vmatmul.mubr.bf16.vlgmr.msra.gmra.mrb[24].mxu0 %v2314_v34  ;;  %2478 = vmatmul.mubr.bf16.vlgmr.msra.gmra.mrb[24].mxu1 %v2314_v34 }
 0x3eb   : > { %2557 = vmatpush1.bf16.msra.mxu0 %v5512_v13  ;;  %2600 = vmatpush1.bf16.msra.mxu1 %v5518_v10  ;;  %v6512_v13 = vld [vmem:[#allocation22_spill] sm:$0xff]  ;;  %v6513_v10 = vld [vmem:[#allocation23_spill] sm:$0xff] }
 0x3ec   : > { %2558 = vmatprep.subr.bf16.mxu0 %v5524_v53  ;;  %2601 = vmatprep.subr.bf16.mxu1 %v5530_v46  ;;  %v6514_v53 = vld [vmem:[#allocation24_spill] sm:$0xff]  ;;  %v6515_v46 = vld [vmem:[#allocation25_spill] sm:$0xff] }
 0x3ed   : > { %2588 = vmatprep.mubr.bf16.mxu0 %v6386_v57  ;;  %2631 = vmatprep.mubr.bf16.mxu1 %v6386_v57 }
 0x3ef   : > { %2559 = vmatpush1.bf16.msra.mxu0 %v5538_v37  ;;  %2602 = vmatpush1.bf16.msra.mxu1 %v5544_v4  ;;  %v6516_v37 = vld [vmem:[#allocation26_spill] sm:$0xff]  ;;  %v6517_v4 = vld [vmem:[#allocation27_spill] sm:$0xff] }
 0x3f0   : > { %2560 = vmatprep.subr.bf16.mxu0 %v5550_v6  ;;  %2603 = vmatprep.subr.bf16.mxu1 %v5556_v15  ;;  %v6518_v6 = vld [vmem:[#allocation28_spill] sm:$0xff]  ;;  %v6519_v15 = vld [vmem:[#allocation29_spill] sm:$0xff] }
 0x3f3   : > { %2561 = vmatpush1.bf16.msra.mxu0 %v5562_v9  ;;  %2604 = vmatpush1.bf16.msra.mxu1 %v5568_v16  ;;  %v6520_v9 = vld [vmem:[#allocation30_spill] sm:$0xff]  ;;  %v6521_v16 = vld [vmem:[#allocation31_spill] sm:$0xff] }
 0x3f4   : > { %2562 = vmatprep.subr.bf16.mxu0 %v5574_v18  ;;  %2605 = vmatprep.subr.bf16.mxu1 %v5580_v14  ;;  %v6522_v18 = vld [vmem:[#allocation32_spill] sm:$0xff]  ;;  %v6523_v14 = vld [vmem:[#allocation33_spill] sm:$0xff] }
 0x3f7   : > { %2563 = vmatpush1.bf16.msra.mxu0 %v5586_v12  ;;  %2606 = vmatpush1.bf16.msra.mxu1 %v5592_v8  ;;  %v6524_v12 = vld [vmem:[#allocation34_spill] sm:$0xff]  ;;  %v4436_v8 = vld [vmem:[#allocation10 + $0x84] ss:$16 sps:$4 sm:$0xff]  }
 0x3f8   : > { %2564 = vmatprep.subr.bf16.mxu0 %v5598_v20  ;;  %2607 = vmatprep.subr.bf16.mxu1 %v5604_v21  ;;  %v4437_v20 = vld [vmem:[#allocation10 + $0x8c] ss:$16 sps:$4 sm:$0xff]   ;;  %v4438_v21 = vld [vmem:[#allocation10 + $0x80] ss:$16 sps:$4 sm:$0xff]  }
 0x3fb   : > { %2565 = vmatpush1.bf16.msra.mxu0 %v5610_v22  ;;  %2608 = vmatpush1.bf16.msra.mxu1 %v5616_v23  ;;  %v4439_v22 = vld [vmem:[#allocation10 + $0x88] ss:$16 sps:$4 sm:$0xff]   ;;  %v4440_v23 = vld [vmem:[#allocation10 + $0xa4] ss:$16 sps:$4 sm:$0xff]  }
 0x3fc   : > { %2566 = vmatprep.subr.bf16.mxu0 %v5622_v24  ;;  %2609 = vmatprep.subr.bf16.mxu1 %v5628_v51  ;;  %v4441_v24 = vld [vmem:[#allocation10 + $0xac] ss:$16 sps:$4 sm:$0xff]   ;;  %v4442_v51 = vld [vmem:[#allocation10 + $0xa0] ss:$16 sps:$4 sm:$0xff]  }
 0x3ff   : > { %2567 = vmatpush1.bf16.msra.mxu0 %v5634_v52  ;;  %2610 = vmatpush1.bf16.msra.mxu1 %v5640_v55  ;;  %v4443_v52 = vld [vmem:[#allocation10 + $0xa8] ss:$16 sps:$4 sm:$0xff]  }
 0x400   : > { %2568 = vmatprep.subr.bf16.mxu0 %v5646_v56  ;;  %2611 = vmatprep.subr.bf16.mxu1 %v5652_v58  ;;  %v4447_v55 = vld [vmem:[#allocation10 + $0xc8] ss:$16 sps:$4 sm:$0xff]   ;;  %v4448_v56 = vld [vmem:[#allocation10 + $0xe4] ss:$16 sps:$4 sm:$0xff]   ;;  %v4449_v58 = vld [vmem:[#allocation10 + $0xec] ss:$16 sps:$4 sm:$0xff]  }
 0x403   : > { %2569 = vmatpush1.bf16.msra.mxu0 %v5658_v59  ;;  %2612 = vmatpush1.bf16.msra.mxu1 %v6510_v62  ;;  %v4450_v59 = vld [vmem:[#allocation10 + $0xe0] ss:$16 sps:$4 sm:$0xff]  }
 0x404   : > { %2570 = vmatprep.subr.bf16.mxu0 %v6511_v63  ;;  %2613 = vmatprep.subr.bf16.mxu1 %v6512_v13 }
 0x407   : > { %2571 = vmatpush1.bf16.msra.mxu0 %v6513_v10  ;;  %2614 = vmatpush1.bf16.msra.mxu1 %v6514_v53 }
 0x408   : > { %2700 = vmatprep.subr.bf16.mxu0 %v6515_v46  ;;  %2743 = vmatprep.subr.bf16.mxu1 %v6516_v37 }
 0x40a   : > { %2589 = vmatmul.mubr.bf16.vlgmr.msra.gmra.mrb[12].mxu0 %v2314_v34  ;;  %2632 = vmatmul.mubr.bf16.vlgmr.msra.gmra.mrb[12].mxu1 %v2314_v34 }
 0x40b   : > { %2701 = vmatpush1.bf16.msra.mxu0 %v6517_v4  ;;  %2744 = vmatpush1.bf16.msra.mxu1 %v6518_v6 }
 0x40c   : > { %2702 = vmatprep.subr.bf16.mxu0 %v6519_v15  ;;  %2745 = vmatprep.subr.bf16.mxu1 %v6520_v9 }
 0x40d   : > { %2732 = vmatprep.mubr.bf16.mxu0 %v6386_v57  ;;  %2775 = vmatprep.mubr.bf16.mxu1 %v6386_v57 }
 0x40f   : > { %2703 = vmatpush1.bf16.msra.mxu0 %v6521_v16  ;;  %2746 = vmatpush1.bf16.msra.mxu1 %v6522_v18  ;;  %v6526_v18 = vld [vmem:[#allocation18_spill] sm:$0xff] }
 0x410   : > { %2704 = vmatprep.subr.bf16.mxu0 %v6523_v14  ;;  %2747 = vmatprep.subr.bf16.mxu1 %v6524_v12 }
 0x413   : > { %2705 = vmatpush1.bf16.msra.mxu0 %v5725_v61  ;;  %2748 = vmatpush1.bf16.msra.mxu1 %v5728_v60  ;;  %v4451_v60 = vld [vmem:[#allocation10 + $0xe8] ss:$16 sps:$4 sm:$0xff]   ;;  %v4452_v61 = vld [vmem:[%s6213_s4 + $0x4] ss:$16 sps:$4 sm:$0xff]  }
 0x414   : > { %2706 = vmatprep.subr.bf16.mxu0 %v5731_v2  ;;  %2749 = vmatprep.subr.bf16.mxu1 %v5734_v47  ;;  %v4444_v47 = vld [vmem:[#allocation10 + $0xc4] ss:$16 sps:$4 sm:$0xff]   ;;  %v4453_v2 = vld [vmem:[%s6213_s4 + $0xc] ss:$16 sps:$4 sm:$0xff]  }
 0x417   : > { %2707 = vmatpush1.bf16.msra.mxu0 %v5737_v49  ;;  %2750 = vmatpush1.bf16.msra.mxu1 %v5740_v54  ;;  %v4445_v49 = vld [vmem:[#allocation10 + $0xcc] ss:$16 sps:$4 sm:$0xff]   ;;  %v4446_v54 = vld [vmem:[#allocation10 + $0xc0] ss:$16 sps:$4 sm:$0xff]  }
 0x418   : > { %2708 = vmatprep.subr.bf16.mxu0 %v4436_v8  ;;  %2751 = vmatprep.subr.bf16.mxu1 %v4437_v20 }
 0x41b   : > { %2709 = vmatpush1.bf16.msra.mxu0 %v4438_v21  ;;  %2752 = vmatpush1.bf16.msra.mxu1 %v4439_v22 }
 0x41c   : > { %2710 = vmatprep.subr.bf16.mxu0 %v4440_v23  ;;  %2753 = vmatprep.subr.bf16.mxu1 %v4441_v24 }
 0x41f   : > { %2711 = vmatpush1.bf16.msra.mxu0 %v4442_v51  ;;  %2754 = vmatpush1.bf16.msra.mxu1 %v4443_v52 }
 0x420   : > { %2712 = vmatprep.subr.bf16.mxu0 %v4444_v47  ;;  %2755 = vmatprep.subr.bf16.mxu1 %v4445_v49 }
 0x423   : > { %2713 = vmatpush1.bf16.msra.mxu0 %v4446_v54  ;;  %2756 = vmatpush1.bf16.msra.mxu1 %v4447_v55 }
 0x424   : > { %2714 = vmatprep.subr.bf16.mxu0 %v4448_v56  ;;  %2757 = vmatprep.subr.bf16.mxu1 %v4449_v58 }
 0x427   : > { %2715 = vmatpush1.bf16.msra.mxu0 %v4450_v59  ;;  %2758 = vmatpush1.bf16.msra.mxu1 %v4451_v60 }
 0x428   : > { %2786 = vmatprep.subr.bf16.mxu0 %v4452_v61  ;;  %2829 = vmatprep.subr.bf16.mxu1 %v4453_v2 }
 0x4bd   : > { %v2436_v38 = vpop.f32.mrb[24].mxu0  ;;  %v2479_v3 = vpop.f32.mrb[24].mxu1 }
 0x4be   : > { %v2488_v34 = vadd.f32 %v2436_v38, %v6525_v29  ;;  %v2438_v48 = vpop.f32.mrb[25].mxu0  ;;  %v2481_v43 = vpop.f32.mrb[25].mxu1  ;;  %v2490_v14 = vadd.f32 %v2479_v3, %v6526_v18 }
 0x4bf   : > { %v2489_v28 = vadd.f32 %v2438_v48, %v5417_v50  ;;  %v2440_v62 = vpop.f32.mrb[26].mxu0  ;;  %v2483_v63 = vpop.f32.mrb[26].mxu1  ;;  %v2491_v9 = vadd.f32 %v2481_v43, %v5424_v11 }
 0x4c0   : > { %v3649_v13 = vmul.f32 -1.442695, %v2488_v34  ;;  %v2492_v10 = vadd.f32 %v2440_v62, %v6525_v29  ;;  %v2442_v53 = vpop.f32.mrb[27].mxu0  ;;  %v2485_v46 = vpop.f32.mrb[27].mxu1  ;;  %v2494_v23 = vadd.f32 %v2483_v63, %v6526_v18 }
 0x4c1   : > { %v3651_v37 = vmul.f32 -1.442695, %v2489_v28  ;;  %v2493_v4 = vadd.f32 %v2442_v53, %v5417_v50  ;;  %v2495_v16 = vadd.f32 %v2485_v46, %v5424_v11  ;;  %v3653_v12 = vmul.f32 -1.442695, %v2491_v9 }
 0x4c2   : > { %4262 = vpow2.f32 %v3649_v13  ;;  %v3650_v6 = vmul.f32 -1.442695, %v2492_v10 }
 0x4c3   : > { %4264 = vpow2.f32 %v3651_v37  ;;  %v3652_v15 = vmul.f32 -1.442695, %v2493_v4  ;;  %v3654_v8 = vmul.f32 -1.442695, %v2495_v16 }
 0x4c4   : > { %4266 = vpow2.f32 %v3650_v6 }
 0x4c5   : > { %4268 = vpow2.f32 %v3652_v15 }
 0x4c6   : > { %4270 = vtanh.f32 %v2490_v14 }
 0x4c7   : > { %4272 = vpow2.f32 %v3653_v12 }
 0x4c8   : > { %4274 = vpow2.f32 %v3654_v8 }
 0x4cc   : > { %v4263_v20 = vpop.eup %4262 }
 0x4cd   : > { %v4265_v21 = vpop.eup %4264  ;;  %v2502_v22 = vadd.f32 1.0, %v4263_v20 }
 0x4ce   : > { %v2514_v24 = vadd.f32 1.0, %v4265_v21  ;;  %v4267_v51 = vpop.eup %4266 }
 0x4cf   : > { %4276 = vrcp.f32 %v2502_v22  ;;  %v2503_v52 = vadd.f32 1.0, %v4267_v51  ;;  %v4269_v47 = vpop.eup %4268 }
 0x4d0   : > { %4278 = vrcp.f32 %v2514_v24  ;;  %v2515_v49 = vadd.f32 1.0, %v4269_v47  ;;  %v4271_v54 = vpop.eup %4270 }
 0x4d1   : > { %4280 = vtanh.f32 %v2494_v23  ;;  %v4273_v55 = vpop.eup %4272 }
 0x4d2   : > { %4282 = vrcp.f32 %v2503_v52  ;;  %v4275_v56 = vpop.eup %4274  ;;  %v2528_v38 = vadd.f32 1.0, %v4273_v55 }
 0x4d3   : > { %4284 = vrcp.f32 %v2515_v49  ;;  %v2529_v34 = vadd.f32 1.0, %v4275_v56 }
 0x4d4   : > { %4286 = vrcp.f32 %v2528_v38 }
 0x4d5   : > { %4288 = vrcp.f32 %v2529_v34 }
 0x4d9   : > { %v4277_v58 = vpop.eup %4276 }
 0x4da   : > { %v4279_v59 = vpop.eup %4278  ;;  %v2536_v60 = vmul.f32 %v4277_v58, %v4271_v54 }
 0x4db   : > { %v4281_v61 = vpop.eup %4280  ;;  %v2534_v2 = vmul.f32 %v4279_v59, %v5770_v32 }
 0x4dc   : > { %v4283_v3 = vpop.eup %4282 }
 0x4dd   : > { %v6046_v48 = vadd.f32 %v2536_v60, %v2534_v2  ;;  %v2537_v43 = vmul.f32 %v4283_v3, %v4281_v61  ;;  %v2590_v28 = vpop.f32.mrb[12].mxu0  ;;  %v2633_v62 = vpop.f32.mrb[12].mxu1 }
 0x4de   : > { %v4285_v63 = vpop.eup %4284  ;;  %v3756_v13 = vadd.f32 %v2590_v28, %v6444_v19  ;;  %v2592_v10 = vpop.f32.mrb[13].mxu0  ;;  %v3772_v22 = vadd.f32 %v2633_v62, %v6445_v45  ;;  %v6528_v62 = vld [vmem:[#allocation37_spill] sm:$0xff] }
 0x4df   : > { %v2635_v53 = vpop.f32.mrb[13].mxu1  ;;  %v2535_v46 = vmul.f32 %v4285_v63, %v5777_v25  ;;  %v3757_v37 = vadd.f32 %v2592_v10, %v5316_v17  ;;  %v2594_v4 = vpop.f32.mrb[14].mxu0  ;;  %4290 = vtanh.f32 %v6046_v48  ;;  %v6529_v63 = vld [vmem:[#allocation38_spill] sm:$0xff] }
 0x4e0   : > { %v2637_v32 = vpop.f32.mrb[14].mxu1  ;;  %v3655_v6 = vmul.f32 -1.442695, %v3756_v13  ;;  %v3758_v15 = vadd.f32 %v2594_v4, %v6444_v19  ;;  %v2596_v9 = vpop.f32.mrb[15].mxu0  ;;  %v3773_v21 = vadd.f32 %v2635_v53, %v5325_v5 }
 0x4e1   : > { %v2639_v16 = vpop.f32.mrb[15].mxu1  ;;  %v6053_v14 = vadd.f32 %v2537_v43, %v2535_v46  ;;  %v3657_v12 = vmul.f32 -1.442695, %v3757_v37  ;;  %v3759_v8 = vadd.f32 %v2596_v9, %v5316_v17  ;;  %v4287_v19 = vpop.eup %4286  ;;  %v3774_v17 = vadd.f32 %v2637_v32, %v6445_v45  ;;  %v6537_v9 = vld [vmem:[#allocation44_spill] sm:$0xff] }
 0x4e2   : > { %4292 = vpow2.f32 %v3655_v6  ;;  %v3656_v20 = vmul.f32 -1.442695, %v3758_v15  ;;  %v4289_v23 = vpop.eup %4288  ;;  %v3659_v24 = vmul.f32 -1.442695, %v3773_v21  ;;  %v3775_v51 = vadd.f32 %v2639_v16, %v5325_v5  ;;  %v6533_v6 = vld [vmem:[#allocation40_spill] sm:$0xff]  ;;  %v6534_v15 = vld [vmem:[#allocation41_spill] sm:$0xff] }
 0x4e3   : > { %4294 = vtanh.f32 %v6053_v14  ;;  %v3658_v25 = vmul.f32 -1.442695, %v3759_v8  ;;  %v6540_v8 = vld [vmem:[#allocation47_spill] sm:$0xff]  ;;  %v6542_v21 = vld [vmem:[#allocation49_spill] sm:$0xff] }
 0x4e4   : > { %4296 = vpow2.f32 %v3657_v12  ;;  %v3660_v56 = vmul.f32 -1.442695, %v3775_v51 }
 0x4e5   : > { %4298 = vpow2.f32 %v3656_v20  ;;  %v6541_v20 = vld [vmem:[#allocation48_spill] sm:$0xff] }
 0x4e6   : > { %4300 = vpow2.f32 %v3658_v25 }
 0x4e7   : > { %4302 = vtanh.f32 %v3772_v22  ;;  %v4064_v22 = vld [vmem:[%s6216_s7 + $0x4] ss:$8 sps:$4 sm:$0xff]  }
 0x4e8   : > { %4304 = vpow2.f32 %v3659_v24 }
 0x4e9   : > { %v4291_v52 = vpop.eup %4290 }
 0x4ea   : > { %v2542_v58 = vmul.f32 %v4291_v52, %v4287_v19  ;;  %v6543_v19 = vld [vmem:[#allocation50_spill] sm:$0xff]  ;;  %v4062_v52 = vld [vmem:[%s6216_s7] ss:$8 sps:$4 sm:$0xff]  }
 0x4ec   : > { %v4293_v47 = vpop.eup %4292 }
 0x4ed   : > { %v4295_v49 = vpop.eup %4294  ;;  %v2656_v54 = vadd.f32 1.0, %v4293_v47 }
 0x4ee   : > { %v4297_v55 = vpop.eup %4296  ;;  %v2543_v59 = vmul.f32 %v4295_v49, %v4289_v23  ;;  %v4068_v49 = vld [vmem:[%s6216_s7 + $0x20] ss:$8 sps:$4 sm:$0xff]  }
 0x4ef   : > { %4306 = vrcp.f32 %v2656_v54  ;;  %v2668_v60 = vadd.f32 1.0, %v4297_v55  ;;  %v4299_v61 = vpop.eup %4298  ;;  %v4073_v54 = vld [vmem:[%s6216_s7 + $0x34] ss:$8 sps:$4 sm:$0xff]   ;;  %v4071_v55 = vld [vmem:[%s6216_s7 + $0x30] ss:$8 sps:$4 sm:$0xff]  }
 0x4f0   : > { %4308 = vtanh.f32 %v3774_v17  ;;  %v6061_v2 = vpack.c.bf16 %v2543_v59, %v2542_v58  ;;  %v2657_v5 = vadd.f32 1.0, %v4299_v61  ;;  %v4301_v38 = vpop.eup %4300  ;;  %v4067_v17 = vld [vmem:[%s6216_s7 + $0x14] ss:$8 sps:$4 sm:$0xff]   ;;  %v4074_v58 = vld [vmem:[%s6216_s7 + $0x40] ss:$8 sps:$4 sm:$0xff]  }
 0x4f1   : > { %4310 = vrcp.f32 %v2668_v60  ;;  %v2669_v45 = vadd.f32 1.0, %v4301_v38  ;;  %v4303_v3 = vpop.eup %4302  ;;  %v4079_v59 = vld [vmem:[%s6216_s7 + $0x54] ss:$8 sps:$4 sm:$0xff]   ;;  %v4077_v60 = vld [vmem:[%s6216_s7 + $0x50] ss:$8 sps:$4 sm:$0xff]  }
 0x4f2   : > { %4312 = vpow2.f32 %v3660_v56  ;;  %2733 = vmatmul.mubr.bf16.vlgmr.msra.gmra.mrb[28].mxu0 %v6061_v2  ;;  %2776 = vmatmul.mubr.bf16.vlgmr.msra.gmra.mrb[28].mxu1 %v6061_v2  ;;  %v4305_v34 = vpop.eup %4304  ;;  %v4076_v56 = vld [vmem:[%s6216_s7 + $0x44] ss:$8 sps:$4 sm:$0xff]   ;;  %v4085_v38 = vld [vmem:[%s6216_s7 + $0x74] ss:$8 sps:$4 sm:$0xff]  }
 0x4f3   : > { %4314 = vrcp.f32 %v2657_v5  ;;  %2787 = vmatpush1.bf16.msra.mxu0 %v5792_v35  ;;  %2830 = vmatpush1.bf16.msra.mxu1 %v5798_v36  ;;  %v6527_v35 = vld [vmem:[#allocation36_spill] sm:$0xff]  ;;  %v4082_v61 = vld [vmem:[%s6216_s7 + $0x64] ss:$8 sps:$4 sm:$0xff]  }
 0x4f4   : > { %2788 = vmatprep.subr.bf16.mxu0 %v5804_v30  ;;  %2831 = vmatprep.subr.bf16.mxu1 %v5810_v39  ;;  %4316 = vrcp.f32 %v2669_v45  ;;  %v2682_v39 = vadd.f32 1.0, %v4305_v34  ;;  %v4080_v5 = vld [vmem:[%s6216_s7 + $0x60] ss:$8 sps:$4 sm:$0xff]   ;;  %v4083_v45 = vld [vmem:[%s6216_s7 + $0x70] ss:$8 sps:$4 sm:$0xff]  }
 0x4f5   : > { %2818 = vmatprep.mubr.bf16.mxu0 %v6386_v57  ;;  %2861 = vmatprep.mubr.bf16.mxu1 %v6386_v57  ;;  %v6545_v34 = vld [vmem:[#allocation35_spill] sm:$0xff] }
 0x4f6   : > { %4318 = vrcp.f32 %v2682_v39  ;;  %v4091_v39 = vld [vmem:[#allocation12 + $0x10] sm:$0xff]  }
 0x4f7   : > { %2789 = vmatpush1.bf16.msra.mxu0 %v5818_v31  ;;  %2832 = vmatpush1.bf16.msra.mxu1 %v5824_v26  ;;  %v6530_v31 = vld [vmem:[#allocation39_spill] sm:$0xff] }
 0x4f8   : > { %2790 = vmatprep.subr.bf16.mxu0 %v5830_v40  ;;  %2833 = vmatprep.subr.bf16.mxu1 %v6527_v35  ;;  %v4086_v35 = vld [vmem:[#allocation12 + $0x40] sm:$0xff]  }
 0x4f9   : > { %v4307_v36 = vpop.eup %4306 }
 0x4fa   : > { %v4309_v43 = vpop.eup %4308  ;;  %v2690_v30 = vmul.f32 %v4307_v36, %v4303_v3  ;;  %v6544_v3 = vld [vmem:[#allocation19_spill] sm:$0xff]  ;;  %v4087_v36 = vld [vmem:[#allocation12] sm:$0xff]  }
 0x4fb   : > { %v4311_v28 = vpop.eup %4310  ;;  %2791 = vmatpush1.bf16.msra.mxu0 %v6528_v62  ;;  %2834 = vmatpush1.bf16.msra.mxu1 %v6529_v63  ;;  %v4092_v62 = vld [vmem:[#allocation12 + $0x58] sm:$0xff]  }
 0x4fc   : > { %v4313_v13 = vpop.eup %4312  ;;  %v2688_v10 = vmul.f32 %v4311_v28, %v5864_v7  ;;  %2792 = vmatprep.subr.bf16.mxu0 %v6530_v31  ;;  %2835 = vmatprep.subr.bf16.mxu1 %v5861_v27  ;;  %v6531_v7 = vld [vmem:[#allocation72_spill] sm:$0xff]  ;;  %v6532_v27 = vld [vmem:[#allocation73_spill] sm:$0xff]  ;;  %v4090_v28 = vld [vmem:[#allocation12 + $0x50] sm:$0xff]  }
 0x4fd   : > { %v4315_v26 = vpop.eup %4314  ;;  %v2683_v37 = vadd.f32 1.0, %v4313_v13  ;;  %v4093_v63 = vld [vmem:[#allocation12 + $0x18] sm:$0xff]   ;;  %v4094_v13 = vld [vmem:[#allocation12 + $0x60] sm:$0xff]   ;;  %v4098_v31 = vld [vmem:[#allocation12 + $0x70] sm:$0xff]  }
 0x4fe   : > { %v2692_v40 = vadd.f32 %v2690_v30, %v2688_v10  ;;  %v2691_v53 = vmul.f32 %v4315_v26, %v4309_v43  ;;  %v4317_v46 = vpop.eup %4316  ;;  %v4088_v43 = vld [vmem:[#allocation12 + $0x48] sm:$0xff]   ;;  %v4099_v26 = vld [vmem:[#allocation12 + $0x30] sm:$0xff]  }
 0x4ff   : > { %2793 = vmatpush1.bf16.msra.mxu0 %v5869_v41  ;;  %2836 = vmatpush1.bf16.msra.mxu1 %v5875_v0  ;;  %v2689_v4 = vmul.f32 %v4317_v46, %v5892_v44  ;;  %v6535_v41 = vld [vmem:[#allocation42_spill] sm:$0xff]  ;;  %v6536_v0 = vld [vmem:[#allocation43_spill] sm:$0xff]  ;;  %v6538_v44 = vld [vmem:[#allocation45_spill] sm:$0xff] }
 0x500   : > { %4320 = vtanh.f32 %v2692_v40  ;;  %2933 = vst [vmem:[#allocation3] sm:$0xff] %v2692_v40  ;;  %2794 = vmatprep.subr.bf16.mxu0 %v5882_v33  ;;  %2837 = vmatprep.subr.bf16.mxu1 %v6531_v7  ;;  %v6539_v33 = vld [vmem:[#allocation46_spill] sm:$0xff]  ;;  %v4319_v16 = vpop.eup %4318  ;;  %v4100_v40 = vld [vmem:[#allocation12 + $0x78] sm:$0xff]  }
 0x501   : > { %v2693_v32 = vadd.f32 %v2691_v53, %v2689_v4  ;;  %4322 = vrcp.f32 %v2683_v37  ;;  %v4089_v30 = vld [vmem:[#allocation12 + $0x8] sm:$0xff]   ;;  %v4101_v53 = vld [vmem:[#allocation12 + $0x38] sm:$0xff]  }
 0x502   : > { %v4097_v10 = vld [vmem:[#allocation12 + $0x28] sm:$0xff]  }
 0x503   : > { %2795 = vmatpush1.bf16.msra.mxu0 %v6532_v27  ;;  %2838 = vmatpush1.bf16.msra.mxu1 %v6533_v6  ;;  %4324 = vtanh.f32 %v2693_v32  ;;  %2934 = vst [vmem:[#allocation3 + $0x8] sm:$0xff] %v2693_v32 }
 0x504   : > { %2796 = vmatprep.subr.bf16.mxu0 %v6534_v15  ;;  %2839 = vmatprep.subr.bf16.mxu1 %v6535_v41 }
 0x507   : > { %2797 = vmatpush1.bf16.msra.mxu0 %v6536_v0  ;;  %2840 = vmatpush1.bf16.msra.mxu1 %v6537_v9 }
 0x508   : > { %2798 = vmatprep.subr.bf16.mxu0 %v6538_v44  ;;  %2841 = vmatprep.subr.bf16.mxu1 %v6539_v33 }
 0x50a   : > { %v4321_v12 = vpop.eup %4320 }
 0x50b   : > { %2799 = vmatpush1.bf16.msra.mxu0 %v6540_v8  ;;  %2842 = vmatpush1.bf16.msra.mxu1 %v6541_v20  ;;  %v2696_v25 = vmul.f32 %v4321_v12, %v4319_v16  ;;  %v4323_v23 = vpop.eup %4322 }
 0x50c   : > { %2800 = vmatprep.subr.bf16.mxu0 %v6542_v21  ;;  %2843 = vmatprep.subr.bf16.mxu1 %v6543_v19 }
 0x50d   : > { %2931 = vst [vmem:[#allocation2] sm:$0xff] %v2696_v25  ;;  %v4325_v24 = vpop.eup %4324 }
 0x50e   : > { %v2697_v51 = vmul.f32 %v4325_v24, %v4323_v23 }
 0x50f   : > { %2801 = vmatpush1.bf16.msra.mxu0 %v5970_v1  ;;  %2844 = vmatpush1.bf16.msra.mxu1 %v5976_v42  ;;  %v4065_v1 = vld [vmem:[%s6216_s7 + $0x10] ss:$8 sps:$4 sm:$0xff]   ;;  %v4070_v42 = vld [vmem:[%s6216_s7 + $0x24] ss:$8 sps:$4 sm:$0xff]  }
 0x510   : > { %3059 = vmatprep.subr.bf16.mxu0 %v4064_v22  ;;  %v2698_v47 = vpack.c.bf16 %v2697_v51, %v2696_v25  ;;  %2932 = vst [vmem:[#allocation2 + $0x8] sm:$0xff] %v2697_v51  ;;  %3704 = vmatprep.subr.bf16.mxu1 %v4086_v35 }
 0x512   : > { %2819 = vmatmul.mubr.bf16.vlgmr.msra.gmra.mrb[28].mxu0 %v2698_v47  ;;  %2862 = vmatmul.mubr.bf16.vlgmr.msra.gmra.mrb[28].mxu1 %v2698_v47 }
 0x513   : > { %3060 = vmatpush1.bf16.msra.mxu0 %v4062_v52  ;;  %3091 = vmatprep.mubr.bf16.mxu0 %v6386_v57 }
 0x514   : > { %3061 = vmatprep.subr.bf16.mxu0 %v4067_v17  ;;  %3705 = vmatpush3.bf16.msra.mxu1 %v4087_v36 }
 0x515   : > { %3706 = vmatprep.subr.bf16.mxu1 %v4088_v43 }
 0x517   : > { %3062 = vmatpush1.bf16.msra.mxu0 %v4065_v1 }
 0x518   : > { %3063 = vmatprep.subr.bf16.mxu0 %v4070_v42  ;;  %3707 = vmatpush3.bf16.msra.mxu1 %v4089_v30 }
 0x519   : > { %3708 = vmatprep.subr.bf16.mxu1 %v4090_v28 }
 0x51b   : > { %3064 = vmatpush1.bf16.msra.mxu0 %v4068_v49 }
 0x51c   : > { %3065 = vmatprep.subr.bf16.mxu0 %v4073_v54  ;;  %3709 = vmatpush3.bf16.msra.mxu1 %v4091_v39 }
 0x51d   : > { %3710 = vmatprep.subr.bf16.mxu1 %v4092_v62 }
 0x51f   : > { %3066 = vmatpush1.bf16.msra.mxu0 %v4071_v55 }
 0x520   : > { %3067 = vmatprep.subr.bf16.mxu0 %v4076_v56  ;;  %3711 = vmatpush3.bf16.msra.mxu1 %v4093_v63 }
 0x521   : > { %3712 = vmatprep.subr.bf16.mxu1 %v4094_v13 }
 0x523   : > { %3068 = vmatpush1.bf16.msra.mxu0 %v4074_v58 }
 0x524   : > { %3069 = vmatprep.subr.bf16.mxu0 %v4079_v59  ;;  %v6546_v59 = vld [vmem:[#allocation70_spill] sm:$0xff] }
 0x527   : > { %3070 = vmatpush1.bf16.msra.mxu0 %v4077_v60 }
 0x528   : > { %3071 = vmatprep.subr.bf16.mxu0 %v4082_v61 }
 0x52b   : > { %3072 = vmatpush1.bf16.msra.mxu0 %v4080_v5 }
 0x52c   : > { %3073 = vmatprep.subr.bf16.mxu0 %v4085_v38  ;;  %v6547_v38 = vld [vmem:[#allocation71_spill] sm:$0xff] }
 0x52f   : > { %3074 = vmatpush1.bf16.msra.mxu0 %v4083_v45 }
 0x532   : > { %3092 = vmatmul.mubr.bf16.vlgmr.msra.gmra.mrb[32].mxu0 %v6544_v3 }
 0x533   : > { %3101 = vmatprep.mubr.bf16.mxu0 %v6386_v57 }
 0x53a   : > { %3102 = vmatmul.mubr.bf16.gmra.mrb[36].mxu0 %v6545_v34 }
 0x53b   : > { %3111 = vmatprep.mubr.bf16.mxu0 %v6386_v57 }
 0x542   : > { %3112 = vmatmul.mubr.bf16.gmra.mrb[40].mxu0 %v6061_v2  ;;  %v4095_v2 = vld [vmem:[#allocation12 + $0x20] sm:$0xff]  }
 0x543   : > { %3121 = vmatprep.mubr.bf16.mxu0 %v6386_v57  ;;  %3713 = vmatpush3.bf16.msra.mxu1 %v4095_v2  ;;  %v4096_v57 = vld [vmem:[#allocation12 + $0x68] sm:$0xff]  }
 0x544   : > { %3714 = vmatprep.subr.bf16.mxu1 %v4096_v57 }
 0x547   : > { %3715 = vmatpush3.bf16.msra.mxu1 %v4097_v10 }
 0x548   : > { %3716 = vmatprep.subr.bf16.mxu1 %v4098_v31 }
 0x54b   : > { %3717 = vmatpush3.bf16.msra.mxu1 %v4099_v26 }
 0x54c   : > { %3718 = vmatprep.subr.bf16.mxu1 %v4100_v40 }
 0x54f   : > { %3719 = vmatpush3.bf16.msra.mxu1 %v4101_v53 }
 0x5e5   : > { %v2820_v46 = vpop.f32.mrb[28].mxu0  ;;  %v2863_v37 = vpop.f32.mrb[28].mxu1 }
 0x5e6   : > { %v2872_v4 = vadd.f32 %v2820_v46, %v6525_v29  ;;  %v2822_v7 = vpop.f32.mrb[29].mxu0  ;;  %v2865_v32 = vpop.f32.mrb[29].mxu1  ;;  %v2874_v25 = vadd.f32 %v2863_v37, %v6526_v18 }
 0x5e7   : > { %v2873_v27 = vadd.f32 %v2822_v7, %v5417_v50  ;;  %v2824_v6 = vpop.f32.mrb[30].mxu0  ;;  %v2867_v15 = vpop.f32.mrb[30].mxu1  ;;  %v2875_v20 = vadd.f32 %v2865_v32, %v5424_v11 }
 0x5e8   : > { %v3661_v41 = vmul.f32 -1.442695, %v2872_v4  ;;  %v2876_v0 = vadd.f32 %v2824_v6, %v6525_v29  ;;  %v2826_v9 = vpop.f32.mrb[31].mxu0  ;;  %v2869_v44 = vpop.f32.mrb[31].mxu1  ;;  %v2878_v29 = vadd.f32 %v2867_v15, %v6526_v18  ;;  %v2967_v18 = vld [vmem:[%s6217_s8] sm:$0x3] }
 0x5e9   : > { %v3663_v33 = vmul.f32 -1.442695, %v2873_v27  ;;  %v2877_v16 = vadd.f32 %v2826_v9, %v5417_v50  ;;  %v3665_v21 = vmul.f32 -1.442695, %v2875_v20  ;;  %v2879_v19 = vadd.f32 %v2869_v44, %v5424_v11 }
 0x5ea   : > { %4326 = vpow2.f32 %v3661_v41  ;;  %v3662_v12 = vmul.f32 -1.442695, %v2876_v0  ;;  %v6166_v60 = vrot.slane %v2967_v18, %v6546_v59  ;;  %v6170_v45 = vrot.slane %v2967_v18, %v6547_v38 }
 0x5eb   : > { %4328 = vpow2.f32 %v3663_v33  ;;  %v3664_v8 = vmul.f32 -1.442695, %v2877_v16  ;;  %v3666_v50 = vmul.f32 -1.442695, %v2879_v19 }
 0x5ec   : > { %4330 = vpow2.f32 %v3662_v12 }
 0x5ed   : > { %4332 = vpow2.f32 %v3664_v8 }
 0x5ee   : > { %4334 = vtanh.f32 %v2874_v25 }
 0x5ef   : > { %4336 = vpow2.f32 %v3665_v21 }
 0x5f0   : > { %4338 = vtanh.f32 %v2878_v29 }
 0x5f4   : > { %v4327_v22 = vpop.eup %4326 }
 0x5f5   : > { %v4329_v23 = vpop.eup %4328  ;;  %v2886_v24 = vadd.f32 1.0, %v4327_v22 }
 0x5f6   : > { %v2898_v51 = vadd.f32 1.0, %v4329_v23  ;;  %v4331_v52 = vpop.eup %4330 }
 0x5f7   : > { %4340 = vrcp.f32 %v2886_v24  ;;  %v2887_v47 = vadd.f32 1.0, %v4331_v52  ;;  %v4333_v17 = vpop.eup %4332 }
 0x5f8   : > { %4342 = vrcp.f32 %v2898_v51  ;;  %v2899_v1 = vadd.f32 1.0, %v4333_v17  ;;  %v4335_v11 = vpop.eup %4334 }
 0x5f9   : > { %4344 = vpow2.f32 %v3666_v50  ;;  %v4337_v42 = vpop.eup %4336 }
 0x5fa   : > { %4346 = vrcp.f32 %v2887_v47  ;;  %v4339_v49 = vpop.eup %4338  ;;  %v2912_v58 = vadd.f32 1.0, %v4337_v42 }
 0x5fb   : > { %4348 = vrcp.f32 %v2899_v1 }
 0x5fc   : > { %4350 = vrcp.f32 %v2912_v58  ;;  %v3683_v58 = vld [vmem:[%s6548_s21] ss:$0 sm:$0xff] }
 0x601   : > { %v4341_v54 = vpop.eup %4340 }
 0x602   : > { %v4343_v55 = vpop.eup %4342  ;;  %v2920_v56 = vmul.f32 %v4341_v54, %v4335_v11 }
 0x603   : > { %v4345_v61 = vpop.eup %4344  ;;  %v2918_v5 = vmul.f32 %v4343_v55, %v6046_v48 }
 0x604   : > { %v4347_v3 = vpop.eup %4346  ;;  %v2913_v30 = vadd.f32 1.0, %v4345_v61 }
 0x605   : > { %v2922_v34 = vadd.f32 %v2920_v56, %v2918_v5  ;;  %v2921_v35 = vmul.f32 %v4347_v3, %v4339_v49  ;;  %v3093_v36 = vpop.f32.mrb[32].mxu0  ;;  %v4349_v43 = vpop.eup %4348 }
 0x606   : > { %v3094_v28 = vadd.f32 %v3093_v36, %v6166_v60  ;;  %v3095_v39 = vpop.f32.mrb[33].mxu0  ;;  %v2919_v62 = vmul.f32 %v4349_v43, %v6053_v14  ;;  %v4351_v6 = vpop.eup %4350 }
 0x607   : > { %2937 = vst [vmem:[#allocation5] sm:$0xff] %v2922_v34  ;;  %v3096_v63 = vadd.f32 %v3095_v39, %v6170_v45  ;;  %v3097_v13 = vpop.f32.mrb[34].mxu0  ;;  %4352 = vtanh.f32 %v2922_v34 }
 0x608   : > { %v3098_v48 = vadd.f32 %v3097_v13, %v6166_v60  ;;  %v3099_v2 = vpop.f32.mrb[35].mxu0  ;;  %v2923_v57 = vadd.f32 %v2921_v35, %v2919_v62  ;;  %4354 = vrcp.f32 %v2913_v30  ;;  %v3132_v31 = vmax.f32 %v3094_v28, 0.0 }
 0x609   : > { %v3100_v10 = vadd.f32 %v3099_v2, %v6170_v45  ;;  %v3133_v40 = vmax.f32 %v3096_v63, 0.0 }
 0x60a   : > { %v3134_v26 = vmax.f32 %v3098_v48, 0.0  ;;  %2938 = vst [vmem:[#allocation5 + $0x8] sm:$0xff] %v2923_v57  ;;  %4356 = vtanh.f32 %v2923_v57 }
 0x60b   : > { %v3135_v53 = vmax.f32 %v3100_v10, 0.0 }
 0x60c   : > { %v3148_v46 = vpack.c.bf16 %v3134_v26, %v3132_v31 }
 0x60d   : > { %v3149_v37 = vpack.c.bf16 %v3135_v53, %v3133_v40  ;;  %v3103_v14 = vpop.f32.mrb[36].mxu0 }
 0x60e   : > { %v3104_v4 = vadd.f32 %v3103_v14, %v6166_v60  ;;  %v3105_v7 = vpop.f32.mrb[37].mxu0 }
 0x60f   : > { %v3106_v32 = vadd.f32 %v3105_v7, %v6170_v45  ;;  %v3107_v27 = vpop.f32.mrb[38].mxu0  ;;  %3323 = vmatprep.mubr.bf16.mxu1 %v3149_v37 }
 0x610   : > { %v3108_v15 = vadd.f32 %v3107_v27, %v6166_v60  ;;  %v3109_v41 = vpop.f32.mrb[39].mxu0  ;;  %3324 = vmatmul.mubr.bf16.vlgmr.msra.gmra.mrb[32].mxu1 %v3148_v46  ;;  %v3136_v44 = vmax.f32 %v3104_v4, 0.0 }
 0x611   : > { %v4353_v0 = vpop.eup %4352  ;;  %v3110_v9 = vadd.f32 %v3109_v41, %v6170_v45  ;;  %v3137_v12 = vmax.f32 %v3106_v32, 0.0 }
 0x612   : > { %v3138_v33 = vmax.f32 %v3108_v15, 0.0  ;;  %v2926_v16 = vmul.f32 %v4353_v0, %v4351_v6  ;;  %v4355_v20 = vpop.eup %4354 }
 0x613   : > { %v3139_v8 = vmax.f32 %v3110_v9, 0.0 }
 0x614   : > { %v3150_v25 = vpack.c.bf16 %v3138_v33, %v3136_v44  ;;  %2935 = vst [vmem:[#allocation4] sm:$0xff] %v2926_v16  ;;  %v4357_v21 = vpop.eup %4356 }
 0x615   : > { %v3151_v19 = vpack.c.bf16 %v3139_v8, %v3137_v12  ;;  %v3113_v29 = vpop.f32.mrb[40].mxu0  ;;  %v2927_v24 = vmul.f32 %v4357_v21, %v4355_v20 }
 0x616   : > { %v3114_v22 = vadd.f32 %v3113_v29, %v6166_v60  ;;  %v3115_v23 = vpop.f32.mrb[41].mxu0 }
 0x617   : > { %v3116_v50 = vadd.f32 %v3115_v23, %v6170_v45  ;;  %v3117_v51 = vpop.f32.mrb[42].mxu0  ;;  %3331 = vmatprep.mubr.bf16.mxu1 %v3151_v19  ;;  %2936 = vst [vmem:[#allocation4 + $0x8] sm:$0xff] %v2927_v24  ;;  %v2950_v17 = vpack.c.bf16 %v2927_v24, %v2926_v16 }
 0x618   : > { %v3118_v52 = vadd.f32 %v3117_v51, %v6166_v60  ;;  %v3119_v47 = vpop.f32.mrb[43].mxu0  ;;  %3332 = vmatmul.mubr.bf16.gmra.mrb[36].mxu1 %v3150_v25  ;;  %v3140_v11 = vmax.f32 %v3114_v22, 0.0 }
 0x619   : > { %v3120_v1 = vadd.f32 %v3119_v47, %v6170_v45  ;;  %3122 = vmatmul.mubr.bf16.gmra.mrb[44].mxu0 %v2950_v17  ;;  %v3141_v18 = vmax.f32 %v3116_v50, 0.0 }
 0x61a   : > { %v3142_v42 = vmax.f32 %v3118_v52, 0.0 }
 0x61b   : > { %v3143_v49 = vmax.f32 %v3120_v1, 0.0 }
 0x61c   : > { %v3152_v54 = vpack.c.bf16 %v3142_v42, %v3140_v11 }
 0x61d   : > { %v3153_v55 = vpack.c.bf16 %v3143_v49, %v3141_v18 }
 0x61f   : > { %3339 = vmatprep.mubr.bf16.mxu1 %v3153_v55 }
 0x620   : > { %3340 = vmatmul.mubr.bf16.gmra.mrb[40].mxu1 %v3152_v54 }
 0x6e3   : > { %v3720_v56 = vpop.f32.mrb[32].mxu1 }
 0x6e4   : > { %v3721_v59 = vpop.f32.mrb[33].mxu1 }
 0x6e5   : > { %v3722_v61 = vadd.f32 %v3721_v59, %v3720_v56  ;;  %v3723_v5 = vpop.f32.mrb[34].mxu1 }
 0x6e6   : > { %v3724_v38 = vpop.f32.mrb[35].mxu1 }
 0x6e7   : > { %v3326_v3 = vadd.f32 %v3722_v61, %v3683_v58  ;;  %v3725_v34 = vadd.f32 %v3724_v38, %v3723_v5 }
 0x6e9   : > { %3356 = vst [vmem:[%s4769_s14] sm:$0xff] %v3326_v3  ;;  %v3329_v35 = vadd.f32 %v3725_v34, %v3683_v58 }
 0x6eb   : > { %3357 = vst [vmem:[%s4769_s14 + $0x8] sm:$0xff] %v3329_v35  ;;  %v3726_v36 = vpop.f32.mrb[36].mxu1 }
 0x6ec   : > { %v3727_v43 = vpop.f32.mrb[37].mxu1  ;;  %v3123_v30 = vpop.f32.mrb[44].mxu0 }
 0x6ed   : > { %v3728_v28 = vadd.f32 %v3727_v43, %v3726_v36  ;;  %v3729_v39 = vpop.f32.mrb[38].mxu1  ;;  %v3124_v62 = vadd.f32 %v3123_v30, %v6166_v60  ;;  %v3125_v63 = vpop.f32.mrb[45].mxu0 }
 0x6ee   : > { %v3730_v13 = vpop.f32.mrb[39].mxu1  ;;  %v3126_v48 = vadd.f32 %v3125_v63, %v6170_v45  ;;  %v3127_v57 = vpop.f32.mrb[46].mxu0 }
 0x6ef   : > { %v3334_v2 = vadd.f32 %v3728_v28, %v3683_v58  ;;  %v3731_v10 = vadd.f32 %v3730_v13, %v3729_v39  ;;  %v3128_v31 = vadd.f32 %v3127_v57, %v6166_v60  ;;  %v3129_v26 = vpop.f32.mrb[47].mxu0  ;;  %v3144_v46 = vmax.f32 %v3124_v62, 0.0 }
 0x6f0   : > { %v3130_v40 = vadd.f32 %v3129_v26, %v6170_v45  ;;  %v3145_v14 = vmax.f32 %v3126_v48, 0.0 }
 0x6f1   : > { %3358 = vst [vmem:[%s4769_s14 + $0x10] sm:$0xff] %v3334_v2  ;;  %v3337_v53 = vadd.f32 %v3731_v10, %v3683_v58  ;;  %v3146_v37 = vmax.f32 %v3128_v31, 0.0 }
 0x6f2   : > { %v3147_v4 = vmax.f32 %v3130_v40, 0.0 }
 0x6f3   : > { %3359 = vst [vmem:[%s4769_s14 + $0x18] sm:$0xff] %v3337_v53  ;;  %v3732_v7 = vpop.f32.mrb[40].mxu1  ;;  %v3154_v32 = vpack.c.bf16 %v3146_v37, %v3144_v46 }
 0x6f4   : > { %v3733_v27 = vpop.f32.mrb[41].mxu1  ;;  %v3155_v6 = vpack.c.bf16 %v3147_v4, %v3145_v14 }
 0x6f5   : > { %v3734_v15 = vadd.f32 %v3733_v27, %v3732_v7  ;;  %v3735_v41 = vpop.f32.mrb[42].mxu1 }
 0x6f6   : > { %v3736_v60 = vpop.f32.mrb[43].mxu1  ;;  %3347 = vmatprep.mubr.bf16.mxu1 %v3155_v6 }
 0x6f7   : > { %v3342_v0 = vadd.f32 %v3734_v15, %v3683_v58  ;;  %v3737_v45 = vadd.f32 %v3736_v60, %v3735_v41  ;;  %3348 = vmatmul.mubr.bf16.gmra.mrb[44].mxu1 %v3154_v32 }
 0x6f9   : > { %3360 = vst [vmem:[%s4769_s14 + $0x20] sm:$0xff] %v3342_v0  ;;  %v3345_v9 = vadd.f32 %v3737_v45, %v3683_v58 }
 0x6fb   : > { %3361 = vst [vmem:[%s4769_s14 + $0x28] sm:$0xff] %v3345_v9 }
 0x7ca   : > { %v3738_v44 = vpop.f32.mrb[44].mxu1 }
 0x7cb   : > { %v3739_v33 = vpop.f32.mrb[45].mxu1 }
 0x7cc   : > { %v3740_v16 = vadd.f32 %v3739_v33, %v3738_v44  ;;  %v3741_v12 = vpop.f32.mrb[46].mxu1 }
 0x7cd   : > { %v3742_v8 = vpop.f32.mrb[47].mxu1 }
 0x7ce   : > { %v3350_v20 = vadd.f32 %v3740_v16, %v3683_v58  ;;  %v3743_v25 = vadd.f32 %v3742_v8, %v3741_v12 }
 0x7d0   : > { %3362 = vst [vmem:[%s4769_s14 + $0x30] sm:$0xff] %v3350_v20  ;;  %v3353_v21 = vadd.f32 %v3743_v25, %v3683_v58 }
 0x7d2   : > { %3363 = vst [vmem:[%s4769_s14 + $0x38] sm:$0xff] %v3353_v21 }
 0x7d3 PF: > { %s6549_s18 = sld [smem:[#allocation16_spill]]  ;;  %s6550_s17 = sld [smem:[#allocation15_spill]] }
 0x7d9   : > { %s23_s19 = sadd.s32 1, %s6549_s18   ;;  %s6551_s18 = smov %s6553_s26 }
 0x7da   : > { %p20_p10 = scmp.ge.s32.totalorder %s23_s19, 4  }
 0x7dc   :  { %22 = sbr.rel (!%p20_p10) target bundleno = 5 (0x5), region = 117 }
 0x7e3   :  { %3397 = vsyncpa [#allocation9], 1 }
 0x7e4   :  { %3399 = vsyncpa [#allocation9 + $0x1], 1 }
 0x7e5   :  { %3400 = vsyncpa [#allocation11], 1 }

</bundles_post_ra>
